<compile_context>
chip_gen: v7x
topology: tpu7x:2x2x1
jax: 0.10.0
libtpu: 0.0.40
codegen_flags: <defaults>
</compile_context>

<pallas_src>
import numpy as np
import jax
import jax.numpy as jnp
from jax.experimental import pallas as pl
from jax.experimental.pallas import tpu as pltpu


def _round_up(x, m):
    return ((x + m - 1) // m) * m


# ----------------------------------------------------------------------------
# Pallas kernels
# ----------------------------------------------------------------------------
def spectral_mul_kernel(xr_ref, xi_ref, wr_ref, wi_ref, or_ref, oi_ref):
    # One weight group (all m*m retained modes at once) per grid step:
    #   xr/xi : (T, Bp, Cinp)   wr/wi : (T, Cinp, Coutp)   out : (T, Bp, Coutp)
    xr = xr_ref[...]
    xi = xi_ref[...]
    wr = wr_ref[...]
    wi = wi_ref[...]

    def bmm(a, b):
        return jnp.einsum('tbc,tco->tbo', a, b,
                          preferred_element_type=jnp.float32)

    or_ref[...] = bmm(xr, wr) - bmm(xi, wi)
    oi_ref[...] = bmm(xi, wr) + bmm(xr, wi)


def mlp_pool_kernel(a_ref, b_ref, c_ref, d_ref,
                    w1_ref, b1_ref, w2_ref, b2_ref, w3_ref, b3_ref,
                    o_ref, acc_ref):
    # Fused 2x2 max-pool (max of the 4 window corners) + K-tiled fc1 accumulation.
    # On the last K step: bias + ReLU + fc2 + ReLU + fc3.
    k = pl.program_id(0)

    @pl.when(k == 0)
    def _():
        acc_ref[...] = jnp.zeros_like(acc_ref)

    pooled = jnp.maximum(jnp.maximum(a_ref[...], b_ref[...]),
                         jnp.maximum(c_ref[...], d_ref[...]))
    acc_ref[...] += jnp.dot(pooled, w1_ref[...],
                            preferred_element_type=jnp.float32)

    @pl.when(k == pl.num_programs(0) - 1)
    def _():
        h = jnp.maximum(acc_ref[...] + b1_ref[...], 0.0)
        h = jnp.maximum(jnp.dot(h, w2_ref[...],
                                preferred_element_type=jnp.float32) + b2_ref[...], 0.0)
        o_ref[...] = jnp.dot(h, w3_ref[...],
                             preferred_element_type=jnp.float32) + b3_ref[...]


# ----------------------------------------------------------------------------
# Pallas wrappers
# ----------------------------------------------------------------------------
def spectral_mode_mul(xr, xi, wr, wi):
    # xr, xi : (G, T, Bp, Cinp)    wr, wi : (G, T, Cinp, Coutp)
    # G = 2 weight groups (low / high frequency corner); grid=(G,) marked "parallel"
    # so the two groups shard across v7x's two TensorCores (no-op on v5e/v6e).
    G, T, Bp, Cinp = xr.shape
    Coutp = wr.shape[-1]
    x_spec = pl.BlockSpec((None, T, Bp, Cinp), lambda g: (g, 0, 0, 0))
    w_spec = pl.BlockSpec((None, T, Cinp, Coutp), lambda g: (g, 0, 0, 0))
    o_spec = pl.BlockSpec((None, T, Bp, Coutp), lambda g: (g, 0, 0, 0))
    o_shape = jax.ShapeDtypeStruct((G, T, Bp, Coutp), jnp.float32)
    return pl.pallas_call(
        spectral_mul_kernel,
        grid=(G,),
        in_specs=[x_spec, x_spec, w_spec, w_spec],
        out_specs=(o_spec, o_spec),
        out_shape=(o_shape, o_shape),
        compiler_params=pltpu.CompilerParams(dimension_semantics=("parallel",)),
    )(xr, xi, wr, wi)


def spectral_conv2d(x, w1, w2, modes):
    # x : (B, Cin, H, W) float32 -- NCHW
    B, Cin, H, W = x.shape
    Cout = w1.shape[0]
    m = modes
    Wr = W // 2 + 1

    x_ft = jnp.fft.rfft2(x)                       # (B, Cin, H, Wr) complex64
    x_lo = x_ft[:, :, :m, :m]                     # low frequency corner
    x_hi = x_ft[:, :, H - m:, :m]                 # high (negative) frequency corner

    def modes_first(xc):                          # (B, Cin, m, m) -> (m*m, B, Cin)
        return jnp.transpose(xc, (2, 3, 0, 1)).reshape(m * m, B, Cin)

    xs = jnp.stack([modes_first(x_lo), modes_first(x_hi)], axis=0)    # (2,T,B,Cin)

    def w_modes_first(w):                         # (Cout, Cin, m, m, 2) -> (m*m, Cin, Cout, 2)
        return jnp.transpose(w, (2, 3, 1, 0, 4)).reshape(m * m, Cin, Cout, 2)

    ws = jnp.stack([w_modes_first(w1), w_modes_first(w2)], axis=0)    # (2,T,Cin,Cout,2)

    # Modest TPU-friendly padding (zero padding leaves results unchanged):
    #   B -> 8 sublanes, Cin -> multiple of 8, Cout -> 128 lanes.  No more 128x
    #   zero inflation of the Cin axis.
    Bp = max(8, _round_up(B, 8))
    Cinp = max(8, _round_up(Cin, 8))
    Coutp = _round_up(Cout, 128)
    xr = jnp.pad(jnp.real(xs), ((0, 0), (0, 0), (0, Bp - B), (0, Cinp - Cin)))
    xi = jnp.pad(jnp.imag(xs), ((0, 0), (0, 0), (0, Bp - B), (0, Cinp - Cin)))
    wr = jnp.pad(ws[..., 0], ((0, 0), (0, 0), (0, Cinp - Cin), (0, Coutp - Cout)))
    wi = jnp.pad(ws[..., 1], ((0, 0), (0, 0), (0, Cinp - Cin), (0, Coutp - Cout)))

    o_r, o_i = spectral_mode_mul(xr, xi, wr, wi)             # (2, T, Bp, Coutp)
    o_r = o_r[:, :, :B, :Cout]
    o_i = o_i[:, :, :B, :Cout]
    out_c = (o_r + 1j * o_i).astype(jnp.complex64)           # (2, T, B, Cout)

    def back_to_bchw(oc):                          # (T, B, Cout) -> (B, Cout, m, m)
        return jnp.transpose(oc.reshape(m, m, B, Cout), (2, 3, 0, 1))

    out_ft = jnp.zeros((B, Cout, H, Wr), dtype=jnp.complex64)
    out_ft = out_ft.at[:, :, :m, :m].set(back_to_bchw(out_c[0]))
    out_ft = out_ft.at[:, :, H - m:, :m].set(back_to_bchw(out_c[1]))

    return jnp.fft.irfft2(out_ft, s=(H, W))        # (B, Cout, H, W) float32


def pool_corners_flat(x):
    # (B, C, H, W) -> four (B, C*(H//2)*(W//2)) flattened corner views of each 2x2
    # window.  The max itself is fused into the Pallas MLP kernel; XLA fuses these
    # cheap strided slices with the preceding irfft2 epilogue.
    B = x.shape[0]
    a = x[:, :, 0::2, 0::2].reshape(B, -1)
    b = x[:, :, 0::2, 1::2].reshape(B, -1)
    c = x[:, :, 1::2, 0::2].reshape(B, -1)
    d = x[:, :, 1::2, 1::2].reshape(B, -1)
    return a, b, c, d


def _pick_k_tile(K, target=2048):
    # largest multiple-of-128 divisor of K that is <= target; fall back to full K
    best = None
    for kt in range(128, min(K, target) + 1, 128):
        if K % kt == 0:
            best = kt
    return best if best is not None else K


def _full_spec(arr):
    nd = arr.ndim
    return pl.BlockSpec(arr.shape, lambda k, _nd=nd: (0,) * _nd)


def mlp_head(a, b, c, d, w1, b1, w2, b2, w3, b3):
    # Fused pool + 3-layer MLP.  fc1 contraction is K-tiled over the grid so the
    # ~6 MB fc1 weight is streamed/pipelined rather than loaded monolithically.
    B, K = a.shape
    N1, N2, N3 = w1.shape[1], w2.shape[1], w3.shape[1]
    kt = _pick_k_tile(K)            # 1792 for K = 64*14*14 = 12544
    n_k = K // kt

    x_spec = pl.BlockSpec((B, kt), lambda k: (0, k))
    w1_spec = pl.BlockSpec((kt, N1), lambda k: (k, 0))

    return pl.pallas_call(
        mlp_pool_kernel,
        grid=(n_k,),
        in_specs=[x_spec, x_spec, x_spec, x_spec,
                  w1_spec, _full_spec(b1),
                  _full_spec(w2), _full_spec(b2),
                  _full_spec(w3), _full_spec(b3)],
        out_specs=pl.BlockSpec((B, N3), lambda k: (0, 0)),
        out_shape=jax.ShapeDtypeStruct((B, N3), jnp.float32),
        scratch_shapes=[pltpu.VMEM((B, N1), jnp.float32)],
        compiler_params=pltpu.CompilerParams(
            dimension_semantics=("arbitrary",)),   # K is a reduction axis
    )(a, b, c, d, w1, b1, w2, b2, w3, b3)


# ----------------------------------------------------------------------------
# Parameter construction (deterministic, matches the PyTorch module shapes)
# ----------------------------------------------------------------------------
def init_params(key, modes):
    ks = jax.random.split(key, 9)

    def spectral_w(k, cin, cout):
        scale = 1.0 / (cin * cout)
        return scale * jax.random.uniform(k, (cout, cin, modes, modes, 2),
                                          dtype=jnp.float32)

    def linear(k, fan_in, fan_out):
        kw, kb = jax.random.split(k)
        bound = 1.0 / float(np.sqrt(fan_in))
        w = jax.random.uniform(kw, (fan_in, fan_out), minval=-bound, maxval=bound,
                               dtype=jnp.float32)
        b = jax.random.uniform(kb, (1, fan_out), minval=-bound, maxval=bound,
                               dtype=jnp.float32)
        return w, b

    p = {}
    p["conv1_w1"] = spectral_w(ks[0], 1, 16)
    p["conv1_w2"] = spectral_w(ks[1], 1, 16)
    p["conv2_w1"] = spectral_w(ks[2], 16, 32)
    p["conv2_w2"] = spectral_w(ks[3], 16, 32)
    p["conv3_w1"] = spectral_w(ks[4], 32, 64)
    p["conv3_w2"] = spectral_w(ks[5], 32, 64)
    p["fc1_w"], p["fc1_b"] = linear(ks[6], 64 * 14 * 14, 120)
    p["fc2_w"], p["fc2_b"] = linear(ks[7], 120, 84)
    p["fc3_w"], p["fc3_b"] = linear(ks[8], 84, 10)
    return p


# ----------------------------------------------------------------------------
# Forward pass (mirrors SimpleBlock2d.forward)
# ----------------------------------------------------------------------------
def simple_block2d(x, params, modes):
    x = spectral_conv2d(x, params["conv1_w1"], params["conv1_w2"], modes)
    x = jnp.maximum(x, 0.0)          # ReLU fused by XLA into neighbouring FFT ops
    x = spectral_conv2d(x, params["conv2_w1"], params["conv2_w2"], modes)
    x = jnp.maximum(x, 0.0)
    x = spectral_conv2d(x, params["conv3_w1"], params["conv3_w2"], modes)
    a, b, c, d = pool_corners_flat(x)              # NCHW flatten order == PyTorch .view
    x = mlp_head(a, b, c, d,
                 params["fc1_w"], params["fc1_b"],
                 params["fc2_w"], params["fc2_b"],
                 params["fc3_w"], params["fc3_b"])
    return x


if __name__ == "__main__":
    modes = 4
    key = jax.random.PRNGKey(0)
    k_params, k_x = jax.random.split(key)
    params = init_params(k_params, modes)

    # fc1 expects 64*14*14 features after a 2x2 pool -> input spatial must be 28x28.
    x = jax.random.normal(k_x, (2, 1, 28, 28), dtype=jnp.float32)

    fwd = jax.jit(lambda xx: simple_block2d(xx, params, modes))
    out = fwd(x)
    out = jax.block_until_ready(out)
    assert out.shape == (2, 10), out.shape
    assert bool(jnp.all(jnp.isfinite(out)))
    print("KERNEL_OK")
</pallas_src>

<mosaic_0001>
module attributes {stable_mosaic.version = 11 : i64} {
  func.func @spectral_mul_kernel(%arg0: i32, %arg1: memref<1x16x8x8xf32, #tpu.memory_space<vmem>>, %arg2: memref<1x16x8x8xf32, #tpu.memory_space<vmem>>, %arg3: memref<1x16x8x128xf32, #tpu.memory_space<vmem>>, %arg4: memref<1x16x8x128xf32, #tpu.memory_space<vmem>>, %arg5: memref<1x16x8x128xf32, #tpu.memory_space<vmem>>, %arg6: memref<1x16x8x128xf32, #tpu.memory_space<vmem>>) attributes {dimension_semantics = [#tpu.dimension_semantics<parallel>], iteration_bounds = array<i64: 2>, scalar_prefetch = 0 : i64, scratch_operands = 0 : i64, tpu.core_type = #tpu.core_type<tc>, window_params = [{transform_indices = @transform_0, window_bounds = array<i64: 1, 16, 8, 8>}, {transform_indices = @transform_1, window_bounds = array<i64: 1, 16, 8, 8>}, {transform_indices = @transform_2, window_bounds = array<i64: 1, 16, 8, 128>}, {transform_indices = @transform_3, window_bounds = array<i64: 1, 16, 8, 128>}, {transform_indices = @transform_4, window_bounds = array<i64: 1, 16, 8, 128>}, {transform_indices = @transform_5, window_bounds = array<i64: 1, 16, 8, 128>}]} {
    %c0 = arith.constant 0 : index
    %c0_0 = arith.constant 0 : index
    %c0_1 = arith.constant 0 : index
    %c0_2 = arith.constant 0 : index
    %0 = vector.load %arg1[%c0, %c0_0, %c0_1, %c0_2] : memref<1x16x8x8xf32, #tpu.memory_space<vmem>>, vector<1x16x8x8xf32>
    %1 = vector.shape_cast %0 : vector<1x16x8x8xf32> to vector<16x8x8xf32>
    %c0_3 = arith.constant 0 : index
    %c0_4 = arith.constant 0 : index
    %c0_5 = arith.constant 0 : index
    %c0_6 = arith.constant 0 : index
    %2 = vector.load %arg2[%c0_3, %c0_4, %c0_5, %c0_6] : memref<1x16x8x8xf32, #tpu.memory_space<vmem>>, vector<1x16x8x8xf32>
    %3 = vector.shape_cast %2 : vector<1x16x8x8xf32> to vector<16x8x8xf32>
    %c0_7 = arith.constant 0 : index
    %c0_8 = arith.constant 0 : index
    %c0_9 = arith.constant 0 : index
    %c0_10 = arith.constant 0 : index
    %4 = vector.load %arg3[%c0_7, %c0_8, %c0_9, %c0_10] : memref<1x16x8x128xf32, #tpu.memory_space<vmem>>, vector<1x16x8x128xf32>
    %5 = vector.shape_cast %4 : vector<1x16x8x128xf32> to vector<16x8x128xf32>
    %c0_11 = arith.constant 0 : index
    %c0_12 = arith.constant 0 : index
    %c0_13 = arith.constant 0 : index
    %c0_14 = arith.constant 0 : index
    %6 = vector.load %arg4[%c0_11, %c0_12, %c0_13, %c0_14] : memref<1x16x8x128xf32, #tpu.memory_space<vmem>>, vector<1x16x8x128xf32>
    %7 = vector.shape_cast %6 : vector<1x16x8x128xf32> to vector<16x8x128xf32>
    "tpu.trace_start"() <{level = 10 : i32, message = "tbc,tco->tbo"}> : () -> ()
    %cst = arith.constant dense<0.000000e+00> : vector<16x8x128xf32>
    %8 = tpu.matmul %1, %5, %cst {dimension_numbers = #tpu.dot_dimension_numbers<[2], [1], [1], [2], [0, 0, 0, 1, 1, 2], [0], [0]>} : vector<16x8x8xf32>, vector<16x8x128xf32>, vector<16x8x128xf32> -> vector<16x8x128xf32>
    %cst_15 = arith.constant dense<0.000000e+00> : vector<16x8x128xf32>
    %9 = tpu.matmul %3, %7, %cst_15 {dimension_numbers = #tpu.dot_dimension_numbers<[2], [1], [1], [2], [0, 0, 0, 1, 1, 2], [0], [0]>} : vector<16x8x8xf32>, vector<16x8x128xf32>, vector<16x8x128xf32> -> vector<16x8x128xf32>
    "tpu.trace_stop"() : () -> ()
    %10 = arith.subf %8, %9 : vector<16x8x128xf32>
    %c0_16 = arith.constant 0 : index
    %c0_17 = arith.constant 0 : index
    %c0_18 = arith.constant 0 : index
    %c0_19 = arith.constant 0 : index
    %11 = vector.load %arg5[%c0_16, %c0_17, %c0_18, %c0_19] : memref<1x16x8x128xf32, #tpu.memory_space<vmem>>, vector<1x16x8x128xf32>
    %12 = vector.shape_cast %11 : vector<1x16x8x128xf32> to vector<16x8x128xf32>
    %13 = vector.shape_cast %10 : vector<16x8x128xf32> to vector<1x16x8x128xf32>
    tpu.vector_store %arg5[%c0_16, %c0_17, %c0_18, %c0_19], %13 {strides = array<i32>} : memref<1x16x8x128xf32, #tpu.memory_space<vmem>>, vector<1x16x8x128xf32>,
    "tpu.trace_start"() <{level = 10 : i32, message = "tbc,tco->tbo"}> : () -> ()
    %cst_20 = arith.constant dense<0.000000e+00> : vector<16x8x128xf32>
    %14 = tpu.matmul %3, %5, %cst_20 {dimension_numbers = #tpu.dot_dimension_numbers<[2], [1], [1], [2], [0, 0, 0, 1, 1, 2], [0], [0]>} : vector<16x8x8xf32>, vector<16x8x128xf32>, vector<16x8x128xf32> -> vector<16x8x128xf32>
    %cst_21 = arith.constant dense<0.000000e+00> : vector<16x8x128xf32>
    %15 = tpu.matmul %1, %7, %cst_21 {dimension_numbers = #tpu.dot_dimension_numbers<[2], [1], [1], [2], [0, 0, 0, 1, 1, 2], [0], [0]>} : vector<16x8x8xf32>, vector<16x8x128xf32>, vector<16x8x128xf32> -> vector<16x8x128xf32>
    "tpu.trace_stop"() : () -> ()
    %16 = arith.addf %14, %15 : vector<16x8x128xf32>
    %c0_22 = arith.constant 0 : index
    %c0_23 = arith.constant 0 : index
    %c0_24 = arith.constant 0 : index
    %c0_25 = arith.constant 0 : index
    %17 = vector.load %arg6[%c0_22, %c0_23, %c0_24, %c0_25] : memref<1x16x8x128xf32, #tpu.memory_space<vmem>>, vector<1x16x8x128xf32>
    %18 = vector.shape_cast %17 : vector<1x16x8x128xf32> to vector<16x8x128xf32>
    %19 = vector.shape_cast %16 : vector<16x8x128xf32> to vector<1x16x8x128xf32>
    tpu.vector_store %arg6[%c0_22, %c0_23, %c0_24, %c0_25], %19 {strides = array<i32>} : memref<1x16x8x128xf32, #tpu.memory_space<vmem>>, vector<1x16x8x128xf32>,
    return
  }
  func.func @transform_0(%arg0: i32) -> (i32, i32, i32, i32) {
    %c0_i32 = arith.constant 0 : i32
    %c0_i32_0 = arith.constant 0 : i32
    %c0_i32_1 = arith.constant 0 : i32
    %c0_i32_2 = arith.constant 0 : i32
    return %arg0, %c0_i32, %c0_i32_0, %c0_i32_1 : i32, i32, i32, i32
  }
  func.func @transform_1(%arg0: i32) -> (i32, i32, i32, i32) {
    %c0_i32 = arith.constant 0 : i32
    %c0_i32_0 = arith.constant 0 : i32
    %c0_i32_1 = arith.constant 0 : i32
    %c0_i32_2 = arith.constant 0 : i32
    return %arg0, %c0_i32, %c0_i32_0, %c0_i32_1 : i32, i32, i32, i32
  }
  func.func @transform_2(%arg0: i32) -> (i32, i32, i32, i32) {
    %c0_i32 = arith.constant 0 : i32
    %c0_i32_0 = arith.constant 0 : i32
    %c0_i32_1 = arith.constant 0 : i32
    %c0_i32_2 = arith.constant 0 : i32
    return %arg0, %c0_i32, %c0_i32_0, %c0_i32_1 : i32, i32, i32, i32
  }
  func.func @transform_3(%arg0: i32) -> (i32, i32, i32, i32) {
    %c0_i32 = arith.constant 0 : i32
    %c0_i32_0 = arith.constant 0 : i32
    %c0_i32_1 = arith.constant 0 : i32
    %c0_i32_2 = arith.constant 0 : i32
    return %arg0, %c0_i32, %c0_i32_0, %c0_i32_1 : i32, i32, i32, i32
  }
  func.func @transform_4(%arg0: i32) -> (i32, i32, i32, i32) {
    %c0_i32 = arith.constant 0 : i32
    %c0_i32_0 = arith.constant 0 : i32
    %c0_i32_1 = arith.constant 0 : i32
    %c0_i32_2 = arith.constant 0 : i32
    return %arg0, %c0_i32, %c0_i32_0, %c0_i32_1 : i32, i32, i32, i32
  }
  func.func @transform_5(%arg0: i32) -> (i32, i32, i32, i32) {
    %c0_i32 = arith.constant 0 : i32
    %c0_i32_0 = arith.constant 0 : i32
    %c0_i32_1 = arith.constant 0 : i32
    %c0_i32_2 = arith.constant 0 : i32
    return %arg0, %c0_i32, %c0_i32_0, %c0_i32_1 : i32, i32, i32, i32
  }
}

module attributes {stable_mosaic.version = 11 : i64} {
  func.func @spectral_mul_kernel(%arg0: i32, %arg1: memref<1x16x8x16xf32, #tpu.memory_space<vmem>>, %arg2: memref<1x16x8x16xf32, #tpu.memory_space<vmem>>, %arg3: memref<1x16x16x128xf32, #tpu.memory_space<vmem>>, %arg4: memref<1x16x16x128xf32, #tpu.memory_space<vmem>>, %arg5: memref<1x16x8x128xf32, #tpu.memory_space<vmem>>, %arg6: memref<1x16x8x128xf32, #tpu.memory_space<vmem>>) attributes {dimension_semantics = [#tpu.dimension_semantics<parallel>], iteration_bounds = array<i64: 2>, scalar_prefetch = 0 : i64, scratch_operands = 0 : i64, tpu.core_type = #tpu.core_type<tc>, window_params = [{transform_indices = @transform_0, window_bounds = array<i64: 1, 16, 8, 16>}, {transform_indices = @transform_1, window_bounds = array<i64: 1, 16, 8, 16>}, {transform_indices = @transform_2, window_bounds = array<i64: 1, 16, 16, 128>}, {transform_indices = @transform_3, window_bounds = array<i64: 1, 16, 16, 128>}, {transform_indices = @transform_4, window_bounds = array<i64: 1, 16, 8, 128>}, {transform_indices = @transform_5, window_bounds = array<i64: 1, 16, 8, 128>}]} {
    %c0 = arith.constant 0 : index
    %c0_0 = arith.constant 0 : index
    %c0_1 = arith.constant 0 : index
    %c0_2 = arith.constant 0 : index
    %0 = vector.load %arg1[%c0, %c0_0, %c0_1, %c0_2] : memref<1x16x8x16xf32, #tpu.memory_space<vmem>>, vector<1x16x8x16xf32>
    %1 = vector.shape_cast %0 : vector<1x16x8x16xf32> to vector<16x8x16xf32>
    %c0_3 = arith.constant 0 : index
    %c0_4 = arith.constant 0 : index
    %c0_5 = arith.constant 0 : index
    %c0_6 = arith.constant 0 : index
    %2 = vector.load %arg2[%c0_3, %c0_4, %c0_5, %c0_6] : memref<1x16x8x16xf32, #tpu.memory_space<vmem>>, vector<1x16x8x16xf32>
    %3 = vector.shape_cast %2 : vector<1x16x8x16xf32> to vector<16x8x16xf32>
    %c0_7 = arith.constant 0 : index
    %c0_8 = arith.constant 0 : index
    %c0_9 = arith.constant 0 : index
    %c0_10 = arith.constant 0 : index
    %4 = vector.load %arg3[%c0_7, %c0_8, %c0_9, %c0_10] : memref<1x16x16x128xf32, #tpu.memory_space<vmem>>, vector<1x16x16x128xf32>
    %5 = vector.shape_cast %4 : vector<1x16x16x128xf32> to vector<16x16x128xf32>
    %c0_11 = arith.constant 0 : index
    %c0_12 = arith.constant 0 : index
    %c0_13 = arith.constant 0 : index
    %c0_14 = arith.constant 0 : index
    %6 = vector.load %arg4[%c0_11, %c0_12, %c0_13, %c0_14] : memref<1x16x16x128xf32, #tpu.memory_space<vmem>>, vector<1x16x16x128xf32>
    %7 = vector.shape_cast %6 : vector<1x16x16x128xf32> to vector<16x16x128xf32>
    "tpu.trace_start"() <{level = 10 : i32, message = "tbc,tco->tbo"}> : () -> ()
    %cst = arith.constant dense<0.000000e+00> : vector<16x8x128xf32>
    %8 = tpu.matmul %1, %5, %cst {dimension_numbers = #tpu.dot_dimension_numbers<[2], [1], [1], [2], [0, 0, 0, 1, 1, 2], [0], [0]>} : vector<16x8x16xf32>, vector<16x16x128xf32>, vector<16x8x128xf32> -> vector<16x8x128xf32>
    %cst_15 = arith.constant dense<0.000000e+00> : vector<16x8x128xf32>
    %9 = tpu.matmul %3, %7, %cst_15 {dimension_numbers = #tpu.dot_dimension_numbers<[2], [1], [1], [2], [0, 0, 0, 1, 1, 2], [0], [0]>} : vector<16x8x16xf32>, vector<16x16x128xf32>, vector<16x8x128xf32> -> vector<16x8x128xf32>
    "tpu.trace_stop"() : () -> ()
    %10 = arith.subf %8, %9 : vector<16x8x128xf32>
    %c0_16 = arith.constant 0 : index
    %c0_17 = arith.constant 0 : index
    %c0_18 = arith.constant 0 : index
    %c0_19 = arith.constant 0 : index
    %11 = vector.load %arg5[%c0_16, %c0_17, %c0_18, %c0_19] : memref<1x16x8x128xf32, #tpu.memory_space<vmem>>, vector<1x16x8x128xf32>
    %12 = vector.shape_cast %11 : vector<1x16x8x128xf32> to vector<16x8x128xf32>
    %13 = vector.shape_cast %10 : vector<16x8x128xf32> to vector<1x16x8x128xf32>
    tpu.vector_store %arg5[%c0_16, %c0_17, %c0_18, %c0_19], %13 {strides = array<i32>} : memref<1x16x8x128xf32, #tpu.memory_space<vmem>>, vector<1x16x8x128xf32>,
    "tpu.trace_start"() <{level = 10 : i32, message = "tbc,tco->tbo"}> : () -> ()
    %cst_20 = arith.constant dense<0.000000e+00> : vector<16x8x128xf32>
    %14 = tpu.matmul %3, %5, %cst_20 {dimension_numbers = #tpu.dot_dimension_numbers<[2], [1], [1], [2], [0, 0, 0, 1, 1, 2], [0], [0]>} : vector<16x8x16xf32>, vector<16x16x128xf32>, vector<16x8x128xf32> -> vector<16x8x128xf32>
    %cst_21 = arith.constant dense<0.000000e+00> : vector<16x8x128xf32>
    %15 = tpu.matmul %1, %7, %cst_21 {dimension_numbers = #tpu.dot_dimension_numbers<[2], [1], [1], [2], [0, 0, 0, 1, 1, 2], [0], [0]>} : vector<16x8x16xf32>, vector<16x16x128xf32>, vector<16x8x128xf32> -> vector<16x8x128xf32>
    "tpu.trace_stop"() : () -> ()
    %16 = arith.addf %14, %15 : vector<16x8x128xf32>
    %c0_22 = arith.constant 0 : index
    %c0_23 = arith.constant 0 : index
    %c0_24 = arith.constant 0 : index
    %c0_25 = arith.constant 0 : index
    %17 = vector.load %arg6[%c0_22, %c0_23, %c0_24, %c0_25] : memref<1x16x8x128xf32, #tpu.memory_space<vmem>>, vector<1x16x8x128xf32>
    %18 = vector.shape_cast %17 : vector<1x16x8x128xf32> to vector<16x8x128xf32>
    %19 = vector.shape_cast %16 : vector<16x8x128xf32> to vector<1x16x8x128xf32>
    tpu.vector_store %arg6[%c0_22, %c0_23, %c0_24, %c0_25], %19 {strides = array<i32>} : memref<1x16x8x128xf32, #tpu.memory_space<vmem>>, vector<1x16x8x128xf32>,
    return
  }
  func.func @transform_0(%arg0: i32) -> (i32, i32, i32, i32) {
    %c0_i32 = arith.constant 0 : i32
    %c0_i32_0 = arith.constant 0 : i32
    %c0_i32_1 = arith.constant 0 : i32
    %c0_i32_2 = arith.constant 0 : i32
    return %arg0, %c0_i32, %c0_i32_0, %c0_i32_1 : i32, i32, i32, i32
  }
  func.func @transform_1(%arg0: i32) -> (i32, i32, i32, i32) {
    %c0_i32 = arith.constant 0 : i32
    %c0_i32_0 = arith.constant 0 : i32
    %c0_i32_1 = arith.constant 0 : i32
    %c0_i32_2 = arith.constant 0 : i32
    return %arg0, %c0_i32, %c0_i32_0, %c0_i32_1 : i32, i32, i32, i32
  }
  func.func @transform_2(%arg0: i32) -> (i32, i32, i32, i32) {
    %c0_i32 = arith.constant 0 : i32
    %c0_i32_0 = arith.constant 0 : i32
    %c0_i32_1 = arith.constant 0 : i32
    %c0_i32_2 = arith.constant 0 : i32
    return %arg0, %c0_i32, %c0_i32_0, %c0_i32_1 : i32, i32, i32, i32
  }
  func.func @transform_3(%arg0: i32) -> (i32, i32, i32, i32) {
    %c0_i32 = arith.constant 0 : i32
    %c0_i32_0 = arith.constant 0 : i32
    %c0_i32_1 = arith.constant 0 : i32
    %c0_i32_2 = arith.constant 0 : i32
    return %arg0, %c0_i32, %c0_i32_0, %c0_i32_1 : i32, i32, i32, i32
  }
  func.func @transform_4(%arg0: i32) -> (i32, i32, i32, i32) {
    %c0_i32 = arith.constant 0 : i32
    %c0_i32_0 = arith.constant 0 : i32
    %c0_i32_1 = arith.constant 0 : i32
    %c0_i32_2 = arith.constant 0 : i32
    return %arg0, %c0_i32, %c0_i32_0, %c0_i32_1 : i32, i32, i32, i32
  }
  func.func @transform_5(%arg0: i32) -> (i32, i32, i32, i32) {
    %c0_i32 = arith.constant 0 : i32
    %c0_i32_0 = arith.constant 0 : i32
    %c0_i32_1 = arith.constant 0 : i32
    %c0_i32_2 = arith.constant 0 : i32
    return %arg0, %c0_i32, %c0_i32_0, %c0_i32_1 : i32, i32, i32, i32
  }
}

module attributes {stable_mosaic.version = 11 : i64} {
  func.func @spectral_mul_kernel(%arg0: i32, %arg1: memref<1x16x8x32xf32, #tpu.memory_space<vmem>>, %arg2: memref<1x16x8x32xf32, #tpu.memory_space<vmem>>, %arg3: memref<1x16x32x128xf32, #tpu.memory_space<vmem>>, %arg4: memref<1x16x32x128xf32, #tpu.memory_space<vmem>>, %arg5: memref<1x16x8x128xf32, #tpu.memory_space<vmem>>, %arg6: memref<1x16x8x128xf32, #tpu.memory_space<vmem>>) attributes {dimension_semantics = [#tpu.dimension_semantics<parallel>], iteration_bounds = array<i64: 2>, scalar_prefetch = 0 : i64, scratch_operands = 0 : i64, tpu.core_type = #tpu.core_type<tc>, window_params = [{transform_indices = @transform_0, window_bounds = array<i64: 1, 16, 8, 32>}, {transform_indices = @transform_1, window_bounds = array<i64: 1, 16, 8, 32>}, {transform_indices = @transform_2, window_bounds = array<i64: 1, 16, 32, 128>}, {transform_indices = @transform_3, window_bounds = array<i64: 1, 16, 32, 128>}, {transform_indices = @transform_4, window_bounds = array<i64: 1, 16, 8, 128>}, {transform_indices = @transform_5, window_bounds = array<i64: 1, 16, 8, 128>}]} {
    %c0 = arith.constant 0 : index
    %c0_0 = arith.constant 0 : index
    %c0_1 = arith.constant 0 : index
    %c0_2 = arith.constant 0 : index
    %0 = vector.load %arg1[%c0, %c0_0, %c0_1, %c0_2] : memref<1x16x8x32xf32, #tpu.memory_space<vmem>>, vector<1x16x8x32xf32>
    %1 = vector.shape_cast %0 : vector<1x16x8x32xf32> to vector<16x8x32xf32>
    %c0_3 = arith.constant 0 : index
    %c0_4 = arith.constant 0 : index
    %c0_5 = arith.constant 0 : index
    %c0_6 = arith.constant 0 : index
    %2 = vector.load %arg2[%c0_3, %c0_4, %c0_5, %c0_6] : memref<1x16x8x32xf32, #tpu.memory_space<vmem>>, vector<1x16x8x32xf32>
    %3 = vector.shape_cast %2 : vector<1x16x8x32xf32> to vector<16x8x32xf32>
    %c0_7 = arith.constant 0 : index
    %c0_8 = arith.constant 0 : index
    %c0_9 = arith.constant 0 : index
    %c0_10 = arith.constant 0 : index
    %4 = vector.load %arg3[%c0_7, %c0_8, %c0_9, %c0_10] : memref<1x16x32x128xf32, #tpu.memory_space<vmem>>, vector<1x16x32x128xf32>
    %5 = vector.shape_cast %4 : vector<1x16x32x128xf32> to vector<16x32x128xf32>
    %c0_11 = arith.constant 0 : index
    %c0_12 = arith.constant 0 : index
    %c0_13 = arith.constant 0 : index
    %c0_14 = arith.constant 0 : index
    %6 = vector.load %arg4[%c0_11, %c0_12, %c0_13, %c0_14] : memref<1x16x32x128xf32, #tpu.memory_space<vmem>>, vector<1x16x32x128xf32>
    %7 = vector.shape_cast %6 : vector<1x16x32x128xf32> to vector<16x32x128xf32>
    "tpu.trace_start"() <{level = 10 : i32, message = "tbc,tco->tbo"}> : () -> ()
    %cst = arith.constant dense<0.000000e+00> : vector<16x8x128xf32>
    %8 = tpu.matmul %1, %5, %cst {dimension_numbers = #tpu.dot_dimension_numbers<[2], [1], [1], [2], [0, 0, 0, 1, 1, 2], [0], [0]>} : vector<16x8x32xf32>, vector<16x32x128xf32>, vector<16x8x128xf32> -> vector<16x8x128xf32>
    %cst_15 = arith.constant dense<0.000000e+00> : vector<16x8x128xf32>
    %9 = tpu.matmul %3, %7, %cst_15 {dimension_numbers = #tpu.dot_dimension_numbers<[2], [1], [1], [2], [0, 0, 0, 1, 1, 2], [0], [0]>} : vector<16x8x32xf32>, vector<16x32x128xf32>, vector<16x8x128xf32> -> vector<16x8x128xf32>
    "tpu.trace_stop"() : () -> ()
    %10 = arith.subf %8, %9 : vector<16x8x128xf32>
    %c0_16 = arith.constant 0 : index
    %c0_17 = arith.constant 0 : index
    %c0_18 = arith.constant 0 : index
    %c0_19 = arith.constant 0 : index
    %11 = vector.load %arg5[%c0_16, %c0_17, %c0_18, %c0_19] : memref<1x16x8x128xf32, #tpu.memory_space<vmem>>, vector<1x16x8x128xf32>
    %12 = vector.shape_cast %11 : vector<1x16x8x128xf32> to vector<16x8x128xf32>
    %13 = vector.shape_cast %10 : vector<16x8x128xf32> to vector<1x16x8x128xf32>
    tpu.vector_store %arg5[%c0_16, %c0_17, %c0_18, %c0_19], %13 {strides = array<i32>} : memref<1x16x8x128xf32, #tpu.memory_space<vmem>>, vector<1x16x8x128xf32>,
    "tpu.trace_start"() <{level = 10 : i32, message = "tbc,tco->tbo"}> : () -> ()
    %cst_20 = arith.constant dense<0.000000e+00> : vector<16x8x128xf32>
    %14 = tpu.matmul %3, %5, %cst_20 {dimension_numbers = #tpu.dot_dimension_numbers<[2], [1], [1], [2], [0, 0, 0, 1, 1, 2], [0], [0]>} : vector<16x8x32xf32>, vector<16x32x128xf32>, vector<16x8x128xf32> -> vector<16x8x128xf32>
    %cst_21 = arith.constant dense<0.000000e+00> : vector<16x8x128xf32>
    %15 = tpu.matmul %1, %7, %cst_21 {dimension_numbers = #tpu.dot_dimension_numbers<[2], [1], [1], [2], [0, 0, 0, 1, 1, 2], [0], [0]>} : vector<16x8x32xf32>, vector<16x32x128xf32>, vector<16x8x128xf32> -> vector<16x8x128xf32>
    "tpu.trace_stop"() : () -> ()
    %16 = arith.addf %14, %15 : vector<16x8x128xf32>
    %c0_22 = arith.constant 0 : index
    %c0_23 = arith.constant 0 : index
    %c0_24 = arith.constant 0 : index
    %c0_25 = arith.constant 0 : index
    %17 = vector.load %arg6[%c0_22, %c0_23, %c0_24, %c0_25] : memref<1x16x8x128xf32, #tpu.memory_space<vmem>>, vector<1x16x8x128xf32>
    %18 = vector.shape_cast %17 : vector<1x16x8x128xf32> to vector<16x8x128xf32>
    %19 = vector.shape_cast %16 : vector<16x8x128xf32> to vector<1x16x8x128xf32>
    tpu.vector_store %arg6[%c0_22, %c0_23, %c0_24, %c0_25], %19 {strides = array<i32>} : memref<1x16x8x128xf32, #tpu.memory_space<vmem>>, vector<1x16x8x128xf32>,
    return
  }
  func.func @transform_0(%arg0: i32) -> (i32, i32, i32, i32) {
    %c0_i32 = arith.constant 0 : i32
    %c0_i32_0 = arith.constant 0 : i32
    %c0_i32_1 = arith.constant 0 : i32
    %c0_i32_2 = arith.constant 0 : i32
    return %arg0, %c0_i32, %c0_i32_0, %c0_i32_1 : i32, i32, i32, i32
  }
  func.func @transform_1(%arg0: i32) -> (i32, i32, i32, i32) {
    %c0_i32 = arith.constant 0 : i32
    %c0_i32_0 = arith.constant 0 : i32
    %c0_i32_1 = arith.constant 0 : i32
    %c0_i32_2 = arith.constant 0 : i32
    return %arg0, %c0_i32, %c0_i32_0, %c0_i32_1 : i32, i32, i32, i32
  }
  func.func @transform_2(%arg0: i32) -> (i32, i32, i32, i32) {
    %c0_i32 = arith.constant 0 : i32
    %c0_i32_0 = arith.constant 0 : i32
    %c0_i32_1 = arith.constant 0 : i32
    %c0_i32_2 = arith.constant 0 : i32
    return %arg0, %c0_i32, %c0_i32_0, %c0_i32_1 : i32, i32, i32, i32
  }
  func.func @transform_3(%arg0: i32) -> (i32, i32, i32, i32) {
    %c0_i32 = arith.constant 0 : i32
    %c0_i32_0 = arith.constant 0 : i32
    %c0_i32_1 = arith.constant 0 : i32
    %c0_i32_2 = arith.constant 0 : i32
    return %arg0, %c0_i32, %c0_i32_0, %c0_i32_1 : i32, i32, i32, i32
  }
  func.func @transform_4(%arg0: i32) -> (i32, i32, i32, i32) {
    %c0_i32 = arith.constant 0 : i32
    %c0_i32_0 = arith.constant 0 : i32
    %c0_i32_1 = arith.constant 0 : i32
    %c0_i32_2 = arith.constant 0 : i32
    return %arg0, %c0_i32, %c0_i32_0, %c0_i32_1 : i32, i32, i32, i32
  }
  func.func @transform_5(%arg0: i32) -> (i32, i32, i32, i32) {
    %c0_i32 = arith.constant 0 : i32
    %c0_i32_0 = arith.constant 0 : i32
    %c0_i32_1 = arith.constant 0 : i32
    %c0_i32_2 = arith.constant 0 : i32
    return %arg0, %c0_i32, %c0_i32_0, %c0_i32_1 : i32, i32, i32, i32
  }
}

module attributes {stable_mosaic.version = 11 : i64} {
  func.func @mlp_pool_kernel(%arg0: i32, %arg1: memref<2x1792xf32, #tpu.memory_space<vmem>>, %arg2: memref<2x1792xf32, #tpu.memory_space<vmem>>, %arg3: memref<2x1792xf32, #tpu.memory_space<vmem>>, %arg4: memref<2x1792xf32, #tpu.memory_space<vmem>>, %arg5: memref<1792x120xf32, #tpu.memory_space<vmem>>, %arg6: memref<1x120xf32, #tpu.memory_space<vmem>>, %arg7: memref<120x84xf32, #tpu.memory_space<vmem>>, %arg8: memref<1x84xf32, #tpu.memory_space<vmem>>, %arg9: memref<84x10xf32, #tpu.memory_space<vmem>>, %arg10: memref<1x10xf32, #tpu.memory_space<vmem>>, %arg11: memref<2x10xf32, #tpu.memory_space<vmem>>, %arg12: memref<2x120xf32, #tpu.memory_space<vmem>>) attributes {dimension_semantics = [#tpu.dimension_semantics<arbitrary>], iteration_bounds = array<i64: 7>, scalar_prefetch = 0 : i64, scratch_operands = 1 : i64, tpu.core_type = #tpu.core_type<tc>, window_params = [{transform_indices = @transform_0, window_bounds = array<i64: 2, 1792>}, {transform_indices = @transform_1, window_bounds = array<i64: 2, 1792>}, {transform_indices = @transform_2, window_bounds = array<i64: 2, 1792>}, {transform_indices = @transform_3, window_bounds = array<i64: 2, 1792>}, {transform_indices = @transform_4, window_bounds = array<i64: 1792, 120>}, {pipeline_mode = #tpu.pipeline_mode<synchronous>, transform_indices = @transform_5, window_bounds = array<i64: 1, 120>}, {pipeline_mode = #tpu.pipeline_mode<synchronous>, transform_indices = @transform_6, window_bounds = array<i64: 120, 84>}, {pipeline_mode = #tpu.pipeline_mode<synchronous>, transform_indices = @transform_7, window_bounds = array<i64: 1, 84>}, {pipeline_mode = #tpu.pipeline_mode<synchronous>, transform_indices = @transform_8, window_bounds = array<i64: 84, 10>}, {pipeline_mode = #tpu.pipeline_mode<synchronous>, transform_indices = @transform_9, window_bounds = array<i64: 1, 10>}, {pipeline_mode = #tpu.pipeline_mode<synchronous>, transform_indices = @transform_10, window_bounds = array<i64: 2, 10>}]} {
    %c0_i32 = arith.constant 0 : i32
    %0 = arith.cmpi eq, %arg0, %c0_i32 : i32
    %1 = arith.extui %0 : i1 to i32
    %c0_i32_0 = arith.constant 0 : i32
    %2 = arith.cmpi ne, %1, %c0_i32_0 : i32
    scf.if %2 {
      %cst_15 = arith.constant 0.000000e+00 : f32
      %18 = vector.broadcast %cst_15 : f32 to vector<2x120xf32>
      %c0_16 = arith.constant 0 : index
      %c0_17 = arith.constant 0 : index
      %19 = vector.load %arg12[%c0_16, %c0_17] : memref<2x120xf32, #tpu.memory_space<vmem>>, vector<2x120xf32>
      tpu.vector_store %arg12[%c0_16, %c0_17], %18 {strides = array<i32>} : memref<2x120xf32, #tpu.memory_space<vmem>>, vector<2x120xf32>,
    } else {
    }
    %c0 = arith.constant 0 : index
    %c0_1 = arith.constant 0 : index
    %3 = vector.load %arg1[%c0, %c0_1] : memref<2x1792xf32, #tpu.memory_space<vmem>>, vector<2x1792xf32>
    %c0_2 = arith.constant 0 : index
    %c0_3 = arith.constant 0 : index
    %4 = vector.load %arg2[%c0_2, %c0_3] : memref<2x1792xf32, #tpu.memory_space<vmem>>, vector<2x1792xf32>
    %5 = arith.maximumf %3, %4 : vector<2x1792xf32>
    %c0_4 = arith.constant 0 : index
    %c0_5 = arith.constant 0 : index
    %6 = vector.load %arg3[%c0_4, %c0_5] : memref<2x1792xf32, #tpu.memory_space<vmem>>, vector<2x1792xf32>
    %c0_6 = arith.constant 0 : index
    %c0_7 = arith.constant 0 : index
    %7 = vector.load %arg4[%c0_6, %c0_7] : memref<2x1792xf32, #tpu.memory_space<vmem>>, vector<2x1792xf32>
    %8 = arith.maximumf %6, %7 : vector<2x1792xf32>
    %9 = arith.maximumf %5, %8 : vector<2x1792xf32>
    %c0_8 = arith.constant 0 : index
    %c0_9 = arith.constant 0 : index
    %10 = vector.load %arg12[%c0_8, %c0_9] : memref<2x120xf32, #tpu.memory_space<vmem>>, vector<2x120xf32>
    %c0_10 = arith.constant 0 : index
    %c0_11 = arith.constant 0 : index
    %11 = vector.load %arg5[%c0_10, %c0_11] : memref<1792x120xf32, #tpu.memory_space<vmem>>, vector<1792x120xf32>
    %cst = arith.constant dense<0.000000e+00> : vector<2x120xf32>
    %12 = tpu.matmul %9, %11, %cst {dimension_numbers = #tpu.dot_dimension_numbers<[1], [0], [0], [1], [0, 0, 1, 1], [], []>} : vector<2x1792xf32>, vector<1792x120xf32>, vector<2x120xf32> -> vector<2x120xf32>
    %13 = arith.addf %10, %12 : vector<2x120xf32>
    %c0_12 = arith.constant 0 : index
    %c0_13 = arith.constant 0 : index
    %14 = vector.load %arg12[%c0_12, %c0_13] : memref<2x120xf32, #tpu.memory_space<vmem>>, vector<2x120xf32>
    tpu.vector_store %arg12[%c0_12, %c0_13], %13 {strides = array<i32>} : memref<2x120xf32, #tpu.memory_space<vmem>>, vector<2x120xf32>,
    %c6_i32 = arith.constant 6 : i32
    %15 = arith.cmpi eq, %arg0, %c6_i32 : i32
    %16 = arith.extui %15 : i1 to i32
    %c0_i32_14 = arith.constant 0 : i32
    %17 = arith.cmpi ne, %16, %c0_i32_14 : i32
    scf.if %17 {
      %c0_15 = arith.constant 0 : index
      %c0_16 = arith.constant 0 : index
      %18 = vector.load %arg12[%c0_15, %c0_16] : memref<2x120xf32, #tpu.memory_space<vmem>>, vector<2x120xf32>
      %c0_17 = arith.constant 0 : index
      %c0_18 = arith.constant 0 : index
      %19 = vector.load %arg6[%c0_17, %c0_18] : memref<1x120xf32, #tpu.memory_space<vmem>>, vector<1x120xf32>
      %20 = vector.broadcast %19 : vector<1x120xf32> to vector<2x120xf32>
      %21 = arith.addf %18, %20 : vector<2x120xf32>
      %cst_19 = arith.constant 0.000000e+00 : f32
      %22 = vector.broadcast %cst_19 : f32 to vector<2x120xf32>
      %23 = arith.maximumf %21, %22 : vector<2x120xf32>
      %c0_20 = arith.constant 0 : index
      %c0_21 = arith.constant 0 : index
      %24 = vector.load %arg7[%c0_20, %c0_21] : memref<120x84xf32, #tpu.memory_space<vmem>>, vector<120x84xf32>
      %cst_22 = arith.constant dense<0.000000e+00> : vector<2x84xf32>
      %25 = tpu.matmul %23, %24, %cst_22 {dimension_numbers = #tpu.dot_dimension_numbers<[1], [0], [0], [1], [0, 0, 1, 1], [], []>} : vector<2x120xf32>, vector<120x84xf32>, vector<2x84xf32> -> vector<2x84xf32>
      %c0_23 = arith.constant 0 : index
      %c0_24 = arith.constant 0 : index
      %26 = vector.load %arg8[%c0_23, %c0_24] : memref<1x84xf32, #tpu.memory_space<vmem>>, vector<1x84xf32>
      %27 = vector.broadcast %26 : vector<1x84xf32> to vector<2x84xf32>
      %28 = arith.addf %25, %27 : vector<2x84xf32>
      %cst_25 = arith.constant 0.000000e+00 : f32
      %29 = vector.broadcast %cst_25 : f32 to vector<2x84xf32>
      %30 = arith.maximumf %28, %29 : vector<2x84xf32>
      %c0_26 = arith.constant 0 : index
      %c0_27 = arith.constant 0 : index
      %31 = vector.load %arg9[%c0_26, %c0_27] : memref<84x10xf32, #tpu.memory_space<vmem>>, vector<84x10xf32>
      %cst_28 = arith.constant dense<0.000000e+00> : vector<2x10xf32>
      %32 = tpu.matmul %30, %31, %cst_28 {dimension_numbers = #tpu.dot_dimension_numbers<[1], [0], [0], [1], [0, 0, 1, 1], [], []>} : vector<2x84xf32>, vector<84x10xf32>, vector<2x10xf32> -> vector<2x10xf32>
      %c0_29 = arith.constant 0 : index
      %c0_30 = arith.constant 0 : index
      %33 = vector.load %arg10[%c0_29, %c0_30] : memref<1x10xf32, #tpu.memory_space<vmem>>, vector<1x10xf32>
      %34 = vector.broadcast %33 : vector<1x10xf32> to vector<2x10xf32>
      %35 = arith.addf %32, %34 : vector<2x10xf32>
      %c0_31 = arith.constant 0 : index
      %c0_32 = arith.constant 0 : index
      %36 = vector.load %arg11[%c0_31, %c0_32] : memref<2x10xf32, #tpu.memory_space<vmem>>, vector<2x10xf32>
      tpu.vector_store %arg11[%c0_31, %c0_32], %35 {strides = array<i32>} : memref<2x10xf32, #tpu.memory_space<vmem>>, vector<2x10xf32>,
    } else {
    }
    return
  }
  func.func @transform_0(%arg0: i32) -> (i32, i32) {
    %c0_i32 = arith.constant 0 : i32
    %c0_i32_0 = arith.constant 0 : i32
    return %c0_i32, %arg0 : i32, i32
  }
  func.func @transform_1(%arg0: i32) -> (i32, i32) {
    %c0_i32 = arith.constant 0 : i32
    %c0_i32_0 = arith.constant 0 : i32
    return %c0_i32, %arg0 : i32, i32
  }
  func.func @transform_2(%arg0: i32) -> (i32, i32) {
    %c0_i32 = arith.constant 0 : i32
    %c0_i32_0 = arith.constant 0 : i32
    return %c0_i32, %arg0 : i32, i32
  }
  func.func @transform_3(%arg0: i32) -> (i32, i32) {
    %c0_i32 = arith.constant 0 : i32
    %c0_i32_0 = arith.constant 0 : i32
    return %c0_i32, %arg0 : i32, i32
  }
  func.func @transform_4(%arg0: i32) -> (i32, i32) {
    %c0_i32 = arith.constant 0 : i32
    %c0_i32_0 = arith.constant 0 : i32
    return %arg0, %c0_i32 : i32, i32
  }
  func.func @transform_5(%arg0: i32) -> (i32, i32) {
    %c0_i32 = arith.constant 0 : i32
    %c0_i32_0 = arith.constant 0 : i32
    %c0_i32_1 = arith.constant 0 : i32
    return %c0_i32, %c0_i32_0 : i32, i32
  }
  func.func @transform_6(%arg0: i32) -> (i32, i32) {
    %c0_i32 = arith.constant 0 : i32
    %c0_i32_0 = arith.constant 0 : i32
    %c0_i32_1 = arith.constant 0 : i32
    return %c0_i32, %c0_i32_0 : i32, i32
  }
  func.func @transform_7(%arg0: i32) -> (i32, i32) {
    %c0_i32 = arith.constant 0 : i32
    %c0_i32_0 = arith.constant 0 : i32
    %c0_i32_1 = arith.constant 0 : i32
    return %c0_i32, %c0_i32_0 : i32, i32
  }
  func.func @transform_8(%arg0: i32) -> (i32, i32) {
    %c0_i32 = arith.constant 0 : i32
    %c0_i32_0 = arith.constant 0 : i32
    %c0_i32_1 = arith.constant 0 : i32
    return %c0_i32, %c0_i32_0 : i32, i32
  }
  func.func @transform_9(%arg0: i32) -> (i32, i32) {
    %c0_i32 = arith.constant 0 : i32
    %c0_i32_0 = arith.constant 0 : i32
    %c0_i32_1 = arith.constant 0 : i32
    return %c0_i32, %c0_i32_0 : i32, i32
  }
  func.func @transform_10(%arg0: i32) -> (i32, i32) {
    %c0_i32 = arith.constant 0 : i32
    %c0_i32_0 = arith.constant 0 : i32
    %c0_i32_1 = arith.constant 0 : i32
    return %c0_i32, %c0_i32_0 : i32, i32
  }
}

</mosaic_0001>

<bundles_post_ra>
// kernel: reverse.3
= control target key start
LH: loop header
LB: loop body
LE: loop exit
PB: predicated region body
PF: predicated region fallthrough
CT: control target
= control target key end

     0   :  { %s632_s0 = inlined_call_operand.vmem [shape: f32[2,16,28,13], index: 0, kind: input, shape index: {}]   ;;  %s633_s1 = inlined_call_operand.vmem [shape: f32[2,16,28,13], index: 1, kind: output, shape index: {}]  }
   0x1   :  { %v208_v0 = vld [vmem:[%s632_s0 + $0xc0] sm:$0xff]  ;;  %v209_v1 = vld [vmem:[%s632_s0 + $0x190] sm:$0xff]  ;;  %v258_v26 = vld [vmem:[%s632_s0 + $0xc8] sm:$0xff] }
   0x2   :  { %v211_v2 = vld [vmem:[%s632_s0 + $0xb0] sm:$0xff]  ;;  %4 = vst [vmem:[%s633_s1] sm:$0xff] %v208_v0  ;;  %210 = vst [vmem:[%s633_s1 + $0xd0] sm:$0xff] %v209_v1  ;;  %v213_v3 = vld [vmem:[%s632_s0 + $0x180] sm:$0xff] }
   0x3   :  { %212 = vst [vmem:[%s633_s1 + $0x10] sm:$0xff] %v211_v2  ;;  %v215_v4 = vld [vmem:[%s632_s0 + $0xa0] sm:$0xff]  ;;  %v217_v5 = vld [vmem:[%s632_s0 + $0x170] sm:$0xff]  ;;  %214 = vst [vmem:[%s633_s1 + $0xe0] sm:$0xff] %v213_v3 }
   0x4   :  { %216 = vst [vmem:[%s633_s1 + $0x20] sm:$0xff] %v215_v4  ;;  %218 = vst [vmem:[%s633_s1 + $0xf0] sm:$0xff] %v217_v5  ;;  %v219_v6 = vld [vmem:[%s632_s0 + $0x90] sm:$0xff]  ;;  %v221_v7 = vld [vmem:[%s632_s0 + $0x160] sm:$0xff] }
   0x5   :  { %v223_v8 = vld [vmem:[%s632_s0 + $0x80] sm:$0xff]  ;;  %220 = vst [vmem:[%s633_s1 + $0x30] sm:$0xff] %v219_v6  ;;  %222 = vst [vmem:[%s633_s1 + $0x100] sm:$0xff] %v221_v7  ;;  %v225_v9 = vld [vmem:[%s632_s0 + $0x150] sm:$0xff] }
   0x6   :  { %224 = vst [vmem:[%s633_s1 + $0x40] sm:$0xff] %v223_v8  ;;  %v227_v10 = vld [vmem:[%s632_s0 + $0x70] sm:$0xff]  ;;  %v229_v11 = vld [vmem:[%s632_s0 + $0x140] sm:$0xff]  ;;  %226 = vst [vmem:[%s633_s1 + $0x110] sm:$0xff] %v225_v9 }
   0x7   :  { %228 = vst [vmem:[%s633_s1 + $0x50] sm:$0xff] %v227_v10  ;;  %230 = vst [vmem:[%s633_s1 + $0x120] sm:$0xff] %v229_v11  ;;  %v231_v12 = vld [vmem:[%s632_s0 + $0x60] sm:$0xff]  ;;  %v233_v13 = vld [vmem:[%s632_s0 + $0x130] sm:$0xff] }
   0x8   :  { %v235_v14 = vld [vmem:[%s632_s0 + $0x50] sm:$0xff]  ;;  %232 = vst [vmem:[%s633_s1 + $0x60] sm:$0xff] %v231_v12  ;;  %234 = vst [vmem:[%s633_s1 + $0x130] sm:$0xff] %v233_v13  ;;  %v237_v15 = vld [vmem:[%s632_s0 + $0x120] sm:$0xff] }
   0x9   :  { %236 = vst [vmem:[%s633_s1 + $0x70] sm:$0xff] %v235_v14  ;;  %v239_v16 = vld [vmem:[%s632_s0 + $0x40] sm:$0xff]  ;;  %v241_v17 = vld [vmem:[%s632_s0 + $0x110] sm:$0xff]  ;;  %238 = vst [vmem:[%s633_s1 + $0x140] sm:$0xff] %v237_v15 }
   0xa   :  { %240 = vst [vmem:[%s633_s1 + $0x80] sm:$0xff] %v239_v16  ;;  %242 = vst [vmem:[%s633_s1 + $0x150] sm:$0xff] %v241_v17  ;;  %v243_v18 = vld [vmem:[%s632_s0 + $0x30] sm:$0xff]  ;;  %v245_v19 = vld [vmem:[%s632_s0 + $0x100] sm:$0xff] }
   0xb   :  { %v247_v20 = vld [vmem:[%s632_s0 + $0x20] sm:$0xff]  ;;  %244 = vst [vmem:[%s633_s1 + $0x90] sm:$0xff] %v243_v18  ;;  %246 = vst [vmem:[%s633_s1 + $0x160] sm:$0xff] %v245_v19  ;;  %v249_v21 = vld [vmem:[%s632_s0 + $0xf0] sm:$0xff] }
   0xc   :  { %248 = vst [vmem:[%s633_s1 + $0xa0] sm:$0xff] %v247_v20  ;;  %v251_v22 = vld [vmem:[%s632_s0 + $0x10] sm:$0xff]  ;;  %v253_v23 = vld [vmem:[%s632_s0 + $0xe0] sm:$0xff]  ;;  %250 = vst [vmem:[%s633_s1 + $0x170] sm:$0xff] %v249_v21 }
   0xd   :  { %252 = vst [vmem:[%s633_s1 + $0xb0] sm:$0xff] %v251_v22  ;;  %254 = vst [vmem:[%s633_s1 + $0x180] sm:$0xff] %v253_v23  ;;  %v97_v24 = vld [vmem:[%s632_s0] sm:$0xff]  ;;  %v256_v25 = vld [vmem:[%s632_s0 + $0xd0] sm:$0xff] }
   0xe   :  { %255 = vst [vmem:[%s633_s1 + $0xc0] sm:$0xff] %v97_v24  ;;  %257 = vst [vmem:[%s633_s1 + $0x190] sm:$0xff] %v256_v25  ;;  %v260_v27 = vld [vmem:[%s632_s0 + $0x198] sm:$0xff]  ;;  %v264_v29 = vld [vmem:[%s632_s0 + $0x188] sm:$0xff] }
   0xf   :  { %259 = vst [vmem:[%s633_s1 + $0x8] sm:$0xff] %v258_v26  ;;  %v262_v28 = vld [vmem:[%s632_s0 + $0xb8] sm:$0xff]  ;;  %261 = vst [vmem:[%s633_s1 + $0xd8] sm:$0xff] %v260_v27  ;;  %v266_v30 = vld [vmem:[%s632_s0 + $0xa8] sm:$0xff] }
  0x10   :  { %263 = vst [vmem:[%s633_s1 + $0x18] sm:$0xff] %v262_v28  ;;  %265 = vst [vmem:[%s633_s1 + $0xe8] sm:$0xff] %v264_v29  ;;  %v268_v31 = vld [vmem:[%s632_s0 + $0x178] sm:$0xff]  ;;  %v272_v33 = vld [vmem:[%s632_s0 + $0x168] sm:$0xff] }
  0x11   :  { %v270_v32 = vld [vmem:[%s632_s0 + $0x98] sm:$0xff]  ;;  %267 = vst [vmem:[%s633_s1 + $0x28] sm:$0xff] %v266_v30  ;;  %269 = vst [vmem:[%s633_s1 + $0xf8] sm:$0xff] %v268_v31  ;;  %v274_v34 = vld [vmem:[%s632_s0 + $0x88] sm:$0xff] }
  0x12   :  { %271 = vst [vmem:[%s633_s1 + $0x38] sm:$0xff] %v270_v32  ;;  %v276_v35 = vld [vmem:[%s632_s0 + $0x158] sm:$0xff]  ;;  %273 = vst [vmem:[%s633_s1 + $0x108] sm:$0xff] %v272_v33  ;;  %v280_v37 = vld [vmem:[%s632_s0 + $0x148] sm:$0xff] }
  0x13   :  { %275 = vst [vmem:[%s633_s1 + $0x48] sm:$0xff] %v274_v34  ;;  %277 = vst [vmem:[%s633_s1 + $0x118] sm:$0xff] %v276_v35  ;;  %v278_v36 = vld [vmem:[%s632_s0 + $0x78] sm:$0xff]  ;;  %v282_v38 = vld [vmem:[%s632_s0 + $0x68] sm:$0xff] }
  0x14   :  { %279 = vst [vmem:[%s633_s1 + $0x58] sm:$0xff] %v278_v36  ;;  %281 = vst [vmem:[%s633_s1 + $0x128] sm:$0xff] %v280_v37  ;;  %v284_v39 = vld [vmem:[%s632_s0 + $0x138] sm:$0xff]  ;;  %v288_v41 = vld [vmem:[%s632_s0 + $0x128] sm:$0xff] }
  0x15   :  { %283 = vst [vmem:[%s633_s1 + $0x68] sm:$0xff] %v282_v38  ;;  %v286_v40 = vld [vmem:[%s632_s0 + $0x58] sm:$0xff]  ;;  %285 = vst [vmem:[%s633_s1 + $0x138] sm:$0xff] %v284_v39  ;;  %v290_v42 = vld [vmem:[%s632_s0 + $0x48] sm:$0xff] }
  0x16   :  { %287 = vst [vmem:[%s633_s1 + $0x78] sm:$0xff] %v286_v40  ;;  %289 = vst [vmem:[%s633_s1 + $0x148] sm:$0xff] %v288_v41  ;;  %v292_v43 = vld [vmem:[%s632_s0 + $0x118] sm:$0xff]  ;;  %v296_v45 = vld [vmem:[%s632_s0 + $0x108] sm:$0xff] }
  0x17   :  { %v294_v44 = vld [vmem:[%s632_s0 + $0x38] sm:$0xff]  ;;  %291 = vst [vmem:[%s633_s1 + $0x88] sm:$0xff] %v290_v42  ;;  %293 = vst [vmem:[%s633_s1 + $0x158] sm:$0xff] %v292_v43  ;;  %v298_v46 = vld [vmem:[%s632_s0 + $0x28] sm:$0xff] }
  0x18   :  { %295 = vst [vmem:[%s633_s1 + $0x98] sm:$0xff] %v294_v44  ;;  %v300_v47 = vld [vmem:[%s632_s0 + $0xf8] sm:$0xff]  ;;  %297 = vst [vmem:[%s633_s1 + $0x168] sm:$0xff] %v296_v45  ;;  %v304_v49 = vld [vmem:[%s632_s0 + $0xe8] sm:$0xff] }
  0x19   :  { %299 = vst [vmem:[%s633_s1 + $0xa8] sm:$0xff] %v298_v46  ;;  %301 = vst [vmem:[%s633_s1 + $0x178] sm:$0xff] %v300_v47  ;;  %v302_v48 = vld [vmem:[%s632_s0 + $0x18] sm:$0xff]  ;;  %v306_v50 = vld [vmem:[%s632_s0 + $0x8] sm:$0xff] }
  0x1a   :  { %303 = vst [vmem:[%s633_s1 + $0xb8] sm:$0xff] %v302_v48  ;;  %305 = vst [vmem:[%s633_s1 + $0x188] sm:$0xff] %v304_v49  ;;  %v308_v51 = vld [vmem:[%s632_s0 + $0xd8] sm:$0xff] }
  0x1b   :  { %307 = vst [vmem:[%s633_s1 + $0xc8] sm:$0xff] %v306_v50  ;;  %309 = vst [vmem:[%s633_s1 + $0x198] sm:$0xff] %v308_v51 }

// kernel: _lambda_.4
= control target key start
LH: loop header
LB: loop body
LE: loop exit
PB: predicated region body
PF: predicated region fallthrough
CT: control target
= control target key end

     0   :  { %11 = vsyncpa [#allocation3], 0  ;;  %s6745_s0 = inlined_call_operand.vmem [shape: f32[2,16,8,8], index: 0, kind: input, shape index: {}]   ;;  %s6746_s1 = inlined_call_operand.vmem [shape: f32[2,16,8,8], index: 1, kind: input, shape index: {}]   ;;  %s6747_s2 = inlined_call_operand.hbm [shape: f32[2,16,8,128], index: 2, kind: input, shape index: {}]   ;;  %s6748_s3 = inlined_call_operand.hbm [shape: f32[2,16,8,128], index: 3, kind: input, shape index: {}]   ;;  %s6749_s4 = inlined_call_operand.vmem [shape: f32[2,16,8,128], index: 4, kind: output, shape index: {0}]   ;;  %s6750_s5 = inlined_call_operand.vmem [shape: f32[2,16,8,128], index: 5, kind: output, shape index: {1}]  }
   0x1   :  { %13 = vsyncpa [#allocation3 + $0x1], 0 }
   0x2   :  { %14 = vsyncpa [#allocation5], 0 }
   0x3   :  { %16 = vsyncpa [#allocation5 + $0x1], 0  ;;  %s5930_s18 = smov 0   ;;  %s5932_s19 = smov 0  }
   0x4   :  { %s5934_s20 = smov 0   ;;  %s5936_s21 = smov 0  }
   0x5 LB: > { %s5949_s22 = sadd.s32 4294967295, %s5892_s21   ;;  %s5952_s23 = sadd.s32 1, %s5892_s21   ;;  %s5892_s21 = sphi %s5936_s21, %s6763_s21   ;;  %s5888_s20 = sphi %s5934_s20, %s6762_s20   ;;  %s5884_s19 = sphi %s5932_s19, %s6761_s19   ;;  %s5880_s18 = sphi %s5930_s18, %s6760_s18  }
   0x6   : > { %s78_s24 = ssub.s32 %s5892_s21, %s5952_s23  ;;  %s81_s25 = sadd.s32 1, %s5888_s20 }
   0x7   : > { %p79_p0 = scmp.eq.s32.totalorder %s78_s24, 0  ;;  %p88_p1 = scmp.ne.s32.totalorder %s5888_s20, %s5884_s19 }
   0x8   : > { %p89_p2 = scmp.eq.s32.totalorder %s5892_s21, 0  ;;  %p94_p3 = scmp.ne.s32.totalorder %s5884_s19, %s5880_s18 }
   0x9   : > { %s5962_s26 = scalar_select %p79_p0, %s5888_s20, %s81_s25  }
   0xa   : > { %p90_p4 = por %p89_p2, %p88_p1  ;;  %p95_p5 = scmp.eq.s32.totalorder %s5949_s22, 0 }
   0xb   : > { %p5757_p6 = scmp.lt.s32.totalorder %s5892_s21, 2  ;;  %s5971_s28 = sand.u32 1, %s5888_s20  }
   0xc   : > { %p5966_p7 = por %p95_p5, %p94_p3  ;;  %s5177_s29 = sshll.u32 %s5971_s28, 7 }
   0xd   : > { %s5260_s30 = sshll.u32 %s5892_s21, 11  ;;  %s216_s9 = scalar_lea.vmem [#allocation2], %s5177_s29 }
   0xe   : > { %s6753_s27 = scalar_select %p5966_p7, 1, 0 }
   0xf   : > { %s5980_s8 = scalar_lea.hbm %s6747_s2, %s5260_s30  ;;  %s223_s10 = sshll.u32 %s216_s9, 4  ;;  %s5984_s10 = int_to_ptr.vmem [resolvable:$true] %s223_s10 }
  0x10   : > { %p5986_p8 = pnand %p5757_p6, %p90_p4  ;;  %s213_s12 = scalar_lea.sflag [#allocation3], %s5971_s28 }
  0x11   : > { %s5794_s13 = scalar_lea.hbm %s5980_s8, 2048  ;;  %s5799_s16 = scalar_lea.hbm %s6747_s2, 4096 }
  0x12   : > { %p5795_p10 = scmp.ne.s32.totalorder %s5980_s8, %s5794_s13  ;;  %p5796_p11 = pneg %p5986_p8 }
  0x13   : > { %p5800_p0 = scmp.lt.u32.totalorder %s5980_s8, %s6747_s2  ;;  %p5801_p1 = scmp.lt.u32.totalorder %s5799_s16, %s5794_s13 }
  0x14   : > { %p5797_p12 = pnand %p5796_p11, %p5795_p10  ;;  %p5803_p3 = scmp.lt.u32.totalorder %s5794_s13, %s5980_s8 }
  0x15   : > { %p5802_p2 = por %p5801_p1, %p5800_p0 }
  0x16   : > { %p5798_p13 = pneg %p5797_p12 }
  0x17   : > { %p5804_p4 = por %p5803_p3, %p5802_p2 }
  0x19   : > { %p5805_p5 = pnand %p5804_p4, %p5798_p13 }
  0x1b   : > { %5808 = shalt.err (!%p5805_p5)
}
  0x1c   : > { %s5809_s24 = scalar_lea.vmem %s5984_s10, 2048  ;;  %s5894_s25 = smov [#allocation2]  }
  0x1d   : > { %p5810_p6 = scmp.ne.s32.totalorder %s5984_s10, %s5809_s24  ;;  %s5814_s6 = sshll.u32 %s5894_s25, 4  ;;  %s5815_s6 = int_to_ptr.vmem [resolvable:$false] %s5814_s6 }
  0x1e   : > { %s5816_s7 = scalar_lea.vmem %s5815_s6, 4096  ;;  %p5817_p9 = scmp.lt.s32.totalorder %s5984_s10, %s5815_s6 }
  0x1f   : > { %p5812_p10 = pnand %p5810_p6, %p5796_p11  ;;  %p5818_p0 = scmp.lt.s32.totalorder %s5816_s7, %s5809_s24 }
  0x21   : > { %p5813_p12 = pneg %p5812_p10  ;;  %p5819_p1 = por %p5818_p0, %p5817_p9 }
  0x23   : > { %p5820_p2 = pnand %p5819_p1, %p5813_p12 }
  0x25   : > { %5823 = shalt.err (!%p5820_p2)
}
  0x26   : > { %s5895_s9 = smov 128   ;;  %s5896_s13 = smov 8  }
  0x27   : > { %5753 = dma.hbm_to_vmem [thread:$0]  (!%p5986_p8), %s5980_s8, 2048, %s5984_s10, %s213_s12, %s5895_s9, %s5895_s9, %s5896_s13  }
  0x28   : > { %p252_p9 = scmp.lt.s32.totalorder %s5892_s21, 3  ;;  %s6028_s16 = scalar_lea.hbm %s6748_s3, %s5260_s30 }
  0x29   : > { %p6755_p13 = scmp.ge.s32.totalorder %s5892_s21, 1  ;;  %s237_s18 = scalar_lea.vmem [#allocation4], %s5177_s29 }
  0x2a   : > { %s244_s24 = sshll.u32 %s237_s18, 4  ;;  %s234_s8 = scalar_lea.sflag [#allocation5], %s5971_s28  ;;  %s6038_s24 = int_to_ptr.vmem [resolvable:$true] %s244_s24 }
  0x2b   : > { %p6032_p3 = pnand %p6755_p13, %p252_p9  ;;  %s5824_s10 = scalar_lea.hbm %s6028_s16, 2048 }
  0x2c   : > { %p5825_p4 = scmp.ne.s32.totalorder %s6028_s16, %s5824_s10  ;;  %s5829_s12 = scalar_lea.hbm %s6748_s3, 4096 }
  0x2d   : > { %p5830_p10 = scmp.lt.u32.totalorder %s6028_s16, %s6748_s3  ;;  %p5831_p12 = scmp.lt.u32.totalorder %s5829_s12, %s5824_s10 }
  0x2e   : > { %p5827_p5 = pnand %p5825_p4, %p5796_p11  ;;  %p5833_p1 = scmp.lt.u32.totalorder %s5824_s10, %s6028_s16 }
  0x2f   : > { %p5832_p0 = por %p5831_p12, %p5830_p10 }
  0x30   : > { %p5828_p6 = pneg %p5827_p5 }
  0x31   : > { %p5834_p2 = por %p5833_p1, %p5832_p0 }
  0x33   : > { %p5835_p9 = pnand %p5834_p2, %p5828_p6 }
  0x35   : > { %5838 = shalt.err (!%p5835_p9)
}
  0x36   : > { %s5839_s29 = scalar_lea.vmem %s6038_s24, 2048  ;;  %s5897_s7 = smov [#allocation4]  }
  0x37   : > { %p5840_p13 = scmp.ne.s32.totalorder %s6038_s24, %s5839_s29  ;;  %s5844_s14 = sshll.u32 %s5897_s7, 4  ;;  %s5845_s14 = int_to_ptr.vmem [resolvable:$false] %s5844_s14 }
  0x38   : > { %s5846_s15 = scalar_lea.vmem %s5845_s14, 4096  ;;  %p5847_p7 = scmp.lt.s32.totalorder %s6038_s24, %s5845_s14 }
  0x39   : > { %p5842_p4 = pnand %p5840_p13, %p5796_p11  ;;  %p5848_p10 = scmp.lt.s32.totalorder %s5846_s15, %s5839_s29 }
  0x3b   : > { %p5843_p5 = pneg %p5842_p4  ;;  %p5849_p12 = por %p5848_p10, %p5847_p7 }
  0x3d   : > { %p5850_p0 = pnand %p5849_p12, %p5843_p5 }
  0x3f   : > { %5853 = shalt.err (!%p5850_p0)
}
  0x40   : > { %5756 = dma.hbm_to_vmem [thread:$0]  (!%p5986_p8), %s6028_s16, 2048, %s6038_s24, %s234_s8, %s5895_s9, %s5895_s9, %s5896_s13  }
  0x41   : > { %256 = sbr.rel (%p6032_p3) target bundleno = 421 (0x1a5), region = 36 }
  0x48   : > { %s258_s18 = sand.u32 1, %s5884_s19   ;;  %p6757_p7 = scmp.ne.s32.totalorder %s6753_s27, 0 }
  0x49   : > { %s5184_s10 = sshll.u32 %s258_s18, 7  ;;  %s259_s21 = scalar_lea.sflag [#allocation3], %s258_s18 }
  0x4a   : > { %s6072_s30 = scalar_lea.vmem [#allocation2], %s5184_s10 }
  0x4b   : > { %5871 = dma.done.wait (%p6757_p7), %s259_s21, 2048  }
  0x4c   : > { %5873 = vsyncadd (%p6757_p7), %s259_s21, 4294965248  ;;  %s268_s28 = scalar_lea.sflag [#allocation5], %s258_s18  ;;  %s6078_s11 = scalar_lea.vmem [#allocation4], %s5184_s10 }
  0x4d   : > { %5875 = dma.done.wait (%p6757_p7), %s268_s28, 2048  }
  0x4e   : > { %5877 = vsyncadd (%p6757_p7), %s268_s28, 4294965248  ;;  %p318_p8 = scmp.lt.s32.totalorder %s5949_s22, 1  ;;  %v5898_v0 = vmov 0.0   ;;  %vm5899_vm0 = vmmov 0   ;;  %vm402_vm1 = vcmask 64512   ;;  %v6101_v1 = vld [vmem:[%s6072_s30] sm:$0xff] }
  0x4f   : > { %5394 = vmatprep.subr.mxu0 %v5898_v0  ;;  %5399 = vmatprep.subr.mxu1 %v5898_v0  ;;  %v6104_v2 = vld [vmem:[%s6072_s30 + $0x8] sm:$0xff]  ;;  %v6115_v5 = vld [vmem:[%s6072_s30 + $0x10] sm:$0xff]  ;;  %v6118_v6 = vld [vmem:[%s6072_s30 + $0x18] sm:$0xff] }
  0x50   : > { %5396 = vmatprep.mubr.msk.f32.mxu0 %vm5899_vm0, %v5898_v0  ;;  %5401 = vmatprep.mubr.msk.f32.mxu1 %vm5899_vm0, %v5898_v0  ;;  %s6765_s22 = smov (!%p318_p8, %s5949_s22), 1  ;;  %v6139_v9 = vld [vmem:[%s6072_s30 + $0x20] sm:$0xff]  ;;  %v6142_v10 = vld [vmem:[%s6072_s30 + $0x28] sm:$0xff]  ;;  %v6163_v13 = vld [vmem:[%s6072_s30 + $0x30] sm:$0xff] }
  0x51   : > { %s6092_s27 = sshll.u32 %s6765_s22, 7  ;;  %5395 = vmatpush3.msra.mxu0 %v6101_v1  ;;  %5400 = vmatpush3.msra.mxu1 %v6104_v2  ;;  %v6166_v14 = vld [vmem:[%s6072_s30 + $0x38] sm:$0xff]  ;;  %v6187_v17 = vld [vmem:[%s6072_s30 + $0x40] sm:$0xff]  ;;  %v6190_v18 = vld [vmem:[%s6072_s30 + $0x48] sm:$0xff] }
  0x52   : > { %s6098_s16 = scalar_lea.vmem %s6745_s0, %s6092_s27  ;;  %5404 = vmatprep.subr.mxu0 %v5898_v0  ;;  %5409 = vmatprep.subr.mxu1 %v5898_v0  ;;  %v6211_v21 = vld [vmem:[%s6072_s30 + $0x50] sm:$0xff]  ;;  %v6214_v22 = vld [vmem:[%s6072_s30 + $0x58] sm:$0xff]  ;;  %v6235_v25 = vld [vmem:[%s6072_s30 + $0x60] sm:$0xff]  ;;  %s6282_s24 = scalar_lea.vmem %s6746_s1, %s6092_s27 }
  0x53   : > { %v6107_v3 = vld [vmem:[%s6098_s16] sm:$0xff]  ;;  %v6112_v4 = vld [vmem:[%s6098_s16 + $0x8] sm:$0xff]  ;;  %v6127_v7 = vld [vmem:[%s6098_s16 + $0x10] sm:$0xff]  ;;  %s6688_s25 = scalar_lea.vmem %s6749_s4, %s6092_s27  ;;  %s6714_s7 = scalar_lea.vmem %s6750_s5, %s6092_s27 }
  0x54   : > { %5397 = vmatmul.mubr.msk.f32.vlgmr.msra.gmra.mrb[0].mxu0 %vm402_vm1, %v6107_v3  ;;  %5402 = vmatmul.mubr.msk.f32.vlgmr.msra.gmra.mrb[0].mxu1 %vm402_vm1, %v6112_v4  ;;  %v6130_v8 = vld [vmem:[%s6098_s16 + $0x18] sm:$0xff]  ;;  %v6151_v11 = vld [vmem:[%s6098_s16 + $0x20] sm:$0xff]  ;;  %v6154_v12 = vld [vmem:[%s6098_s16 + $0x28] sm:$0xff] }
  0x55   : > { %5405 = vmatpush3.msra.mxu0 %v6115_v5  ;;  %5410 = vmatpush3.msra.mxu1 %v6118_v6  ;;  %v6175_v15 = vld [vmem:[%s6098_s16 + $0x30] sm:$0xff]  ;;  %v6178_v16 = vld [vmem:[%s6098_s16 + $0x38] sm:$0xff]  ;;  %v6199_v19 = vld [vmem:[%s6098_s16 + $0x40] sm:$0xff] }
  0x56   : > { %5406 = vmatprep.mubr.msk.f32.mxu0 %vm5899_vm0, %v5898_v0  ;;  %5411 = vmatprep.mubr.msk.f32.mxu1 %vm5899_vm0, %v5898_v0  ;;  %v6202_v20 = vld [vmem:[%s6098_s16 + $0x48] sm:$0xff]  ;;  %v6223_v23 = vld [vmem:[%s6098_s16 + $0x50] sm:$0xff]  ;;  %v6226_v24 = vld [vmem:[%s6098_s16 + $0x58] sm:$0xff] }
  0x57   : > { %5414 = vmatprep.subr.mxu0 %v5898_v0  ;;  %5419 = vmatprep.subr.mxu1 %v5898_v0  ;;  %v6238_v26 = vld [vmem:[%s6072_s30 + $0x68] sm:$0xff]  ;;  %v6247_v27 = vld [vmem:[%s6098_s16 + $0x60] sm:$0xff]  ;;  %v6259_v29 = vld [vmem:[%s6072_s30 + $0x70] sm:$0xff] }
  0x58   : > { %5407 = vmatmul.mubr.msk.f32.vlgmr.msra.gmra.mrb[2].mxu0 %vm402_vm1, %v6127_v7  ;;  %5412 = vmatmul.mubr.msk.f32.vlgmr.msra.gmra.mrb[2].mxu1 %vm402_vm1, %v6130_v8  ;;  %v6250_v28 = vld [vmem:[%s6098_s16 + $0x68] sm:$0xff]  ;;  %v6262_v30 = vld [vmem:[%s6072_s30 + $0x78] sm:$0xff]  ;;  %v6271_v31 = vld [vmem:[%s6098_s16 + $0x70] sm:$0xff] }
  0x59   : > { %5415 = vmatpush3.msra.mxu0 %v6139_v9  ;;  %5420 = vmatpush3.msra.mxu1 %v6142_v10  ;;  %6758 = vst [vmem:[#allocation8_spill] sm:$0xff] %v6262_v30  ;;  %v6274_v32 = vld [vmem:[%s6098_s16 + $0x78] sm:$0xff]  ;;  %v6289_v33 = vld [vmem:[%s6078_s11] sm:$0xff]  ;;  %v6292_v34 = vld [vmem:[%s6078_s11 + $0x8] sm:$0xff] }
  0x5a   : > { %5416 = vmatprep.mubr.msk.f32.mxu0 %vm5899_vm0, %v5898_v0  ;;  %5421 = vmatprep.mubr.msk.f32.mxu1 %vm5899_vm0, %v5898_v0  ;;  %v6301_v35 = vld [vmem:[%s6282_s24] sm:$0xff]  ;;  %v6304_v36 = vld [vmem:[%s6282_s24 + $0x8] sm:$0xff]  ;;  %v6313_v37 = vld [vmem:[%s6078_s11 + $0x10] sm:$0xff] }
  0x5b   : > { %5424 = vmatprep.subr.mxu0 %v5898_v0  ;;  %5429 = vmatprep.subr.mxu1 %v5898_v0  ;;  %v6316_v38 = vld [vmem:[%s6078_s11 + $0x18] sm:$0xff]  ;;  %v6325_v39 = vld [vmem:[%s6282_s24 + $0x10] sm:$0xff]  ;;  %v6337_v41 = vld [vmem:[%s6078_s11 + $0x20] sm:$0xff] }
  0x5c   : > { %5417 = vmatmul.mubr.msk.f32.vlgmr.msra.gmra.mrb[4].mxu0 %vm402_vm1, %v6151_v11  ;;  %5422 = vmatmul.mubr.msk.f32.vlgmr.msra.gmra.mrb[4].mxu1 %vm402_vm1, %v6154_v12  ;;  %v6328_v40 = vld [vmem:[%s6282_s24 + $0x18] sm:$0xff]  ;;  %v6340_v42 = vld [vmem:[%s6078_s11 + $0x28] sm:$0xff]  ;;  %v6349_v43 = vld [vmem:[%s6282_s24 + $0x20] sm:$0xff] }
  0x5d   : > { %5425 = vmatpush3.msra.mxu0 %v6163_v13  ;;  %5430 = vmatpush3.msra.mxu1 %v6166_v14  ;;  %v6352_v44 = vld [vmem:[%s6282_s24 + $0x28] sm:$0xff]  ;;  %v6361_v45 = vld [vmem:[%s6078_s11 + $0x30] sm:$0xff]  ;;  %v6364_v46 = vld [vmem:[%s6078_s11 + $0x38] sm:$0xff] }
  0x5e   : > { %5426 = vmatprep.mubr.msk.f32.mxu0 %vm5899_vm0, %v5898_v0  ;;  %5431 = vmatprep.mubr.msk.f32.mxu1 %vm5899_vm0, %v5898_v0  ;;  %v6373_v47 = vld [vmem:[%s6282_s24 + $0x30] sm:$0xff]  ;;  %v6376_v48 = vld [vmem:[%s6282_s24 + $0x38] sm:$0xff]  ;;  %v6385_v49 = vld [vmem:[%s6078_s11 + $0x40] sm:$0xff] }
  0x5f   : > { %5434 = vmatprep.subr.mxu0 %v5898_v0  ;;  %5439 = vmatprep.subr.mxu1 %v5898_v0  ;;  %v6388_v50 = vld [vmem:[%s6078_s11 + $0x48] sm:$0xff]  ;;  %v6397_v51 = vld [vmem:[%s6282_s24 + $0x40] sm:$0xff]  ;;  %v6409_v53 = vld [vmem:[%s6078_s11 + $0x50] sm:$0xff] }
  0x60   : > { %5427 = vmatmul.mubr.msk.f32.vlgmr.msra.gmra.mrb[6].mxu0 %vm402_vm1, %v6175_v15  ;;  %5432 = vmatmul.mubr.msk.f32.vlgmr.msra.gmra.mrb[6].mxu1 %vm402_vm1, %v6178_v16  ;;  %v6400_v52 = vld [vmem:[%s6282_s24 + $0x48] sm:$0xff]  ;;  %v6412_v54 = vld [vmem:[%s6078_s11 + $0x58] sm:$0xff]  ;;  %v6421_v55 = vld [vmem:[%s6282_s24 + $0x50] sm:$0xff] }
  0x61   : > { %5435 = vmatpush3.msra.mxu0 %v6187_v17  ;;  %5440 = vmatpush3.msra.mxu1 %v6190_v18  ;;  %v6424_v56 = vld [vmem:[%s6282_s24 + $0x58] sm:$0xff]  ;;  %v6433_v57 = vld [vmem:[%s6078_s11 + $0x60] sm:$0xff]  ;;  %v6436_v58 = vld [vmem:[%s6078_s11 + $0x68] sm:$0xff] }
  0x62   : > { %5436 = vmatprep.mubr.msk.f32.mxu0 %vm5899_vm0, %v5898_v0  ;;  %5441 = vmatprep.mubr.msk.f32.mxu1 %vm5899_vm0, %v5898_v0  ;;  %v6445_v59 = vld [vmem:[%s6282_s24 + $0x60] sm:$0xff]  ;;  %v6448_v60 = vld [vmem:[%s6282_s24 + $0x68] sm:$0xff]  ;;  %v6457_v61 = vld [vmem:[%s6078_s11 + $0x70] sm:$0xff] }
  0x63   : > { %5444 = vmatprep.subr.mxu0 %v5898_v0  ;;  %5449 = vmatprep.subr.mxu1 %v5898_v0  ;;  %v6460_v62 = vld [vmem:[%s6078_s11 + $0x78] sm:$0xff]  ;;  %v6469_v63 = vld [vmem:[%s6282_s24 + $0x70] sm:$0xff] }
  0x64   : > { %5437 = vmatmul.mubr.msk.f32.vlgmr.msra.gmra.mrb[8].mxu0 %vm402_vm1, %v6199_v19  ;;  %5442 = vmatmul.mubr.msk.f32.vlgmr.msra.gmra.mrb[8].mxu1 %vm402_vm1, %v6202_v20 }
  0x65   : > { %5445 = vmatpush3.msra.mxu0 %v6211_v21  ;;  %5450 = vmatpush3.msra.mxu1 %v6214_v22 }
  0x66   : > { %5446 = vmatprep.mubr.msk.f32.mxu0 %vm5899_vm0, %v5898_v0  ;;  %5451 = vmatprep.mubr.msk.f32.mxu1 %vm5899_vm0, %v5898_v0 }
  0x67   : > { %5454 = vmatprep.subr.mxu0 %v5898_v0  ;;  %5459 = vmatprep.subr.mxu1 %v5898_v0 }
  0x68   : > { %5447 = vmatmul.mubr.msk.f32.vlgmr.msra.gmra.mrb[10].mxu0 %vm402_vm1, %v6223_v23  ;;  %5452 = vmatmul.mubr.msk.f32.vlgmr.msra.gmra.mrb[10].mxu1 %vm402_vm1, %v6226_v24 }
  0x69   : > { %5455 = vmatpush3.msra.mxu0 %v6235_v25  ;;  %5460 = vmatpush3.msra.mxu1 %v6238_v26 }
  0x6a   : > { %5456 = vmatprep.mubr.msk.f32.mxu0 %vm5899_vm0, %v5898_v0  ;;  %5461 = vmatprep.mubr.msk.f32.mxu1 %vm5899_vm0, %v5898_v0 }
  0x6b   : > { %5464 = vmatprep.subr.mxu0 %v5898_v0  ;;  %5469 = vmatprep.subr.mxu1 %v5898_v0 }
  0x6c   : > { %5457 = vmatmul.mubr.msk.f32.vlgmr.msra.gmra.mrb[12].mxu0 %vm402_vm1, %v6247_v27  ;;  %5462 = vmatmul.mubr.msk.f32.vlgmr.msra.gmra.mrb[12].mxu1 %vm402_vm1, %v6250_v28 }
  0x6d   : > { %5465 = vmatpush3.msra.mxu0 %v6259_v29  ;;  %5470 = vmatpush3.msra.mxu1 %v6262_v30  ;;  %v6472_v30 = vld [vmem:[%s6282_s24 + $0x78] sm:$0xff] }
  0x6e   : > { %5466 = vmatprep.mubr.msk.f32.mxu0 %vm5899_vm0, %v5898_v0  ;;  %5471 = vmatprep.mubr.msk.f32.mxu1 %vm5899_vm0, %v5898_v0 }
  0x6f   : > { %5474 = vmatprep.subr.mxu0 %v5898_v0  ;;  %5479 = vmatprep.subr.mxu1 %v5898_v0 }
  0x70   : > { %5467 = vmatmul.mubr.msk.f32.vlgmr.msra.gmra.mrb[14].mxu0 %vm402_vm1, %v6271_v31  ;;  %5472 = vmatmul.mubr.msk.f32.vlgmr.msra.gmra.mrb[14].mxu1 %vm402_vm1, %v6274_v32 }
  0x71   : > { %5475 = vmatpush3.msra.mxu0 %v6289_v33  ;;  %5480 = vmatpush3.msra.mxu1 %v6292_v34 }
  0x72   : > { %5476 = vmatprep.mubr.msk.f32.mxu0 %vm5899_vm0, %v5898_v0  ;;  %5481 = vmatprep.mubr.msk.f32.mxu1 %vm5899_vm0, %v5898_v0 }
  0x73   : > { %5484 = vmatprep.subr.mxu0 %v5898_v0  ;;  %5489 = vmatprep.subr.mxu1 %v5898_v0 }
  0x74   : > { %5477 = vmatmul.mubr.msk.f32.vlgmr.msra.gmra.mrb[16].mxu0 %vm402_vm1, %v6301_v35  ;;  %5482 = vmatmul.mubr.msk.f32.vlgmr.msra.gmra.mrb[16].mxu1 %vm402_vm1, %v6304_v36 }
  0x75   : > { %5485 = vmatpush3.msra.mxu0 %v6313_v37  ;;  %5490 = vmatpush3.msra.mxu1 %v6316_v38 }
  0x76   : > { %5486 = vmatprep.mubr.msk.f32.mxu0 %vm5899_vm0, %v5898_v0  ;;  %5491 = vmatprep.mubr.msk.f32.mxu1 %vm5899_vm0, %v5898_v0 }
  0x77   : > { %5494 = vmatprep.subr.mxu0 %v5898_v0  ;;  %5499 = vmatprep.subr.mxu1 %v5898_v0 }
  0x78   : > { %5487 = vmatmul.mubr.msk.f32.vlgmr.msra.gmra.mrb[18].mxu0 %vm402_vm1, %v6325_v39  ;;  %5492 = vmatmul.mubr.msk.f32.vlgmr.msra.gmra.mrb[18].mxu1 %vm402_vm1, %v6328_v40 }
  0x79   : > { %5495 = vmatpush3.msra.mxu0 %v6337_v41  ;;  %5500 = vmatpush3.msra.mxu1 %v6340_v42 }
  0x7a   : > { %5496 = vmatprep.mubr.msk.f32.mxu0 %vm5899_vm0, %v5898_v0  ;;  %5501 = vmatprep.mubr.msk.f32.mxu1 %vm5899_vm0, %v5898_v0 }
  0x7b   : > { %5504 = vmatprep.subr.mxu0 %v5898_v0  ;;  %5509 = vmatprep.subr.mxu1 %v5898_v0 }
  0x7c   : > { %5497 = vmatmul.mubr.msk.f32.vlgmr.msra.gmra.mrb[20].mxu0 %vm402_vm1, %v6349_v43  ;;  %5502 = vmatmul.mubr.msk.f32.vlgmr.msra.gmra.mrb[20].mxu1 %vm402_vm1, %v6352_v44 }
  0x7d   : > { %5505 = vmatpush3.msra.mxu0 %v6361_v45  ;;  %5510 = vmatpush3.msra.mxu1 %v6364_v46 }
  0x7e   : > { %5506 = vmatprep.mubr.msk.f32.mxu0 %vm5899_vm0, %v5898_v0  ;;  %5511 = vmatprep.mubr.msk.f32.mxu1 %vm5899_vm0, %v5898_v0 }
  0x7f   : > { %5514 = vmatprep.subr.mxu0 %v5898_v0  ;;  %5519 = vmatprep.subr.mxu1 %v5898_v0 }
  0x80   : > { %5507 = vmatmul.mubr.msk.f32.vlgmr.msra.gmra.mrb[22].mxu0 %vm402_vm1, %v6373_v47  ;;  %5512 = vmatmul.mubr.msk.f32.vlgmr.msra.gmra.mrb[22].mxu1 %vm402_vm1, %v6376_v48 }
  0x81   : > { %5515 = vmatpush3.msra.mxu0 %v6385_v49  ;;  %5520 = vmatpush3.msra.mxu1 %v6388_v50 }
  0x82   : > { %5516 = vmatprep.mubr.msk.f32.mxu0 %vm5899_vm0, %v5898_v0  ;;  %5521 = vmatprep.mubr.msk.f32.mxu1 %vm5899_vm0, %v5898_v0 }
  0x83   : > { %5524 = vmatprep.subr.mxu0 %v5898_v0  ;;  %5529 = vmatprep.subr.mxu1 %v5898_v0 }
  0x84   : > { %5517 = vmatmul.mubr.msk.f32.vlgmr.msra.gmra.mrb[24].mxu0 %vm402_vm1, %v6397_v51  ;;  %5522 = vmatmul.mubr.msk.f32.vlgmr.msra.gmra.mrb[24].mxu1 %vm402_vm1, %v6400_v52 }
  0x85   : > { %5525 = vmatpush3.msra.mxu0 %v6409_v53  ;;  %5530 = vmatpush3.msra.mxu1 %v6412_v54 }
  0x86   : > { %5526 = vmatprep.mubr.msk.f32.mxu0 %vm5899_vm0, %v5898_v0  ;;  %5531 = vmatprep.mubr.msk.f32.mxu1 %vm5899_vm0, %v5898_v0 }
  0x87   : > { %5534 = vmatprep.subr.mxu0 %v5898_v0  ;;  %5539 = vmatprep.subr.mxu1 %v5898_v0 }
  0x88   : > { %5527 = vmatmul.mubr.msk.f32.vlgmr.msra.gmra.mrb[26].mxu0 %vm402_vm1, %v6421_v55  ;;  %5532 = vmatmul.mubr.msk.f32.vlgmr.msra.gmra.mrb[26].mxu1 %vm402_vm1, %v6424_v56 }
  0x89   : > { %5535 = vmatpush3.msra.mxu0 %v6433_v57  ;;  %5540 = vmatpush3.msra.mxu1 %v6436_v58 }
  0x8a   : > { %5536 = vmatprep.mubr.msk.f32.mxu0 %vm5899_vm0, %v5898_v0  ;;  %5541 = vmatprep.mubr.msk.f32.mxu1 %vm5899_vm0, %v5898_v0 }
  0x8b   : > { %5544 = vmatprep.subr.mxu0 %v5898_v0  ;;  %5549 = vmatprep.subr.mxu1 %v5898_v0 }
  0x8c   : > { %5537 = vmatmul.mubr.msk.f32.vlgmr.msra.gmra.mrb[28].mxu0 %vm402_vm1, %v6445_v59  ;;  %5542 = vmatmul.mubr.msk.f32.vlgmr.msra.gmra.mrb[28].mxu1 %vm402_vm1, %v6448_v60 }
  0x8d   : > { %5545 = vmatpush3.msra.mxu0 %v6457_v61  ;;  %5550 = vmatpush3.msra.mxu1 %v6460_v62 }
  0x8e   : > { %5546 = vmatprep.mubr.msk.f32.mxu0 %vm5899_vm0, %v5898_v0  ;;  %5551 = vmatprep.mubr.msk.f32.mxu1 %vm5899_vm0, %v5898_v0 }
  0x8f   : > { %5554 = vmatprep.subr.mxu0 %v5898_v0  ;;  %5559 = vmatprep.subr.mxu1 %v5898_v0 }
  0x90   : > { %5547 = vmatmul.mubr.msk.f32.vlgmr.msra.gmra.mrb[30].mxu0 %vm402_vm1, %v6469_v63  ;;  %5552 = vmatmul.mubr.msk.f32.vlgmr.msra.gmra.mrb[30].mxu1 %vm402_vm1, %v6472_v30 }
  0x91   : > { %5555 = vmatpush3.msra.mxu0 %v6289_v33  ;;  %5560 = vmatpush3.msra.mxu1 %v6292_v34 }
  0x92   : > { %5556 = vmatprep.mubr.msk.f32.mxu0 %vm5899_vm0, %v5898_v0  ;;  %5561 = vmatprep.mubr.msk.f32.mxu1 %vm5899_vm0, %v5898_v0 }
  0x93   : > { %5564 = vmatprep.subr.mxu0 %v5898_v0  ;;  %5569 = vmatprep.subr.mxu1 %v5898_v0 }
  0x94   : > { %5557 = vmatmul.mubr.msk.f32.vlgmr.msra.gmra.mrb[32].mxu0 %vm402_vm1, %v6107_v3  ;;  %5562 = vmatmul.mubr.msk.f32.vlgmr.msra.gmra.mrb[32].mxu1 %vm402_vm1, %v6112_v4 }
  0x95   : > { %5565 = vmatpush3.msra.mxu0 %v6313_v37  ;;  %5570 = vmatpush3.msra.mxu1 %v6316_v38 }
  0x96   : > { %5566 = vmatprep.mubr.msk.f32.mxu0 %vm5899_vm0, %v5898_v0  ;;  %5571 = vmatprep.mubr.msk.f32.mxu1 %vm5899_vm0, %v5898_v0 }
  0x97   : > { %5574 = vmatprep.subr.mxu0 %v5898_v0  ;;  %5579 = vmatprep.subr.mxu1 %v5898_v0 }
  0x98   : > { %5567 = vmatmul.mubr.msk.f32.vlgmr.msra.gmra.mrb[34].mxu0 %vm402_vm1, %v6127_v7  ;;  %5572 = vmatmul.mubr.msk.f32.vlgmr.msra.gmra.mrb[34].mxu1 %vm402_vm1, %v6130_v8 }
  0x99   : > { %5575 = vmatpush3.msra.mxu0 %v6337_v41  ;;  %5580 = vmatpush3.msra.mxu1 %v6340_v42 }
  0x9a   : > { %5576 = vmatprep.mubr.msk.f32.mxu0 %vm5899_vm0, %v5898_v0  ;;  %5581 = vmatprep.mubr.msk.f32.mxu1 %vm5899_vm0, %v5898_v0 }
  0x9b   : > { %5584 = vmatprep.subr.mxu0 %v5898_v0  ;;  %5589 = vmatprep.subr.mxu1 %v5898_v0 }
  0x9c   : > { %5577 = vmatmul.mubr.msk.f32.vlgmr.msra.gmra.mrb[36].mxu0 %vm402_vm1, %v6151_v11  ;;  %5582 = vmatmul.mubr.msk.f32.vlgmr.msra.gmra.mrb[36].mxu1 %vm402_vm1, %v6154_v12 }
  0x9d   : > { %5585 = vmatpush3.msra.mxu0 %v6361_v45  ;;  %5590 = vmatpush3.msra.mxu1 %v6364_v46 }
  0x9e   : > { %5586 = vmatprep.mubr.msk.f32.mxu0 %vm5899_vm0, %v5898_v0  ;;  %5591 = vmatprep.mubr.msk.f32.mxu1 %vm5899_vm0, %v5898_v0 }
  0x9f   : > { %5594 = vmatprep.subr.mxu0 %v5898_v0  ;;  %5599 = vmatprep.subr.mxu1 %v5898_v0 }
  0xa0   : > { %5587 = vmatmul.mubr.msk.f32.vlgmr.msra.gmra.mrb[38].mxu0 %vm402_vm1, %v6175_v15  ;;  %5592 = vmatmul.mubr.msk.f32.vlgmr.msra.gmra.mrb[38].mxu1 %vm402_vm1, %v6178_v16 }
  0xa1   : > { %5595 = vmatpush3.msra.mxu0 %v6385_v49  ;;  %5600 = vmatpush3.msra.mxu1 %v6388_v50 }
  0xa2   : > { %5596 = vmatprep.mubr.msk.f32.mxu0 %vm5899_vm0, %v5898_v0  ;;  %5601 = vmatprep.mubr.msk.f32.mxu1 %vm5899_vm0, %v5898_v0 }
  0xa3   : > { %5604 = vmatprep.subr.mxu0 %v5898_v0  ;;  %5609 = vmatprep.subr.mxu1 %v5898_v0 }
  0xa4   : > { %5597 = vmatmul.mubr.msk.f32.vlgmr.msra.gmra.mrb[40].mxu0 %vm402_vm1, %v6199_v19  ;;  %5602 = vmatmul.mubr.msk.f32.vlgmr.msra.gmra.mrb[40].mxu1 %vm402_vm1, %v6202_v20 }
  0xa5   : > { %5605 = vmatpush3.msra.mxu0 %v6409_v53  ;;  %5610 = vmatpush3.msra.mxu1 %v6412_v54 }
  0xa6   : > { %5606 = vmatprep.mubr.msk.f32.mxu0 %vm5899_vm0, %v5898_v0  ;;  %5611 = vmatprep.mubr.msk.f32.mxu1 %vm5899_vm0, %v5898_v0 }
  0xa7   : > { %5614 = vmatprep.subr.mxu0 %v5898_v0  ;;  %5619 = vmatprep.subr.mxu1 %v5898_v0 }
  0xa8   : > { %5607 = vmatmul.mubr.msk.f32.vlgmr.msra.gmra.mrb[42].mxu0 %vm402_vm1, %v6223_v23  ;;  %5612 = vmatmul.mubr.msk.f32.vlgmr.msra.gmra.mrb[42].mxu1 %vm402_vm1, %v6226_v24 }
  0xa9   : > { %5615 = vmatpush3.msra.mxu0 %v6433_v57  ;;  %5620 = vmatpush3.msra.mxu1 %v6436_v58 }
  0xaa   : > { %5616 = vmatprep.mubr.msk.f32.mxu0 %vm5899_vm0, %v5898_v0  ;;  %5621 = vmatprep.mubr.msk.f32.mxu1 %vm5899_vm0, %v5898_v0 }
  0xab   : > { %5624 = vmatprep.subr.mxu0 %v5898_v0  ;;  %5629 = vmatprep.subr.mxu1 %v5898_v0 }
  0xac   : > { %5617 = vmatmul.mubr.msk.f32.vlgmr.msra.gmra.mrb[44].mxu0 %vm402_vm1, %v6247_v27  ;;  %5622 = vmatmul.mubr.msk.f32.vlgmr.msra.gmra.mrb[44].mxu1 %vm402_vm1, %v6250_v28 }
  0xad   : > { %5625 = vmatpush3.msra.mxu0 %v6457_v61  ;;  %5630 = vmatpush3.msra.mxu1 %v6460_v62 }
  0xae   : > { %5626 = vmatprep.mubr.msk.f32.mxu0 %vm5899_vm0, %v5898_v0  ;;  %5631 = vmatprep.mubr.msk.f32.mxu1 %vm5899_vm0, %v5898_v0 }
  0xaf   : > { %5634 = vmatprep.subr.mxu0 %v5898_v0  ;;  %5639 = vmatprep.subr.mxu1 %v5898_v0 }
  0xb0   : > { %5627 = vmatmul.mubr.msk.f32.vlgmr.msra.gmra.mrb[46].mxu0 %vm402_vm1, %v6271_v31  ;;  %5632 = vmatmul.mubr.msk.f32.vlgmr.msra.gmra.mrb[46].mxu1 %vm402_vm1, %v6274_v32 }
  0xb1   : > { %5635 = vmatpush3.msra.mxu0 %v6101_v1  ;;  %5640 = vmatpush3.msra.mxu1 %v6104_v2  ;;  %v6759_v1 = vld [vmem:[#allocation8_spill] sm:$0xff] }
  0xb2   : > { %5636 = vmatprep.mubr.msk.f32.mxu0 %vm5899_vm0, %v5898_v0  ;;  %5641 = vmatprep.mubr.msk.f32.mxu1 %vm5899_vm0, %v5898_v0 }
  0xb3   : > { %5644 = vmatprep.subr.mxu0 %v5898_v0  ;;  %5649 = vmatprep.subr.mxu1 %v5898_v0 }
  0xb4   : > { %5637 = vmatmul.mubr.msk.f32.vlgmr.msra.gmra.mrb[32].mxu0 %vm402_vm1, %v6301_v35  ;;  %5642 = vmatmul.mubr.msk.f32.vlgmr.msra.gmra.mrb[32].mxu1 %vm402_vm1, %v6304_v36 }
  0xb5   : > { %5645 = vmatpush3.msra.mxu0 %v6115_v5  ;;  %5650 = vmatpush3.msra.mxu1 %v6118_v6 }
  0xb6   : > { %5646 = vmatprep.mubr.msk.f32.mxu0 %vm5899_vm0, %v5898_v0  ;;  %5651 = vmatprep.mubr.msk.f32.mxu1 %vm5899_vm0, %v5898_v0 }
  0xb7   : > { %5654 = vmatprep.subr.mxu0 %v5898_v0  ;;  %5659 = vmatprep.subr.mxu1 %v5898_v0 }
  0xb8   : > { %5647 = vmatmul.mubr.msk.f32.vlgmr.msra.gmra.mrb[34].mxu0 %vm402_vm1, %v6325_v39  ;;  %5652 = vmatmul.mubr.msk.f32.vlgmr.msra.gmra.mrb[34].mxu1 %vm402_vm1, %v6328_v40 }
  0xb9   : > { %5655 = vmatpush3.msra.mxu0 %v6139_v9  ;;  %5660 = vmatpush3.msra.mxu1 %v6142_v10 }
  0xba   : > { %5656 = vmatprep.mubr.msk.f32.mxu0 %vm5899_vm0, %v5898_v0  ;;  %5661 = vmatprep.mubr.msk.f32.mxu1 %vm5899_vm0, %v5898_v0 }
  0xbb   : > { %5664 = vmatprep.subr.mxu0 %v5898_v0  ;;  %5669 = vmatprep.subr.mxu1 %v5898_v0 }
  0xbc   : > { %5657 = vmatmul.mubr.msk.f32.vlgmr.msra.gmra.mrb[36].mxu0 %vm402_vm1, %v6349_v43  ;;  %5662 = vmatmul.mubr.msk.f32.vlgmr.msra.gmra.mrb[36].mxu1 %vm402_vm1, %v6352_v44 }
  0xbd   : > { %5665 = vmatpush3.msra.mxu0 %v6163_v13  ;;  %5670 = vmatpush3.msra.mxu1 %v6166_v14 }
  0xbe   : > { %5666 = vmatprep.mubr.msk.f32.mxu0 %vm5899_vm0, %v5898_v0  ;;  %5671 = vmatprep.mubr.msk.f32.mxu1 %vm5899_vm0, %v5898_v0 }
  0xbf   : > { %5674 = vmatprep.subr.mxu0 %v5898_v0  ;;  %5679 = vmatprep.subr.mxu1 %v5898_v0 }
  0xc0   : > { %5667 = vmatmul.mubr.msk.f32.vlgmr.msra.gmra.mrb[38].mxu0 %vm402_vm1, %v6373_v47  ;;  %5672 = vmatmul.mubr.msk.f32.vlgmr.msra.gmra.mrb[38].mxu1 %vm402_vm1, %v6376_v48 }
  0xc1   : > { %5675 = vmatpush3.msra.mxu0 %v6187_v17  ;;  %5680 = vmatpush3.msra.mxu1 %v6190_v18 }
  0xc2   : > { %5676 = vmatprep.mubr.msk.f32.mxu0 %vm5899_vm0, %v5898_v0  ;;  %5681 = vmatprep.mubr.msk.f32.mxu1 %vm5899_vm0, %v5898_v0 }
  0xc3   : > { %5684 = vmatprep.subr.mxu0 %v5898_v0  ;;  %5689 = vmatprep.subr.mxu1 %v5898_v0 }
  0xc4   : > { %5677 = vmatmul.mubr.msk.f32.vlgmr.msra.gmra.mrb[40].mxu0 %vm402_vm1, %v6397_v51  ;;  %5682 = vmatmul.mubr.msk.f32.vlgmr.msra.gmra.mrb[40].mxu1 %vm402_vm1, %v6400_v52 }
  0xc5   : > { %5685 = vmatpush3.msra.mxu0 %v6211_v21  ;;  %5690 = vmatpush3.msra.mxu1 %v6214_v22 }
  0xc6   : > { %5686 = vmatprep.mubr.msk.f32.mxu0 %vm5899_vm0, %v5898_v0  ;;  %5691 = vmatprep.mubr.msk.f32.mxu1 %vm5899_vm0, %v5898_v0 }
  0xc7   : > { %5694 = vmatprep.subr.mxu0 %v5898_v0  ;;  %5699 = vmatprep.subr.mxu1 %v5898_v0 }
  0xc8   : > { %5687 = vmatmul.mubr.msk.f32.vlgmr.msra.gmra.mrb[42].mxu0 %vm402_vm1, %v6421_v55  ;;  %5692 = vmatmul.mubr.msk.f32.vlgmr.msra.gmra.mrb[42].mxu1 %vm402_vm1, %v6424_v56 }
  0xc9   : > { %5695 = vmatpush3.msra.mxu0 %v6235_v25  ;;  %5700 = vmatpush3.msra.mxu1 %v6238_v26 }
  0xca   : > { %5696 = vmatprep.mubr.msk.f32.mxu0 %vm5899_vm0, %v5898_v0  ;;  %5701 = vmatprep.mubr.msk.f32.mxu1 %vm5899_vm0, %v5898_v0 }
  0xcb   : > { %5704 = vmatprep.subr.mxu0 %v5898_v0  ;;  %5709 = vmatprep.subr.mxu1 %v5898_v0 }
  0xcc   : > { %5697 = vmatmul.mubr.msk.f32.vlgmr.msra.gmra.mrb[44].mxu0 %vm402_vm1, %v6445_v59  ;;  %5702 = vmatmul.mubr.msk.f32.vlgmr.msra.gmra.mrb[44].mxu1 %vm402_vm1, %v6448_v60 }
  0xcd   : > { %5705 = vmatpush3.msra.mxu0 %v6259_v29  ;;  %5710 = vmatpush3.msra.mxu1 %v6759_v1 }
  0xce   : > { %5706 = vmatprep.mubr.msk.f32.mxu0 %vm5899_vm0, %v5898_v0  ;;  %5711 = vmatprep.mubr.msk.f32.mxu1 %vm5899_vm0, %v5898_v0 }
  0xd0   : > { %5707 = vmatmul.mubr.msk.f32.vlgmr.msra.gmra.mrb[46].mxu0 %vm402_vm1, %v6469_v63  ;;  %5712 = vmatmul.mubr.msk.f32.vlgmr.msra.gmra.mrb[46].mxu1 %vm402_vm1, %v6472_v30 }
 0x127   : > { %v472_v2 = vpop.f32.mrb[0].mxu0  ;;  %v545_v3 = vpop.f32.mrb[0].mxu1 }
 0x128   : > { %v5398_v4 = vpop.f32.mrb[1].mxu0  ;;  %v5403_v5 = vpop.f32.mrb[1].mxu1 }
 0x12b   : > { %v618_v6 = vpop.f32.mrb[2].mxu0  ;;  %v691_v7 = vpop.f32.mrb[2].mxu1 }
 0x12c   : > { %v5408_v8 = vpop.f32.mrb[3].mxu0  ;;  %v5413_v9 = vpop.f32.mrb[3].mxu1 }
 0x12f   : > { %v764_v10 = vpop.f32.mrb[4].mxu0  ;;  %v837_v11 = vpop.f32.mrb[4].mxu1 }
 0x130   : > { %v5418_v12 = vpop.f32.mrb[5].mxu0  ;;  %v5423_v13 = vpop.f32.mrb[5].mxu1 }
 0x133   : > { %v910_v14 = vpop.f32.mrb[6].mxu0  ;;  %v983_v0 = vpop.f32.mrb[6].mxu1 }
 0x134   : > { %v5428_v15 = vpop.f32.mrb[7].mxu0  ;;  %v5433_v16 = vpop.f32.mrb[7].mxu1 }
 0x137   : > { %v1056_v17 = vpop.f32.mrb[8].mxu0  ;;  %v1129_v18 = vpop.f32.mrb[8].mxu1 }
 0x138   : > { %v5438_v19 = vpop.f32.mrb[9].mxu0  ;;  %v5443_v20 = vpop.f32.mrb[9].mxu1 }
 0x13b   : > { %v1202_v21 = vpop.f32.mrb[10].mxu0  ;;  %v1275_v22 = vpop.f32.mrb[10].mxu1 }
 0x13c   : > { %v5448_v23 = vpop.f32.mrb[11].mxu0  ;;  %v5453_v24 = vpop.f32.mrb[11].mxu1 }
 0x13f   : > { %v6676_v25 = vpop.f32.mrb[12].mxu0  ;;  %v6678_v26 = vpop.f32.mrb[12].mxu1 }
 0x140   : > { %v5458_v27 = vpop.f32.mrb[13].mxu0  ;;  %v5463_v28 = vpop.f32.mrb[13].mxu1 }
 0x143   : > { %v6680_v29 = vpop.f32.mrb[14].mxu0  ;;  %v6682_v30 = vpop.f32.mrb[14].mxu1 }
 0x144   : > { %v5468_v31 = vpop.f32.mrb[15].mxu0  ;;  %v5473_v32 = vpop.f32.mrb[15].mxu1 }
 0x147   : > { %v1640_v33 = vpop.f32.mrb[16].mxu0  ;;  %v1713_v34 = vpop.f32.mrb[16].mxu1 }
 0x148   : > { %v2739_v35 = vsub.f32 %v472_v2, %v1640_v33  ;;  %v2740_v36 = vsub.f32 %v545_v3, %v1713_v34  ;;  %v5478_v37 = vpop.f32.mrb[17].mxu0  ;;  %v5483_v38 = vpop.f32.mrb[17].mxu1 }
 0x14a   : > { %2755 = vst [vmem:[%s6688_s25] sm:$0xff] %v2739_v35  ;;  %2756 = vst [vmem:[%s6688_s25 + $0x8] sm:$0xff] %v2740_v36 }
 0x14b   : > { %v1786_v39 = vpop.f32.mrb[18].mxu0  ;;  %v1859_v40 = vpop.f32.mrb[18].mxu1 }
 0x14c   : > { %v2741_v41 = vsub.f32 %v618_v6, %v1786_v39  ;;  %v2742_v42 = vsub.f32 %v691_v7, %v1859_v40  ;;  %v5488_v43 = vpop.f32.mrb[19].mxu0  ;;  %v5493_v44 = vpop.f32.mrb[19].mxu1 }
 0x14e   : > { %2757 = vst [vmem:[%s6688_s25 + $0x10] sm:$0xff] %v2741_v41  ;;  %2758 = vst [vmem:[%s6688_s25 + $0x18] sm:$0xff] %v2742_v42 }
 0x14f   : > { %v1932_v45 = vpop.f32.mrb[20].mxu0  ;;  %v2005_v46 = vpop.f32.mrb[20].mxu1 }
 0x150   : > { %v2743_v47 = vsub.f32 %v764_v10, %v1932_v45  ;;  %v2744_v48 = vsub.f32 %v837_v11, %v2005_v46  ;;  %v5498_v49 = vpop.f32.mrb[21].mxu0  ;;  %v5503_v50 = vpop.f32.mrb[21].mxu1 }
 0x152   : > { %2759 = vst [vmem:[%s6688_s25 + $0x20] sm:$0xff] %v2743_v47  ;;  %2760 = vst [vmem:[%s6688_s25 + $0x28] sm:$0xff] %v2744_v48 }
 0x153   : > { %v2078_v51 = vpop.f32.mrb[22].mxu0  ;;  %v2151_v52 = vpop.f32.mrb[22].mxu1 }
 0x154   : > { %v2745_v53 = vsub.f32 %v910_v14, %v2078_v51  ;;  %v2746_v54 = vsub.f32 %v983_v0, %v2151_v52  ;;  %v5508_v55 = vpop.f32.mrb[23].mxu0  ;;  %v5513_v56 = vpop.f32.mrb[23].mxu1 }
 0x156   : > { %2761 = vst [vmem:[%s6688_s25 + $0x30] sm:$0xff] %v2745_v53  ;;  %2762 = vst [vmem:[%s6688_s25 + $0x38] sm:$0xff] %v2746_v54 }
 0x157   : > { %v2224_v57 = vpop.f32.mrb[24].mxu0  ;;  %v2297_v58 = vpop.f32.mrb[24].mxu1 }
 0x158   : > { %v2747_v59 = vsub.f32 %v1056_v17, %v2224_v57  ;;  %v2748_v60 = vsub.f32 %v1129_v18, %v2297_v58  ;;  %v5518_v61 = vpop.f32.mrb[25].mxu0  ;;  %v5523_v62 = vpop.f32.mrb[25].mxu1 }
 0x15a   : > { %2763 = vst [vmem:[%s6688_s25 + $0x40] sm:$0xff] %v2747_v59  ;;  %2764 = vst [vmem:[%s6688_s25 + $0x48] sm:$0xff] %v2748_v60 }
 0x15b   : > { %v2370_v63 = vpop.f32.mrb[26].mxu0  ;;  %v2443_v1 = vpop.f32.mrb[26].mxu1 }
 0x15c   : > { %v2749_v2 = vsub.f32 %v1202_v21, %v2370_v63  ;;  %v2750_v3 = vsub.f32 %v1275_v22, %v2443_v1  ;;  %v5528_v4 = vpop.f32.mrb[27].mxu0  ;;  %v5533_v5 = vpop.f32.mrb[27].mxu1 }
 0x15e   : > { %2765 = vst [vmem:[%s6688_s25 + $0x50] sm:$0xff] %v2749_v2  ;;  %2766 = vst [vmem:[%s6688_s25 + $0x58] sm:$0xff] %v2750_v3 }
 0x15f   : > { %v2516_v6 = vpop.f32.mrb[28].mxu0  ;;  %v2589_v7 = vpop.f32.mrb[28].mxu1 }
 0x160   : > { %v2751_v8 = vsub.f32 %v6676_v25, %v2516_v6  ;;  %v2752_v9 = vsub.f32 %v6678_v26, %v2589_v7  ;;  %v5538_v10 = vpop.f32.mrb[29].mxu0  ;;  %v5543_v11 = vpop.f32.mrb[29].mxu1 }
 0x162   : > { %2767 = vst [vmem:[%s6688_s25 + $0x60] sm:$0xff] %v2751_v8  ;;  %2768 = vst [vmem:[%s6688_s25 + $0x68] sm:$0xff] %v2752_v9 }
 0x163   : > { %v2662_v12 = vpop.f32.mrb[30].mxu0  ;;  %v2735_v13 = vpop.f32.mrb[30].mxu1 }
 0x164   : > { %v2753_v14 = vsub.f32 %v6680_v29, %v2662_v12  ;;  %v2754_v0 = vsub.f32 %v6682_v30, %v2735_v13  ;;  %v5548_v15 = vpop.f32.mrb[31].mxu0  ;;  %v5553_v16 = vpop.f32.mrb[31].mxu1 }
 0x166   : > { %2769 = vst [vmem:[%s6688_s25 + $0x70] sm:$0xff] %v2753_v14  ;;  %2770 = vst [vmem:[%s6688_s25 + $0x78] sm:$0xff] %v2754_v0 }
 0x187   : > { %v3957_v17 = vpop.f32.mrb[32].mxu0  ;;  %v4027_v18 = vpop.f32.mrb[32].mxu1 }
 0x188   : > { %5011 = vst [vmem:[%s6714_s7] sm:$0xff] %v3957_v17  ;;  %5012 = vst [vmem:[%s6714_s7 + $0x8] sm:$0xff] %v4027_v18  ;;  %v5638_v19 = vpop.f32.mrb[33].mxu0  ;;  %v5643_v20 = vpop.f32.mrb[33].mxu1 }
 0x18b   : > { %v4097_v21 = vpop.f32.mrb[34].mxu0  ;;  %v4167_v22 = vpop.f32.mrb[34].mxu1 }
 0x18c   : > { %5013 = vst [vmem:[%s6714_s7 + $0x10] sm:$0xff] %v4097_v21  ;;  %5014 = vst [vmem:[%s6714_s7 + $0x18] sm:$0xff] %v4167_v22  ;;  %v5648_v23 = vpop.f32.mrb[35].mxu0  ;;  %v5653_v24 = vpop.f32.mrb[35].mxu1 }
 0x18f   : > { %v4237_v25 = vpop.f32.mrb[36].mxu0  ;;  %v4307_v26 = vpop.f32.mrb[36].mxu1 }
 0x190   : > { %5015 = vst [vmem:[%s6714_s7 + $0x20] sm:$0xff] %v4237_v25  ;;  %5016 = vst [vmem:[%s6714_s7 + $0x28] sm:$0xff] %v4307_v26  ;;  %v5658_v27 = vpop.f32.mrb[37].mxu0  ;;  %v5663_v28 = vpop.f32.mrb[37].mxu1 }
 0x193   : > { %v4377_v29 = vpop.f32.mrb[38].mxu0  ;;  %v4447_v30 = vpop.f32.mrb[38].mxu1 }
 0x194   : > { %5017 = vst [vmem:[%s6714_s7 + $0x30] sm:$0xff] %v4377_v29  ;;  %5018 = vst [vmem:[%s6714_s7 + $0x38] sm:$0xff] %v4447_v30  ;;  %v5668_v31 = vpop.f32.mrb[39].mxu0  ;;  %v5673_v32 = vpop.f32.mrb[39].mxu1 }
 0x197   : > { %v4517_v33 = vpop.f32.mrb[40].mxu0  ;;  %v4587_v34 = vpop.f32.mrb[40].mxu1 }
 0x198   : > { %5019 = vst [vmem:[%s6714_s7 + $0x40] sm:$0xff] %v4517_v33  ;;  %5020 = vst [vmem:[%s6714_s7 + $0x48] sm:$0xff] %v4587_v34  ;;  %v5678_v35 = vpop.f32.mrb[41].mxu0  ;;  %v5683_v36 = vpop.f32.mrb[41].mxu1 }
 0x19b   : > { %v4657_v37 = vpop.f32.mrb[42].mxu0  ;;  %v4727_v38 = vpop.f32.mrb[42].mxu1 }
 0x19c   : > { %5021 = vst [vmem:[%s6714_s7 + $0x50] sm:$0xff] %v4657_v37  ;;  %5022 = vst [vmem:[%s6714_s7 + $0x58] sm:$0xff] %v4727_v38  ;;  %v5688_v39 = vpop.f32.mrb[43].mxu0  ;;  %v5693_v40 = vpop.f32.mrb[43].mxu1 }
 0x19f   : > { %v4797_v41 = vpop.f32.mrb[44].mxu0  ;;  %v4867_v42 = vpop.f32.mrb[44].mxu1 }
 0x1a0   : > { %5023 = vst [vmem:[%s6714_s7 + $0x60] sm:$0xff] %v4797_v41  ;;  %5024 = vst [vmem:[%s6714_s7 + $0x68] sm:$0xff] %v4867_v42  ;;  %v5698_v43 = vpop.f32.mrb[45].mxu0  ;;  %v5703_v44 = vpop.f32.mrb[45].mxu1 }
 0x1a3   : > { %v4937_v45 = vpop.f32.mrb[46].mxu0  ;;  %v5007_v46 = vpop.f32.mrb[46].mxu1 }
 0x1a4   : > { %5025 = vst [vmem:[%s6714_s7 + $0x70] sm:$0xff] %v4937_v45  ;;  %5026 = vst [vmem:[%s6714_s7 + $0x78] sm:$0xff] %v5007_v46  ;;  %v5708_v47 = vpop.f32.mrb[47].mxu0  ;;  %v5713_v48 = vpop.f32.mrb[47].mxu1 }
 0x1a5 PF: > { %p19_p11 = scmp.ge.s32.totalorder %s5952_s23, 4   ;;  %s6760_s18 = smov %s5884_s19 }
 0x1a6   : > { %s6761_s19 = smov %s5888_s20  ;;  %s6762_s20 = smov %s5962_s26 }
 0x1a7   : > { %s6763_s21 = smov %s5952_s23  ;;  %21 = sbr.rel (!%p19_p11) target bundleno = 5 (0x5), region = 107 }
 0x1ae   :  { %5064 = vsyncpa [#allocation3], 1 }
 0x1af   :  { %5066 = vsyncpa [#allocation3 + $0x1], 1 }
 0x1b0   :  { %5067 = vsyncpa [#allocation5], 1 }
 0x1b1   :  { %5069 = vsyncpa [#allocation5 + $0x1], 1 }

// kernel: _lambda_.5
= control target key start
LH: loop header
LB: loop body
LE: loop exit
PB: predicated region body
PF: predicated region fallthrough
CT: control target
= control target key end

     0   :  { %s6148_s18 = smov 0   ;;  %s6855_s0 = inlined_call_operand.vmem [shape: f32[2,16,8,16], index: 0, kind: input, shape index: {}]   ;;  %s6856_s1 = inlined_call_operand.vmem [shape: f32[2,16,8,16], index: 1, kind: input, shape index: {}]   ;;  %s6857_s2 = inlined_call_operand.vmem [shape: f32[2,16,16,128], index: 2, kind: input, shape index: {}]   ;;  %s6858_s3 = inlined_call_operand.vmem [shape: f32[2,16,16,128], index: 3, kind: input, shape index: {}]   ;;  %s6859_s4 = inlined_call_operand.vmem [shape: f32[2,16,8,128], index: 4, kind: output, shape index: {0}]   ;;  %s6860_s5 = inlined_call_operand.vmem [shape: f32[2,16,8,128], index: 5, kind: output, shape index: {1}]  }
   0x1 LB: > { %s5143_s19 = sadd.s32 4294967295, %s6113_s18   ;;  %p5147_p0 = scmp.ge.s32.totalorder %s6113_s18, 1  ;;  %s6113_s18 = sphi %s6148_s18, %s16_s18  }
   0x2   : > { %p220_p1 = scmp.lt.s32.totalorder %s6113_s18, 3 }
   0x4   : > { %p221_p2 = pnand %p5147_p0, %p220_p1 }
   0x6   : > { %224 = sbr.rel (%p221_p2) target bundleno = 362 (0x16a), region = 36 }
   0xd   : > { %p268_p3 = scmp.lt.s32.totalorder %s5143_s19, 1  ;;  %v6861_v0 = vmov 0.0|0.0   ;;  %vm6116_vm0 = vmmov 0   ;;  %v6117_v1 = vmov 0.0   ;;  %vm394_vm1 = vcmask 130048  }
   0xe   : > { %5872 = vmatprep.subr.bf16.mxu0 %v6861_v0  ;;  %5875 = vmatprep.subr.bf16.mxu1 %v6861_v0 }
   0xf   : > { %s6877_s19 = smov (!%p268_p3, %s5143_s19), 1  ;;  %5428 = vmatprep.mubr.msk.f32.mxu0 %vm6116_vm0, %v6117_v1  ;;  %5435 = vmatprep.mubr.msk.f32.mxu1 %vm6116_vm0, %v6117_v1 }
  0x10   : > { %s5228_s20 = sshll.u32 %s6877_s19, 8  ;;  %s6166_s21 = sshll.u32 %s6877_s19, 7 }
  0x11   : > { %s6173_s24 = scalar_lea.vmem %s6857_s2, %s5228_s20  ;;  %s6182_s27 = scalar_lea.vmem %s6855_s0, %s6166_s21 }
  0x12   : > { %v330_v2 = vld [vmem:[%s6173_s24] sm:$0xff]  ;;  %v331_v3 = vld [vmem:[%s6173_s24 + $0x8] sm:$0xff]  ;;  %v332_v4 = vld [vmem:[%s6173_s24 + $0x10] sm:$0xff]  ;;  %s6340_s30 = scalar_lea.vmem %s6858_s3, %s5228_s20  ;;  %s6396_s8 = scalar_lea.vmem %s6856_s1, %s6166_s21 }
  0x13   : > { %v6184_v5 = vpack.c.bf16 %v331_v3, %v330_v2  ;;  %v333_v6 = vld [vmem:[%s6173_s24 + $0x18] sm:$0xff]  ;;  %v334_v8 = vld [vmem:[%s6173_s24 + $0x20] sm:$0xff]  ;;  %v335_v9 = vld [vmem:[%s6173_s24 + $0x28] sm:$0xff]  ;;  %s6808_s11 = scalar_lea.vmem %s6859_s4, %s6166_s21  ;;  %s6834_s14 = scalar_lea.vmem %s6860_s5, %s6166_s21 }
  0x14   : > { %v6187_v7 = vpack.c.bf16 %v333_v6, %v332_v4  ;;  %v336_v10 = vld [vmem:[%s6173_s24 + $0x30] sm:$0xff]  ;;  %v6194_v11 = vld [vmem:[%s6182_s27] sm:$0xff]  ;;  %v6196_v12 = vpack.c.bf16 %v335_v9, %v334_v8  ;;  %v337_v13 = vld [vmem:[%s6173_s24 + $0x38] sm:$0xff] }
  0x15   : > { %5874 = vmatpush3.bf16.msra.mxu0 %v6184_v5  ;;  %v6201_v14 = vld [vmem:[%s6182_s27 + $0x8] sm:$0xff]  ;;  %v6204_v15 = vpack.c.bf16 %v337_v13, %v336_v10  ;;  %v338_v16 = vld [vmem:[%s6173_s24 + $0x40] sm:$0xff]  ;;  %v340_v18 = vld [vmem:[%s6173_s24 + $0x50] sm:$0xff] }
  0x16   : > { %5877 = vmatpush3.bf16.msra.mxu1 %v6187_v7  ;;  %5878 = vmatprep.subr.bf16.mxu0 %v6861_v0  ;;  %v339_v17 = vld [vmem:[%s6173_s24 + $0x48] sm:$0xff]  ;;  %v341_v19 = vld [vmem:[%s6173_s24 + $0x58] sm:$0xff]  ;;  %v6217_v20 = vld [vmem:[%s6182_s27 + $0x10] sm:$0xff] }
  0x17   : > { %5881 = vmatprep.subr.bf16.mxu1 %v6861_v0  ;;  %v6219_v21 = vpack.c.bf16 %v339_v17, %v338_v16  ;;  %v6225_v22 = vld [vmem:[%s6182_s27 + $0x18] sm:$0xff]  ;;  %v6227_v23 = vpack.c.bf16 %v341_v19, %v340_v18  ;;  %v342_v24 = vld [vmem:[%s6173_s24 + $0x60] sm:$0xff]  ;;  %v343_v25 = vld [vmem:[%s6173_s24 + $0x68] sm:$0xff] }
  0x18   : > { %5429 = vmatmul.mubr.msk.f32.vlgmr.msra.gmra.mrb[0].mxu0 %vm394_vm1, %v6194_v11  ;;  %v344_v26 = vld [vmem:[%s6173_s24 + $0x70] sm:$0xff]  ;;  %v345_v27 = vld [vmem:[%s6173_s24 + $0x78] sm:$0xff]  ;;  %v6243_v28 = vld [vmem:[%s6182_s27 + $0x20] sm:$0xff]  ;;  %v6245_v29 = vpack.c.bf16 %v343_v25, %v342_v24 }
  0x19   : > { %5436 = vmatmul.mubr.msk.f32.vlgmr.msra.gmra.mrb[0].mxu1 %vm394_vm1, %v6201_v14  ;;  %5880 = vmatpush3.bf16.msra.mxu0 %v6196_v12  ;;  %v6251_v30 = vld [vmem:[%s6182_s27 + $0x28] sm:$0xff]  ;;  %v6253_v31 = vpack.c.bf16 %v345_v27, %v344_v26  ;;  %v346_v32 = vld [vmem:[%s6173_s24 + $0x80] sm:$0xff]  ;;  %v348_v34 = vld [vmem:[%s6173_s24 + $0x90] sm:$0xff] }
  0x1a   : > { %5883 = vmatpush3.bf16.msra.mxu1 %v6204_v15  ;;  %5442 = vmatprep.mubr.msk.f32.mxu0 %vm6116_vm0, %v6117_v1  ;;  %v347_v33 = vld [vmem:[%s6173_s24 + $0x88] sm:$0xff]  ;;  %v349_v35 = vld [vmem:[%s6173_s24 + $0x98] sm:$0xff]  ;;  %v6269_v36 = vld [vmem:[%s6182_s27 + $0x30] sm:$0xff] }
  0x1b   : > { %5449 = vmatprep.mubr.msk.f32.mxu1 %vm6116_vm0, %v6117_v1  ;;  %5884 = vmatprep.subr.bf16.mxu0 %v6861_v0  ;;  %v6271_v37 = vpack.c.bf16 %v347_v33, %v346_v32  ;;  %v6277_v38 = vld [vmem:[%s6182_s27 + $0x38] sm:$0xff]  ;;  %v6279_v39 = vpack.c.bf16 %v349_v35, %v348_v34  ;;  %v350_v40 = vld [vmem:[%s6173_s24 + $0xa0] sm:$0xff]  ;;  %v351_v41 = vld [vmem:[%s6173_s24 + $0xa8] sm:$0xff] }
  0x1c   : > { %5443 = vmatmul.mubr.msk.f32.vlgmr.msra.gmra.mrb[2].mxu0 %vm394_vm1, %v6217_v20  ;;  %5887 = vmatprep.subr.bf16.mxu1 %v6861_v0  ;;  %v352_v42 = vld [vmem:[%s6173_s24 + $0xb0] sm:$0xff]  ;;  %v353_v43 = vld [vmem:[%s6173_s24 + $0xb8] sm:$0xff]  ;;  %v6295_v44 = vld [vmem:[%s6182_s27 + $0x40] sm:$0xff]  ;;  %v6297_v45 = vpack.c.bf16 %v351_v41, %v350_v40 }
  0x1d   : > { %5450 = vmatmul.mubr.msk.f32.vlgmr.msra.gmra.mrb[2].mxu1 %vm394_vm1, %v6225_v22  ;;  %5886 = vmatpush3.bf16.msra.mxu0 %v6219_v21  ;;  %v6303_v46 = vld [vmem:[%s6182_s27 + $0x48] sm:$0xff]  ;;  %v6305_v47 = vpack.c.bf16 %v353_v43, %v352_v42  ;;  %v354_v48 = vld [vmem:[%s6173_s24 + $0xc0] sm:$0xff]  ;;  %v356_v50 = vld [vmem:[%s6173_s24 + $0xd0] sm:$0xff] }
  0x1e   : > { %5889 = vmatpush3.bf16.msra.mxu1 %v6227_v23  ;;  %5456 = vmatprep.mubr.msk.f32.mxu0 %vm6116_vm0, %v6117_v1  ;;  %v355_v49 = vld [vmem:[%s6173_s24 + $0xc8] sm:$0xff]  ;;  %v357_v51 = vld [vmem:[%s6173_s24 + $0xd8] sm:$0xff]  ;;  %v6321_v52 = vld [vmem:[%s6182_s27 + $0x50] sm:$0xff] }
  0x1f   : > { %5463 = vmatprep.mubr.msk.f32.mxu1 %vm6116_vm0, %v6117_v1  ;;  %5890 = vmatprep.subr.bf16.mxu0 %v6861_v0  ;;  %v6323_v53 = vpack.c.bf16 %v355_v49, %v354_v48  ;;  %v6329_v54 = vld [vmem:[%s6182_s27 + $0x58] sm:$0xff]  ;;  %v6331_v55 = vpack.c.bf16 %v357_v51, %v356_v50  ;;  %v358_v56 = vld [vmem:[%s6173_s24 + $0xe0] sm:$0xff]  ;;  %v359_v57 = vld [vmem:[%s6173_s24 + $0xe8] sm:$0xff] }
  0x20   : > { %5457 = vmatmul.mubr.msk.f32.vlgmr.msra.gmra.mrb[4].mxu0 %vm394_vm1, %v6243_v28  ;;  %5893 = vmatprep.subr.bf16.mxu1 %v6861_v0  ;;  %v360_v58 = vld [vmem:[%s6173_s24 + $0xf0] sm:$0xff]  ;;  %v361_v59 = vld [vmem:[%s6173_s24 + $0xf8] sm:$0xff]  ;;  %v6354_v60 = vld [vmem:[%s6182_s27 + $0x60] sm:$0xff]  ;;  %v6356_v61 = vpack.c.bf16 %v359_v57, %v358_v56 }
  0x21   : > { %5464 = vmatmul.mubr.msk.f32.vlgmr.msra.gmra.mrb[4].mxu1 %vm394_vm1, %v6251_v30  ;;  %5892 = vmatpush3.bf16.msra.mxu0 %v6245_v29  ;;  %6867 = vst [vmem:[#allocation2_spill] sm:$0xff] %v6323_v53  ;;  %6868 = vst [vmem:[#allocation3_spill] sm:$0xff] %v6331_v55  ;;  %v6362_v62 = vld [vmem:[%s6182_s27 + $0x68] sm:$0xff]  ;;  %v6364_v63 = vpack.c.bf16 %v361_v59, %v360_v58  ;;  %v362_v2 = vld [vmem:[%s6340_s30] sm:$0xff] }
  0x22   : > { %5895 = vmatpush3.bf16.msra.mxu1 %v6253_v31  ;;  %5470 = vmatprep.mubr.msk.f32.mxu0 %vm6116_vm0, %v6117_v1  ;;  %6869 = vst [vmem:[#allocation4_spill] sm:$0xff] %v6356_v61  ;;  %v363_v3 = vld [vmem:[%s6340_s30 + $0x8] sm:$0xff]  ;;  %v364_v4 = vld [vmem:[%s6340_s30 + $0x10] sm:$0xff]  ;;  %v365_v6 = vld [vmem:[%s6340_s30 + $0x18] sm:$0xff] }
  0x23   : > { %5477 = vmatprep.mubr.msk.f32.mxu1 %vm6116_vm0, %v6117_v1  ;;  %5896 = vmatprep.subr.bf16.mxu0 %v6861_v0  ;;  %6870 = vst [vmem:[#allocation5_spill] sm:$0xff] %v6364_v63  ;;  %v6380_v8 = vld [vmem:[%s6182_s27 + $0x70] sm:$0xff]  ;;  %v6382_v9 = vpack.c.bf16 %v363_v3, %v362_v2  ;;  %v6388_v10 = vld [vmem:[%s6182_s27 + $0x78] sm:$0xff]  ;;  %v6390_v13 = vpack.c.bf16 %v365_v6, %v364_v4  ;;  %v366_v16 = vld [vmem:[%s6340_s30 + $0x20] sm:$0xff] }
  0x24   : > { %5471 = vmatmul.mubr.msk.f32.vlgmr.msra.gmra.mrb[6].mxu0 %vm394_vm1, %v6269_v36  ;;  %5899 = vmatprep.subr.bf16.mxu1 %v6861_v0  ;;  %v367_v17 = vld [vmem:[%s6340_s30 + $0x28] sm:$0xff]  ;;  %v368_v18 = vld [vmem:[%s6340_s30 + $0x30] sm:$0xff]  ;;  %v369_v19 = vld [vmem:[%s6340_s30 + $0x38] sm:$0xff] }
  0x25   : > { %5478 = vmatmul.mubr.msk.f32.vlgmr.msra.gmra.mrb[6].mxu1 %vm394_vm1, %v6277_v38  ;;  %5898 = vmatpush3.bf16.msra.mxu0 %v6271_v37  ;;  %v6412_v24 = vld [vmem:[%s6396_s8] sm:$0xff]  ;;  %v6414_v25 = vpack.c.bf16 %v367_v17, %v366_v16  ;;  %v6420_v26 = vld [vmem:[%s6396_s8 + $0x8] sm:$0xff]  ;;  %v6422_v27 = vpack.c.bf16 %v369_v19, %v368_v18  ;;  %v372_v34 = vld [vmem:[%s6340_s30 + $0x50] sm:$0xff] }
  0x26   : > { %5901 = vmatpush3.bf16.msra.mxu1 %v6279_v39  ;;  %5484 = vmatprep.mubr.msk.f32.mxu0 %vm6116_vm0, %v6117_v1  ;;  %v370_v32 = vld [vmem:[%s6340_s30 + $0x40] sm:$0xff]  ;;  %v371_v33 = vld [vmem:[%s6340_s30 + $0x48] sm:$0xff]  ;;  %v373_v35 = vld [vmem:[%s6340_s30 + $0x58] sm:$0xff] }
  0x27   : > { %5491 = vmatprep.mubr.msk.f32.mxu1 %vm6116_vm0, %v6117_v1  ;;  %5902 = vmatprep.subr.bf16.mxu0 %v6861_v0  ;;  %v6438_v40 = vld [vmem:[%s6396_s8 + $0x10] sm:$0xff]  ;;  %v6440_v41 = vpack.c.bf16 %v371_v33, %v370_v32  ;;  %v6446_v42 = vld [vmem:[%s6396_s8 + $0x18] sm:$0xff]  ;;  %v6448_v43 = vpack.c.bf16 %v373_v35, %v372_v34  ;;  %v374_v48 = vld [vmem:[%s6340_s30 + $0x60] sm:$0xff] }
  0x28   : > { %5485 = vmatmul.mubr.msk.f32.vlgmr.msra.gmra.mrb[8].mxu0 %vm394_vm1, %v6295_v44  ;;  %5905 = vmatprep.subr.bf16.mxu1 %v6861_v0  ;;  %v375_v49 = vld [vmem:[%s6340_s30 + $0x68] sm:$0xff]  ;;  %v376_v50 = vld [vmem:[%s6340_s30 + $0x70] sm:$0xff]  ;;  %v377_v51 = vld [vmem:[%s6340_s30 + $0x78] sm:$0xff] }
  0x29   : > { %5492 = vmatmul.mubr.msk.f32.vlgmr.msra.gmra.mrb[8].mxu1 %vm394_vm1, %v6303_v46  ;;  %5904 = vmatpush3.bf16.msra.mxu0 %v6297_v45  ;;  %v6464_v56 = vld [vmem:[%s6396_s8 + $0x20] sm:$0xff]  ;;  %v6466_v57 = vpack.c.bf16 %v375_v49, %v374_v48  ;;  %v6472_v58 = vld [vmem:[%s6396_s8 + $0x28] sm:$0xff]  ;;  %v6474_v59 = vpack.c.bf16 %v377_v51, %v376_v50  ;;  %v380_v4 = vld [vmem:[%s6340_s30 + $0x90] sm:$0xff] }
  0x2a   : > { %5907 = vmatpush3.bf16.msra.mxu1 %v6305_v47  ;;  %5498 = vmatprep.mubr.msk.f32.mxu0 %vm6116_vm0, %v6117_v1  ;;  %v378_v2 = vld [vmem:[%s6340_s30 + $0x80] sm:$0xff]  ;;  %v379_v3 = vld [vmem:[%s6340_s30 + $0x88] sm:$0xff]  ;;  %v381_v6 = vld [vmem:[%s6340_s30 + $0x98] sm:$0xff] }
  0x2b   : > { %5505 = vmatprep.mubr.msk.f32.mxu1 %vm6116_vm0, %v6117_v1  ;;  %5908 = vmatprep.subr.bf16.mxu0 %v6861_v0  ;;  %v6490_v16 = vld [vmem:[%s6396_s8 + $0x30] sm:$0xff]  ;;  %v6492_v17 = vpack.c.bf16 %v379_v3, %v378_v2  ;;  %v6498_v18 = vld [vmem:[%s6396_s8 + $0x38] sm:$0xff]  ;;  %v6500_v19 = vpack.c.bf16 %v381_v6, %v380_v4  ;;  %v382_v32 = vld [vmem:[%s6340_s30 + $0xa0] sm:$0xff] }
  0x2c   : > { %5499 = vmatmul.mubr.msk.f32.vlgmr.msra.gmra.mrb[10].mxu0 %vm394_vm1, %v6321_v52  ;;  %5911 = vmatprep.subr.bf16.mxu1 %v6861_v0  ;;  %v383_v33 = vld [vmem:[%s6340_s30 + $0xa8] sm:$0xff]  ;;  %v384_v34 = vld [vmem:[%s6340_s30 + $0xb0] sm:$0xff]  ;;  %v385_v35 = vld [vmem:[%s6340_s30 + $0xb8] sm:$0xff] }
  0x2d   : > { %5506 = vmatmul.mubr.msk.f32.vlgmr.msra.gmra.mrb[10].mxu1 %vm394_vm1, %v6329_v54  ;;  %5910 = vmatpush3.bf16.msra.mxu0 %v6323_v53  ;;  %v6516_v48 = vld [vmem:[%s6396_s8 + $0x40] sm:$0xff]  ;;  %v6518_v49 = vpack.c.bf16 %v383_v33, %v382_v32  ;;  %v6524_v50 = vld [vmem:[%s6396_s8 + $0x48] sm:$0xff]  ;;  %v6526_v51 = vpack.c.bf16 %v385_v35, %v384_v34  ;;  %v388_v4 = vld [vmem:[%s6340_s30 + $0xd0] sm:$0xff] }
  0x2e   : > { %5913 = vmatpush3.bf16.msra.mxu1 %v6331_v55  ;;  %5512 = vmatprep.mubr.msk.f32.mxu0 %vm6116_vm0, %v6117_v1  ;;  %v386_v2 = vld [vmem:[%s6340_s30 + $0xc0] sm:$0xff]  ;;  %v387_v3 = vld [vmem:[%s6340_s30 + $0xc8] sm:$0xff]  ;;  %v389_v6 = vld [vmem:[%s6340_s30 + $0xd8] sm:$0xff] }
  0x2f   : > { %5519 = vmatprep.mubr.msk.f32.mxu1 %vm6116_vm0, %v6117_v1  ;;  %5914 = vmatprep.subr.bf16.mxu0 %v6861_v0  ;;  %v6542_v32 = vld [vmem:[%s6396_s8 + $0x50] sm:$0xff]  ;;  %v6544_v33 = vpack.c.bf16 %v387_v3, %v386_v2  ;;  %v6550_v34 = vld [vmem:[%s6396_s8 + $0x58] sm:$0xff]  ;;  %v6552_v35 = vpack.c.bf16 %v389_v6, %v388_v4  ;;  %v6568_v3 = vld [vmem:[%s6396_s8 + $0x60] sm:$0xff] }
  0x30   : > { %5513 = vmatmul.mubr.msk.f32.vlgmr.msra.gmra.mrb[12].mxu0 %vm394_vm1, %v6354_v60  ;;  %5917 = vmatprep.subr.bf16.mxu1 %v6861_v0  ;;  %v392_v55 = vld [vmem:[%s6340_s30 + $0xf0] sm:$0xff]  ;;  %v393_v2 = vld [vmem:[%s6340_s30 + $0xf8] sm:$0xff]  ;;  %v6576_v6 = vld [vmem:[%s6396_s8 + $0x68] sm:$0xff] }
  0x31   : > { %5520 = vmatmul.mubr.msk.f32.vlgmr.msra.gmra.mrb[12].mxu1 %vm394_vm1, %v6362_v62  ;;  %5916 = vmatpush3.bf16.msra.mxu0 %v6356_v61  ;;  %v6871_v61 = vmov 0.0|0.0   ;;  %v6578_v53 = vpack.c.bf16 %v393_v2, %v392_v55  ;;  %v6596_v55 = vld [vmem:[%s6396_s8 + $0x78] sm:$0xff] }
  0x32   : > { %5919 = vmatpush3.bf16.msra.mxu1 %v6364_v63  ;;  %5526 = vmatprep.mubr.msk.f32.mxu0 %vm6116_vm0, %v6117_v1  ;;  %v391_v63 = vld [vmem:[%s6340_s30 + $0xe8] sm:$0xff] }
  0x33   : > { %5533 = vmatprep.mubr.msk.f32.mxu1 %vm6116_vm0, %v6117_v1  ;;  %5920 = vmatprep.subr.bf16.mxu0 %v6861_v0 }
  0x34   : > { %5527 = vmatmul.mubr.msk.f32.vlgmr.msra.gmra.mrb[14].mxu0 %vm394_vm1, %v6380_v8  ;;  %5923 = vmatprep.subr.bf16.mxu1 %v6861_v0 }
  0x35   : > { %5534 = vmatmul.mubr.msk.f32.vlgmr.msra.gmra.mrb[14].mxu1 %vm394_vm1, %v6388_v10  ;;  %5922 = vmatpush3.bf16.msra.mxu0 %v6382_v9 }
  0x36   : > { %5925 = vmatpush3.bf16.msra.mxu1 %v6390_v13  ;;  %5540 = vmatprep.mubr.msk.f32.mxu0 %vm6116_vm0, %v6117_v1 }
  0x37   : > { %5547 = vmatprep.mubr.msk.f32.mxu1 %vm6116_vm0, %v6117_v1  ;;  %5926 = vmatprep.subr.bf16.mxu0 %v6861_v0 }
  0x38   : > { %5541 = vmatmul.mubr.msk.f32.vlgmr.msra.gmra.mrb[16].mxu0 %vm394_vm1, %v6412_v24  ;;  %5929 = vmatprep.subr.bf16.mxu1 %v6861_v0 }
  0x39   : > { %5548 = vmatmul.mubr.msk.f32.vlgmr.msra.gmra.mrb[16].mxu1 %vm394_vm1, %v6420_v26  ;;  %5928 = vmatpush3.bf16.msra.mxu0 %v6414_v25 }
  0x3a   : > { %5931 = vmatpush3.bf16.msra.mxu1 %v6422_v27  ;;  %5554 = vmatprep.mubr.msk.f32.mxu0 %vm6116_vm0, %v6117_v1 }
  0x3b   : > { %5561 = vmatprep.mubr.msk.f32.mxu1 %vm6116_vm0, %v6117_v1  ;;  %5932 = vmatprep.subr.bf16.mxu0 %v6861_v0 }
  0x3c   : > { %5555 = vmatmul.mubr.msk.f32.vlgmr.msra.gmra.mrb[18].mxu0 %vm394_vm1, %v6438_v40  ;;  %5935 = vmatprep.subr.bf16.mxu1 %v6861_v0 }
  0x3d   : > { %5562 = vmatmul.mubr.msk.f32.vlgmr.msra.gmra.mrb[18].mxu1 %vm394_vm1, %v6446_v42  ;;  %5934 = vmatpush3.bf16.msra.mxu0 %v6440_v41 }
  0x3e   : > { %5937 = vmatpush3.bf16.msra.mxu1 %v6448_v43  ;;  %5568 = vmatprep.mubr.msk.f32.mxu0 %vm6116_vm0, %v6117_v1 }
  0x3f   : > { %5575 = vmatprep.mubr.msk.f32.mxu1 %vm6116_vm0, %v6117_v1  ;;  %5938 = vmatprep.subr.bf16.mxu0 %v6861_v0 }
  0x40   : > { %5569 = vmatmul.mubr.msk.f32.vlgmr.msra.gmra.mrb[20].mxu0 %vm394_vm1, %v6464_v56  ;;  %5941 = vmatprep.subr.bf16.mxu1 %v6861_v0 }
  0x41   : > { %5576 = vmatmul.mubr.msk.f32.vlgmr.msra.gmra.mrb[20].mxu1 %vm394_vm1, %v6472_v58  ;;  %5940 = vmatpush3.bf16.msra.mxu0 %v6466_v57 }
  0x42   : > { %5943 = vmatpush3.bf16.msra.mxu1 %v6474_v59  ;;  %5582 = vmatprep.mubr.msk.f32.mxu0 %vm6116_vm0, %v6117_v1 }
  0x43   : > { %5589 = vmatprep.mubr.msk.f32.mxu1 %vm6116_vm0, %v6117_v1  ;;  %5944 = vmatprep.subr.bf16.mxu0 %v6861_v0 }
  0x44   : > { %5583 = vmatmul.mubr.msk.f32.vlgmr.msra.gmra.mrb[22].mxu0 %vm394_vm1, %v6490_v16  ;;  %5947 = vmatprep.subr.bf16.mxu1 %v6861_v0 }
  0x45   : > { %5590 = vmatmul.mubr.msk.f32.vlgmr.msra.gmra.mrb[22].mxu1 %vm394_vm1, %v6498_v18  ;;  %5946 = vmatpush3.bf16.msra.mxu0 %v6492_v17 }
  0x46   : > { %5949 = vmatpush3.bf16.msra.mxu1 %v6500_v19  ;;  %5596 = vmatprep.mubr.msk.f32.mxu0 %vm6116_vm0, %v6117_v1 }
  0x47   : > { %5603 = vmatprep.mubr.msk.f32.mxu1 %vm6116_vm0, %v6117_v1  ;;  %5950 = vmatprep.subr.bf16.mxu0 %v6861_v0 }
  0x48   : > { %5597 = vmatmul.mubr.msk.f32.vlgmr.msra.gmra.mrb[24].mxu0 %vm394_vm1, %v6516_v48  ;;  %5953 = vmatprep.subr.bf16.mxu1 %v6861_v0  ;;  %v390_v0 = vld [vmem:[%s6340_s30 + $0xe0] sm:$0xff] }
  0x49   : > { %5604 = vmatmul.mubr.msk.f32.vlgmr.msra.gmra.mrb[24].mxu1 %vm394_vm1, %v6524_v50  ;;  %5952 = vmatpush3.bf16.msra.mxu0 %v6518_v49  ;;  %v6570_v4 = vpack.c.bf16 %v391_v63, %v390_v0  ;;  %v6590_v0 = vld [vmem:[%s6396_s8 + $0x70] sm:$0xff] }
  0x4a   : > { %5955 = vmatpush3.bf16.msra.mxu1 %v6526_v51  ;;  %5610 = vmatprep.mubr.msk.f32.mxu0 %vm6116_vm0, %v6117_v1 }
  0x4b   : > { %5617 = vmatprep.mubr.msk.f32.mxu1 %vm6116_vm0, %v6117_v1  ;;  %5956 = vmatprep.subr.bf16.mxu0 %v6871_v61 }
  0x4c   : > { %5611 = vmatmul.mubr.msk.f32.vlgmr.msra.gmra.mrb[26].mxu0 %vm394_vm1, %v6542_v32  ;;  %5959 = vmatprep.subr.bf16.mxu1 %v6871_v61 }
  0x4d   : > { %5618 = vmatmul.mubr.msk.f32.vlgmr.msra.gmra.mrb[26].mxu1 %vm394_vm1, %v6550_v34  ;;  %5958 = vmatpush3.bf16.msra.mxu0 %v6544_v33 }
  0x4e   : > { %5961 = vmatpush3.bf16.msra.mxu1 %v6552_v35  ;;  %5624 = vmatprep.mubr.msk.f32.mxu0 %vm6116_vm0, %v6117_v1 }
  0x4f   : > { %5631 = vmatprep.mubr.msk.f32.mxu1 %vm6116_vm0, %v6117_v1  ;;  %5962 = vmatprep.subr.bf16.mxu0 %v6871_v61 }
  0x50   : > { %5625 = vmatmul.mubr.msk.f32.vlgmr.msra.gmra.mrb[28].mxu0 %vm394_vm1, %v6568_v3  ;;  %5965 = vmatprep.subr.bf16.mxu1 %v6871_v61 }
  0x51   : > { %5632 = vmatmul.mubr.msk.f32.vlgmr.msra.gmra.mrb[28].mxu1 %vm394_vm1, %v6576_v6  ;;  %5964 = vmatpush3.bf16.msra.mxu0 %v6570_v4 }
  0x52   : > { %5967 = vmatpush3.bf16.msra.mxu1 %v6578_v53  ;;  %5638 = vmatprep.mubr.msk.f32.mxu0 %vm6116_vm0, %v6117_v1 }
  0x53   : > { %5645 = vmatprep.mubr.msk.f32.mxu1 %vm6116_vm0, %v6117_v1  ;;  %5968 = vmatprep.subr.bf16.mxu0 %v6871_v61 }
  0x54   : > { %5639 = vmatmul.mubr.msk.f32.vlgmr.msra.gmra.mrb[30].mxu0 %vm394_vm1, %v6590_v0  ;;  %5971 = vmatprep.subr.bf16.mxu1 %v6871_v61 }
  0x55   : > { %5646 = vmatmul.mubr.msk.f32.vlgmr.msra.gmra.mrb[30].mxu1 %vm394_vm1, %v6596_v55  ;;  %5970 = vmatpush3.bf16.msra.mxu0 %v6382_v9 }
  0x56   : > { %5973 = vmatpush3.bf16.msra.mxu1 %v6390_v13  ;;  %5652 = vmatprep.mubr.msk.f32.mxu0 %vm6116_vm0, %v6117_v1 }
  0x57   : > { %5659 = vmatprep.mubr.msk.f32.mxu1 %vm6116_vm0, %v6117_v1  ;;  %5974 = vmatprep.subr.bf16.mxu0 %v6871_v61 }
  0x58   : > { %5653 = vmatmul.mubr.msk.f32.vlgmr.msra.gmra.mrb[32].mxu0 %vm394_vm1, %v6194_v11  ;;  %5977 = vmatprep.subr.bf16.mxu1 %v6871_v61  ;;  %v6874_v11 = vld [vmem:[#allocation4_spill] sm:$0xff] }
  0x59   : > { %5660 = vmatmul.mubr.msk.f32.vlgmr.msra.gmra.mrb[32].mxu1 %vm394_vm1, %v6201_v14  ;;  %5976 = vmatpush3.bf16.msra.mxu0 %v6414_v25 }
  0x5a   : > { %5979 = vmatpush3.bf16.msra.mxu1 %v6422_v27  ;;  %5666 = vmatprep.mubr.msk.f32.mxu0 %vm6116_vm0, %v6117_v1 }
  0x5b   : > { %5673 = vmatprep.mubr.msk.f32.mxu1 %vm6116_vm0, %v6117_v1  ;;  %5980 = vmatprep.subr.bf16.mxu0 %v6871_v61 }
  0x5c   : > { %5667 = vmatmul.mubr.msk.f32.vlgmr.msra.gmra.mrb[34].mxu0 %vm394_vm1, %v6217_v20  ;;  %5983 = vmatprep.subr.bf16.mxu1 %v6871_v61 }
  0x5d   : > { %5674 = vmatmul.mubr.msk.f32.vlgmr.msra.gmra.mrb[34].mxu1 %vm394_vm1, %v6225_v22  ;;  %5982 = vmatpush3.bf16.msra.mxu0 %v6440_v41 }
  0x5e   : > { %5985 = vmatpush3.bf16.msra.mxu1 %v6448_v43  ;;  %5680 = vmatprep.mubr.msk.f32.mxu0 %vm6116_vm0, %v6117_v1 }
  0x5f   : > { %5687 = vmatprep.mubr.msk.f32.mxu1 %vm6116_vm0, %v6117_v1  ;;  %5986 = vmatprep.subr.bf16.mxu0 %v6871_v61 }
  0x60   : > { %5681 = vmatmul.mubr.msk.f32.vlgmr.msra.gmra.mrb[36].mxu0 %vm394_vm1, %v6243_v28  ;;  %5989 = vmatprep.subr.bf16.mxu1 %v6871_v61 }
  0x61   : > { %5688 = vmatmul.mubr.msk.f32.vlgmr.msra.gmra.mrb[36].mxu1 %vm394_vm1, %v6251_v30  ;;  %5988 = vmatpush3.bf16.msra.mxu0 %v6466_v57 }
  0x62   : > { %5991 = vmatpush3.bf16.msra.mxu1 %v6474_v59  ;;  %5694 = vmatprep.mubr.msk.f32.mxu0 %vm6116_vm0, %v6117_v1 }
  0x63   : > { %5701 = vmatprep.mubr.msk.f32.mxu1 %vm6116_vm0, %v6117_v1  ;;  %5992 = vmatprep.subr.bf16.mxu0 %v6871_v61 }
  0x64   : > { %5695 = vmatmul.mubr.msk.f32.vlgmr.msra.gmra.mrb[38].mxu0 %vm394_vm1, %v6269_v36  ;;  %5995 = vmatprep.subr.bf16.mxu1 %v6871_v61 }
  0x65   : > { %5702 = vmatmul.mubr.msk.f32.vlgmr.msra.gmra.mrb[38].mxu1 %vm394_vm1, %v6277_v38  ;;  %5994 = vmatpush3.bf16.msra.mxu0 %v6492_v17 }
  0x66   : > { %5997 = vmatpush3.bf16.msra.mxu1 %v6500_v19  ;;  %5708 = vmatprep.mubr.msk.f32.mxu0 %vm6116_vm0, %v6117_v1 }
  0x67   : > { %5715 = vmatprep.mubr.msk.f32.mxu1 %vm6116_vm0, %v6117_v1  ;;  %5998 = vmatprep.subr.bf16.mxu0 %v6871_v61 }
  0x68   : > { %5709 = vmatmul.mubr.msk.f32.vlgmr.msra.gmra.mrb[40].mxu0 %vm394_vm1, %v6295_v44  ;;  %6001 = vmatprep.subr.bf16.mxu1 %v6871_v61 }
  0x69   : > { %5716 = vmatmul.mubr.msk.f32.vlgmr.msra.gmra.mrb[40].mxu1 %vm394_vm1, %v6303_v46  ;;  %6000 = vmatpush3.bf16.msra.mxu0 %v6518_v49 }
  0x6a   : > { %6003 = vmatpush3.bf16.msra.mxu1 %v6526_v51  ;;  %5722 = vmatprep.mubr.msk.f32.mxu0 %vm6116_vm0, %v6117_v1 }
  0x6b   : > { %5729 = vmatprep.mubr.msk.f32.mxu1 %vm6116_vm0, %v6117_v1  ;;  %6004 = vmatprep.subr.bf16.mxu0 %v6871_v61 }
  0x6c   : > { %5723 = vmatmul.mubr.msk.f32.vlgmr.msra.gmra.mrb[42].mxu0 %vm394_vm1, %v6321_v52  ;;  %6007 = vmatprep.subr.bf16.mxu1 %v6871_v61 }
  0x6d   : > { %5730 = vmatmul.mubr.msk.f32.vlgmr.msra.gmra.mrb[42].mxu1 %vm394_vm1, %v6329_v54  ;;  %6006 = vmatpush3.bf16.msra.mxu0 %v6544_v33 }
  0x6e   : > { %6009 = vmatpush3.bf16.msra.mxu1 %v6552_v35  ;;  %5736 = vmatprep.mubr.msk.f32.mxu0 %vm6116_vm0, %v6117_v1 }
  0x6f   : > { %5743 = vmatprep.mubr.msk.f32.mxu1 %vm6116_vm0, %v6117_v1  ;;  %6010 = vmatprep.subr.bf16.mxu0 %v6871_v61 }
  0x70   : > { %5737 = vmatmul.mubr.msk.f32.vlgmr.msra.gmra.mrb[44].mxu0 %vm394_vm1, %v6354_v60  ;;  %6013 = vmatprep.subr.bf16.mxu1 %v6871_v61 }
  0x71   : > { %5744 = vmatmul.mubr.msk.f32.vlgmr.msra.gmra.mrb[44].mxu1 %vm394_vm1, %v6362_v62  ;;  %6012 = vmatpush3.bf16.msra.mxu0 %v6570_v4 }
  0x72   : > { %6015 = vmatpush3.bf16.msra.mxu1 %v6578_v53  ;;  %5750 = vmatprep.mubr.msk.f32.mxu0 %vm6116_vm0, %v6117_v1 }
  0x73   : > { %5757 = vmatprep.mubr.msk.f32.mxu1 %vm6116_vm0, %v6117_v1  ;;  %6016 = vmatprep.subr.bf16.mxu0 %v6871_v61 }
  0x74   : > { %5751 = vmatmul.mubr.msk.f32.vlgmr.msra.gmra.mrb[46].mxu0 %vm394_vm1, %v6380_v8  ;;  %6019 = vmatprep.subr.bf16.mxu1 %v6871_v61 }
  0x75   : > { %5758 = vmatmul.mubr.msk.f32.vlgmr.msra.gmra.mrb[46].mxu1 %vm394_vm1, %v6388_v10  ;;  %6018 = vmatpush3.bf16.msra.mxu0 %v6184_v5  ;;  %v6872_v5 = vld [vmem:[#allocation2_spill] sm:$0xff] }
  0x76   : > { %6021 = vmatpush3.bf16.msra.mxu1 %v6187_v7  ;;  %5764 = vmatprep.mubr.msk.f32.mxu0 %vm6116_vm0, %v6117_v1  ;;  %v6873_v7 = vld [vmem:[#allocation3_spill] sm:$0xff] }
  0x77   : > { %5771 = vmatprep.mubr.msk.f32.mxu1 %vm6116_vm0, %v6117_v1  ;;  %6022 = vmatprep.subr.bf16.mxu0 %v6871_v61 }
  0x78   : > { %5765 = vmatmul.mubr.msk.f32.vlgmr.msra.gmra.mrb[32].mxu0 %vm394_vm1, %v6412_v24  ;;  %6025 = vmatprep.subr.bf16.mxu1 %v6871_v61 }
  0x79   : > { %5772 = vmatmul.mubr.msk.f32.vlgmr.msra.gmra.mrb[32].mxu1 %vm394_vm1, %v6420_v26  ;;  %6024 = vmatpush3.bf16.msra.mxu0 %v6196_v12  ;;  %v6875_v12 = vld [vmem:[#allocation5_spill] sm:$0xff] }
  0x7a   : > { %6027 = vmatpush3.bf16.msra.mxu1 %v6204_v15  ;;  %5778 = vmatprep.mubr.msk.f32.mxu0 %vm6116_vm0, %v6117_v1 }
  0x7b   : > { %5785 = vmatprep.mubr.msk.f32.mxu1 %vm6116_vm0, %v6117_v1  ;;  %6028 = vmatprep.subr.bf16.mxu0 %v6871_v61 }
  0x7c   : > { %5779 = vmatmul.mubr.msk.f32.vlgmr.msra.gmra.mrb[34].mxu0 %vm394_vm1, %v6438_v40  ;;  %6031 = vmatprep.subr.bf16.mxu1 %v6871_v61 }
  0x7d   : > { %5786 = vmatmul.mubr.msk.f32.vlgmr.msra.gmra.mrb[34].mxu1 %vm394_vm1, %v6446_v42  ;;  %6030 = vmatpush3.bf16.msra.mxu0 %v6219_v21 }
  0x7e   : > { %6033 = vmatpush3.bf16.msra.mxu1 %v6227_v23  ;;  %5792 = vmatprep.mubr.msk.f32.mxu0 %vm6116_vm0, %v6117_v1 }
  0x7f   : > { %5799 = vmatprep.mubr.msk.f32.mxu1 %vm6116_vm0, %v6117_v1  ;;  %6034 = vmatprep.subr.bf16.mxu0 %v6871_v61 }
  0x80   : > { %5793 = vmatmul.mubr.msk.f32.vlgmr.msra.gmra.mrb[36].mxu0 %vm394_vm1, %v6464_v56  ;;  %6037 = vmatprep.subr.bf16.mxu1 %v6871_v61 }
  0x81   : > { %5800 = vmatmul.mubr.msk.f32.vlgmr.msra.gmra.mrb[36].mxu1 %vm394_vm1, %v6472_v58  ;;  %6036 = vmatpush3.bf16.msra.mxu0 %v6245_v29 }
  0x82   : > { %6039 = vmatpush3.bf16.msra.mxu1 %v6253_v31  ;;  %5806 = vmatprep.mubr.msk.f32.mxu0 %vm6116_vm0, %v6117_v1 }
  0x83   : > { %5813 = vmatprep.mubr.msk.f32.mxu1 %vm6116_vm0, %v6117_v1  ;;  %6040 = vmatprep.subr.bf16.mxu0 %v6871_v61 }
  0x84   : > { %5807 = vmatmul.mubr.msk.f32.vlgmr.msra.gmra.mrb[38].mxu0 %vm394_vm1, %v6490_v16  ;;  %6043 = vmatprep.subr.bf16.mxu1 %v6871_v61 }
  0x85   : > { %5814 = vmatmul.mubr.msk.f32.vlgmr.msra.gmra.mrb[38].mxu1 %vm394_vm1, %v6498_v18  ;;  %6042 = vmatpush3.bf16.msra.mxu0 %v6271_v37 }
  0x86   : > { %6045 = vmatpush3.bf16.msra.mxu1 %v6279_v39  ;;  %5820 = vmatprep.mubr.msk.f32.mxu0 %vm6116_vm0, %v6117_v1 }
  0x87   : > { %5827 = vmatprep.mubr.msk.f32.mxu1 %vm6116_vm0, %v6117_v1  ;;  %6046 = vmatprep.subr.bf16.mxu0 %v6871_v61 }
  0x88   : > { %5821 = vmatmul.mubr.msk.f32.vlgmr.msra.gmra.mrb[40].mxu0 %vm394_vm1, %v6516_v48  ;;  %6049 = vmatprep.subr.bf16.mxu1 %v6871_v61 }
  0x89   : > { %5828 = vmatmul.mubr.msk.f32.vlgmr.msra.gmra.mrb[40].mxu1 %vm394_vm1, %v6524_v50  ;;  %6048 = vmatpush3.bf16.msra.mxu0 %v6297_v45 }
  0x8a   : > { %6051 = vmatpush3.bf16.msra.mxu1 %v6305_v47  ;;  %5834 = vmatprep.mubr.msk.f32.mxu0 %vm6116_vm0, %v6117_v1 }
  0x8b   : > { %5841 = vmatprep.mubr.msk.f32.mxu1 %vm6116_vm0, %v6117_v1  ;;  %6052 = vmatprep.subr.bf16.mxu0 %v6871_v61 }
  0x8c   : > { %5835 = vmatmul.mubr.msk.f32.vlgmr.msra.gmra.mrb[42].mxu0 %vm394_vm1, %v6542_v32  ;;  %6055 = vmatprep.subr.bf16.mxu1 %v6871_v61 }
  0x8d   : > { %5842 = vmatmul.mubr.msk.f32.vlgmr.msra.gmra.mrb[42].mxu1 %vm394_vm1, %v6550_v34  ;;  %6054 = vmatpush3.bf16.msra.mxu0 %v6872_v5 }
  0x8e   : > { %6057 = vmatpush3.bf16.msra.mxu1 %v6873_v7  ;;  %5848 = vmatprep.mubr.msk.f32.mxu0 %vm6116_vm0, %v6117_v1 }
  0x8f   : > { %5855 = vmatprep.mubr.msk.f32.mxu1 %vm6116_vm0, %v6117_v1  ;;  %6058 = vmatprep.subr.bf16.mxu0 %v6871_v61 }
  0x90   : > { %5849 = vmatmul.mubr.msk.f32.vlgmr.msra.gmra.mrb[44].mxu0 %vm394_vm1, %v6568_v3  ;;  %6061 = vmatprep.subr.bf16.mxu1 %v6871_v61 }
  0x91   : > { %5856 = vmatmul.mubr.msk.f32.vlgmr.msra.gmra.mrb[44].mxu1 %vm394_vm1, %v6576_v6  ;;  %6060 = vmatpush3.bf16.msra.mxu0 %v6874_v11 }
  0x92   : > { %6063 = vmatpush3.bf16.msra.mxu1 %v6875_v12  ;;  %5862 = vmatprep.mubr.msk.f32.mxu0 %vm6116_vm0, %v6117_v1 }
  0x93   : > { %5869 = vmatprep.mubr.msk.f32.mxu1 %vm6116_vm0, %v6117_v1 }
  0x94   : > { %5863 = vmatmul.mubr.msk.f32.vlgmr.msra.gmra.mrb[46].mxu0 %vm394_vm1, %v6590_v0 }
  0x95   : > { %5870 = vmatmul.mubr.msk.f32.vlgmr.msra.gmra.mrb[46].mxu1 %vm394_vm1, %v6596_v55 }
  0xeb   : > { %v464_v14 = vpop.f32.mrb[0].mxu0 }
  0xec   : > { %v537_v15 = vpop.f32.mrb[0].mxu1  ;;  %v5430_v20 = vpop.f32.mrb[1].mxu0 }
  0xed   : > { %v5437_v21 = vpop.f32.mrb[1].mxu1 }
  0xef   : > { %v610_v22 = vpop.f32.mrb[2].mxu0 }
  0xf0   : > { %v683_v23 = vpop.f32.mrb[2].mxu1  ;;  %v5444_v28 = vpop.f32.mrb[3].mxu0 }
  0xf1   : > { %v5451_v29 = vpop.f32.mrb[3].mxu1 }
  0xf3   : > { %v756_v30 = vpop.f32.mrb[4].mxu0 }
  0xf4   : > { %v829_v31 = vpop.f32.mrb[4].mxu1  ;;  %v5458_v36 = vpop.f32.mrb[5].mxu0 }
  0xf5   : > { %v5465_v37 = vpop.f32.mrb[5].mxu1 }
  0xf7   : > { %v902_v38 = vpop.f32.mrb[6].mxu0 }
  0xf8   : > { %v975_v1 = vpop.f32.mrb[6].mxu1  ;;  %v5472_v39 = vpop.f32.mrb[7].mxu0 }
  0xf9   : > { %v5479_v44 = vpop.f32.mrb[7].mxu1 }
  0xfb   : > { %v1048_v45 = vpop.f32.mrb[8].mxu0 }
  0xfc   : > { %v1121_v46 = vpop.f32.mrb[8].mxu1  ;;  %v5486_v47 = vpop.f32.mrb[9].mxu0 }
  0xfd   : > { %v5493_v52 = vpop.f32.mrb[9].mxu1 }
  0xff   : > { %v1194_v53 = vpop.f32.mrb[10].mxu0 }
 0x100   : > { %v1267_v54 = vpop.f32.mrb[10].mxu1  ;;  %v5500_v60 = vpop.f32.mrb[11].mxu0 }
 0x101   : > { %v5507_v61 = vpop.f32.mrb[11].mxu1 }
 0x103   : > { %v6796_v62 = vpop.f32.mrb[12].mxu0 }
 0x104   : > { %v6798_v63 = vpop.f32.mrb[12].mxu1  ;;  %v5514_v8 = vpop.f32.mrb[13].mxu0 }
 0x105   : > { %v5521_v9 = vpop.f32.mrb[13].mxu1 }
 0x107   : > { %v6800_v10 = vpop.f32.mrb[14].mxu0 }
 0x108   : > { %v6802_v13 = vpop.f32.mrb[14].mxu1  ;;  %v5528_v24 = vpop.f32.mrb[15].mxu0 }
 0x109   : > { %v5535_v25 = vpop.f32.mrb[15].mxu1 }
 0x10b   : > { %v1632_v26 = vpop.f32.mrb[16].mxu0 }
 0x10c   : > { %v2731_v27 = vsub.f32 %v464_v14, %v1632_v26  ;;  %v1705_v40 = vpop.f32.mrb[16].mxu1  ;;  %v5542_v41 = vpop.f32.mrb[17].mxu0 }
 0x10d   : > { %v2732_v42 = vsub.f32 %v537_v15, %v1705_v40  ;;  %v5549_v43 = vpop.f32.mrb[17].mxu1 }
 0x10e   : > { %2747 = vst [vmem:[%s6808_s11] sm:$0xff] %v2731_v27 }
 0x10f   : > { %2748 = vst [vmem:[%s6808_s11 + $0x8] sm:$0xff] %v2732_v42  ;;  %v1778_v56 = vpop.f32.mrb[18].mxu0 }
 0x110   : > { %v2733_v57 = vsub.f32 %v610_v22, %v1778_v56  ;;  %v1851_v58 = vpop.f32.mrb[18].mxu1  ;;  %v5556_v59 = vpop.f32.mrb[19].mxu0 }
 0x111   : > { %v2734_v16 = vsub.f32 %v683_v23, %v1851_v58  ;;  %v5563_v17 = vpop.f32.mrb[19].mxu1 }
 0x112   : > { %2749 = vst [vmem:[%s6808_s11 + $0x10] sm:$0xff] %v2733_v57 }
 0x113   : > { %2750 = vst [vmem:[%s6808_s11 + $0x18] sm:$0xff] %v2734_v16  ;;  %v1924_v18 = vpop.f32.mrb[20].mxu0 }
 0x114   : > { %v2735_v19 = vsub.f32 %v756_v30, %v1924_v18  ;;  %v1997_v48 = vpop.f32.mrb[20].mxu1  ;;  %v5570_v49 = vpop.f32.mrb[21].mxu0 }
 0x115   : > { %v2736_v50 = vsub.f32 %v829_v31, %v1997_v48  ;;  %v5577_v51 = vpop.f32.mrb[21].mxu1 }
 0x116   : > { %2751 = vst [vmem:[%s6808_s11 + $0x20] sm:$0xff] %v2735_v19 }
 0x117   : > { %2752 = vst [vmem:[%s6808_s11 + $0x28] sm:$0xff] %v2736_v50  ;;  %v2070_v32 = vpop.f32.mrb[22].mxu0 }
 0x118   : > { %v2737_v33 = vsub.f32 %v902_v38, %v2070_v32  ;;  %v2143_v34 = vpop.f32.mrb[22].mxu1  ;;  %v5584_v35 = vpop.f32.mrb[23].mxu0 }
 0x119   : > { %v2738_v2 = vsub.f32 %v975_v1, %v2143_v34  ;;  %v5591_v3 = vpop.f32.mrb[23].mxu1 }
 0x11a   : > { %2753 = vst [vmem:[%s6808_s11 + $0x30] sm:$0xff] %v2737_v33 }
 0x11b   : > { %2754 = vst [vmem:[%s6808_s11 + $0x38] sm:$0xff] %v2738_v2  ;;  %v2216_v4 = vpop.f32.mrb[24].mxu0 }
 0x11c   : > { %v2739_v6 = vsub.f32 %v1048_v45, %v2216_v4  ;;  %v2289_v0 = vpop.f32.mrb[24].mxu1  ;;  %v5598_v55 = vpop.f32.mrb[25].mxu0 }
 0x11d   : > { %v2740_v5 = vsub.f32 %v1121_v46, %v2289_v0  ;;  %v5605_v7 = vpop.f32.mrb[25].mxu1 }
 0x11e   : > { %2755 = vst [vmem:[%s6808_s11 + $0x40] sm:$0xff] %v2739_v6 }
 0x11f   : > { %2756 = vst [vmem:[%s6808_s11 + $0x48] sm:$0xff] %v2740_v5  ;;  %v2362_v11 = vpop.f32.mrb[26].mxu0 }
 0x120   : > { %v2741_v12 = vsub.f32 %v1194_v53, %v2362_v11  ;;  %v2435_v14 = vpop.f32.mrb[26].mxu1  ;;  %v5612_v15 = vpop.f32.mrb[27].mxu0 }
 0x121   : > { %v2742_v20 = vsub.f32 %v1267_v54, %v2435_v14  ;;  %v5619_v21 = vpop.f32.mrb[27].mxu1 }
 0x122   : > { %2757 = vst [vmem:[%s6808_s11 + $0x50] sm:$0xff] %v2741_v12 }
 0x123   : > { %2758 = vst [vmem:[%s6808_s11 + $0x58] sm:$0xff] %v2742_v20  ;;  %v2508_v22 = vpop.f32.mrb[28].mxu0 }
 0x124   : > { %v2743_v23 = vsub.f32 %v6796_v62, %v2508_v22  ;;  %v2581_v28 = vpop.f32.mrb[28].mxu1  ;;  %v5626_v29 = vpop.f32.mrb[29].mxu0 }
 0x125   : > { %v2744_v30 = vsub.f32 %v6798_v63, %v2581_v28  ;;  %v5633_v31 = vpop.f32.mrb[29].mxu1 }
 0x126   : > { %2759 = vst [vmem:[%s6808_s11 + $0x60] sm:$0xff] %v2743_v23 }
 0x127   : > { %2760 = vst [vmem:[%s6808_s11 + $0x68] sm:$0xff] %v2744_v30  ;;  %v2654_v36 = vpop.f32.mrb[30].mxu0 }
 0x128   : > { %v2745_v37 = vsub.f32 %v6800_v10, %v2654_v36  ;;  %v2727_v38 = vpop.f32.mrb[30].mxu1  ;;  %v5640_v1 = vpop.f32.mrb[31].mxu0 }
 0x129   : > { %v2746_v39 = vsub.f32 %v6802_v13, %v2727_v38  ;;  %v5647_v44 = vpop.f32.mrb[31].mxu1 }
 0x12a   : > { %2761 = vst [vmem:[%s6808_s11 + $0x70] sm:$0xff] %v2745_v37 }
 0x12b   : > { %2762 = vst [vmem:[%s6808_s11 + $0x78] sm:$0xff] %v2746_v39 }
 0x14b   : > { %v3949_v45 = vpop.f32.mrb[32].mxu0 }
 0x14c   : > { %5003 = vst [vmem:[%s6834_s14] sm:$0xff] %v3949_v45  ;;  %v4019_v46 = vpop.f32.mrb[32].mxu1  ;;  %v5766_v47 = vpop.f32.mrb[33].mxu0 }
 0x14d   : > { %5004 = vst [vmem:[%s6834_s14 + $0x8] sm:$0xff] %v4019_v46  ;;  %v5773_v52 = vpop.f32.mrb[33].mxu1 }
 0x14f   : > { %v4089_v53 = vpop.f32.mrb[34].mxu0 }
 0x150   : > { %5005 = vst [vmem:[%s6834_s14 + $0x10] sm:$0xff] %v4089_v53  ;;  %v4159_v54 = vpop.f32.mrb[34].mxu1  ;;  %v5780_v60 = vpop.f32.mrb[35].mxu0 }
 0x151   : > { %5006 = vst [vmem:[%s6834_s14 + $0x18] sm:$0xff] %v4159_v54  ;;  %v5787_v61 = vpop.f32.mrb[35].mxu1 }
 0x153   : > { %v4229_v62 = vpop.f32.mrb[36].mxu0 }
 0x154   : > { %5007 = vst [vmem:[%s6834_s14 + $0x20] sm:$0xff] %v4229_v62  ;;  %v4299_v63 = vpop.f32.mrb[36].mxu1  ;;  %v5794_v8 = vpop.f32.mrb[37].mxu0 }
 0x155   : > { %5008 = vst [vmem:[%s6834_s14 + $0x28] sm:$0xff] %v4299_v63  ;;  %v5801_v9 = vpop.f32.mrb[37].mxu1 }
 0x157   : > { %v4369_v10 = vpop.f32.mrb[38].mxu0 }
 0x158   : > { %5009 = vst [vmem:[%s6834_s14 + $0x30] sm:$0xff] %v4369_v10  ;;  %v4439_v13 = vpop.f32.mrb[38].mxu1  ;;  %v5808_v24 = vpop.f32.mrb[39].mxu0 }
 0x159   : > { %5010 = vst [vmem:[%s6834_s14 + $0x38] sm:$0xff] %v4439_v13  ;;  %v5815_v25 = vpop.f32.mrb[39].mxu1 }
 0x15b   : > { %v4509_v26 = vpop.f32.mrb[40].mxu0 }
 0x15c   : > { %5011 = vst [vmem:[%s6834_s14 + $0x40] sm:$0xff] %v4509_v26  ;;  %v4579_v27 = vpop.f32.mrb[40].mxu1  ;;  %v5822_v40 = vpop.f32.mrb[41].mxu0 }
 0x15d   : > { %5012 = vst [vmem:[%s6834_s14 + $0x48] sm:$0xff] %v4579_v27  ;;  %v5829_v41 = vpop.f32.mrb[41].mxu1 }
 0x15f   : > { %v4649_v42 = vpop.f32.mrb[42].mxu0 }
 0x160   : > { %5013 = vst [vmem:[%s6834_s14 + $0x50] sm:$0xff] %v4649_v42  ;;  %v4719_v43 = vpop.f32.mrb[42].mxu1  ;;  %v5836_v56 = vpop.f32.mrb[43].mxu0 }
 0x161   : > { %5014 = vst [vmem:[%s6834_s14 + $0x58] sm:$0xff] %v4719_v43  ;;  %v5843_v57 = vpop.f32.mrb[43].mxu1 }
 0x163   : > { %v4789_v58 = vpop.f32.mrb[44].mxu0 }
 0x164   : > { %5015 = vst [vmem:[%s6834_s14 + $0x60] sm:$0xff] %v4789_v58  ;;  %v4859_v59 = vpop.f32.mrb[44].mxu1  ;;  %v5850_v16 = vpop.f32.mrb[45].mxu0 }
 0x165   : > { %5016 = vst [vmem:[%s6834_s14 + $0x68] sm:$0xff] %v4859_v59  ;;  %v5857_v17 = vpop.f32.mrb[45].mxu1 }
 0x167   : > { %v4929_v18 = vpop.f32.mrb[46].mxu0 }
 0x168   : > { %5017 = vst [vmem:[%s6834_s14 + $0x70] sm:$0xff] %v4929_v18  ;;  %v4999_v19 = vpop.f32.mrb[46].mxu1  ;;  %v5864_v48 = vpop.f32.mrb[47].mxu0 }
 0x169   : > { %5018 = vst [vmem:[%s6834_s14 + $0x78] sm:$0xff] %v4999_v19  ;;  %v5871_v49 = vpop.f32.mrb[47].mxu1 }
 0x16a PF: > { %s16_s18 = sadd.s32 1, %s6113_s18  }
 0x16b   : > { %p13_p4 = scmp.ge.s32.totalorder %s16_s18, 4  }
 0x16d   :  { %15 = sbr.rel (!%p13_p4) target bundleno = 1 (0x1), region = 87 }

// kernel: reverse.4
= control target key start
LH: loop header
LB: loop body
LE: loop exit
PB: predicated region body
PF: predicated region fallthrough
CT: control target
= control target key end

     0   :  { %s1256_s0 = inlined_call_operand.vmem [shape: f32[2,32,28,13], index: 0, kind: input, shape index: {}]   ;;  %s1257_s1 = inlined_call_operand.vmem [shape: f32[2,32,28,13], index: 1, kind: output, shape index: {}]  }
   0x1   :  { %v416_v0 = vld [vmem:[%s1256_s0 + $0x180] sm:$0xff]  ;;  %v466_v26 = vld [vmem:[%s1256_s0 + $0x188] sm:$0xff]  ;;  %v518_v52 = vld [vmem:[%s1256_s0 + $0x190] sm:$0xff] }
   0x2   :  { %v417_v1 = vld [vmem:[%s1256_s0 + $0x320] sm:$0xff]  ;;  %4 = vst [vmem:[%s1257_s1] sm:$0xff] %v416_v0  ;;  %467 = vst [vmem:[%s1257_s1 + $0x8] sm:$0xff] %v466_v26  ;;  %v468_v27 = vld [vmem:[%s1256_s0 + $0x328] sm:$0xff] }
   0x3   :  { %v419_v2 = vld [vmem:[%s1256_s0 + $0x160] sm:$0xff]  ;;  %418 = vst [vmem:[%s1257_s1 + $0x1a0] sm:$0xff] %v417_v1  ;;  %v470_v28 = vld [vmem:[%s1256_s0 + $0x168] sm:$0xff]  ;;  %469 = vst [vmem:[%s1257_s1 + $0x1a8] sm:$0xff] %v468_v27 }
   0x4   :  { %420 = vst [vmem:[%s1257_s1 + $0x20] sm:$0xff] %v419_v2  ;;  %v421_v3 = vld [vmem:[%s1256_s0 + $0x300] sm:$0xff]  ;;  %v472_v29 = vld [vmem:[%s1256_s0 + $0x308] sm:$0xff]  ;;  %471 = vst [vmem:[%s1257_s1 + $0x28] sm:$0xff] %v470_v28 }
   0x5   :  { %v423_v4 = vld [vmem:[%s1256_s0 + $0x140] sm:$0xff]  ;;  %422 = vst [vmem:[%s1257_s1 + $0x1c0] sm:$0xff] %v421_v3  ;;  %473 = vst [vmem:[%s1257_s1 + $0x1c8] sm:$0xff] %v472_v29  ;;  %v474_v30 = vld [vmem:[%s1256_s0 + $0x148] sm:$0xff] }
   0x6   :  { %v425_v5 = vld [vmem:[%s1256_s0 + $0x2e0] sm:$0xff]  ;;  %424 = vst [vmem:[%s1257_s1 + $0x40] sm:$0xff] %v423_v4  ;;  %v476_v31 = vld [vmem:[%s1256_s0 + $0x2e8] sm:$0xff]  ;;  %475 = vst [vmem:[%s1257_s1 + $0x48] sm:$0xff] %v474_v30 }
   0x7   :  { %426 = vst [vmem:[%s1257_s1 + $0x1e0] sm:$0xff] %v425_v5  ;;  %v427_v6 = vld [vmem:[%s1256_s0 + $0x120] sm:$0xff]  ;;  %v478_v32 = vld [vmem:[%s1256_s0 + $0x128] sm:$0xff]  ;;  %477 = vst [vmem:[%s1257_s1 + $0x1e8] sm:$0xff] %v476_v31 }
   0x8   :  { %v429_v7 = vld [vmem:[%s1256_s0 + $0x2c0] sm:$0xff]  ;;  %428 = vst [vmem:[%s1257_s1 + $0x60] sm:$0xff] %v427_v6  ;;  %479 = vst [vmem:[%s1257_s1 + $0x68] sm:$0xff] %v478_v32  ;;  %v480_v33 = vld [vmem:[%s1256_s0 + $0x2c8] sm:$0xff] }
   0x9   :  { %v431_v8 = vld [vmem:[%s1256_s0 + $0x100] sm:$0xff]  ;;  %430 = vst [vmem:[%s1257_s1 + $0x200] sm:$0xff] %v429_v7  ;;  %v482_v34 = vld [vmem:[%s1256_s0 + $0x108] sm:$0xff]  ;;  %481 = vst [vmem:[%s1257_s1 + $0x208] sm:$0xff] %v480_v33 }
   0xa   :  { %432 = vst [vmem:[%s1257_s1 + $0x80] sm:$0xff] %v431_v8  ;;  %v433_v9 = vld [vmem:[%s1256_s0 + $0x2a0] sm:$0xff]  ;;  %v484_v35 = vld [vmem:[%s1256_s0 + $0x2a8] sm:$0xff]  ;;  %483 = vst [vmem:[%s1257_s1 + $0x88] sm:$0xff] %v482_v34 }
   0xb   :  { %v435_v10 = vld [vmem:[%s1256_s0 + $0xe0] sm:$0xff]  ;;  %434 = vst [vmem:[%s1257_s1 + $0x220] sm:$0xff] %v433_v9  ;;  %485 = vst [vmem:[%s1257_s1 + $0x228] sm:$0xff] %v484_v35  ;;  %v486_v36 = vld [vmem:[%s1256_s0 + $0xe8] sm:$0xff] }
   0xc   :  { %v437_v11 = vld [vmem:[%s1256_s0 + $0x280] sm:$0xff]  ;;  %436 = vst [vmem:[%s1257_s1 + $0xa0] sm:$0xff] %v435_v10  ;;  %v488_v37 = vld [vmem:[%s1256_s0 + $0x288] sm:$0xff]  ;;  %487 = vst [vmem:[%s1257_s1 + $0xa8] sm:$0xff] %v486_v36 }
   0xd   :  { %438 = vst [vmem:[%s1257_s1 + $0x240] sm:$0xff] %v437_v11  ;;  %v439_v12 = vld [vmem:[%s1256_s0 + $0xc0] sm:$0xff]  ;;  %v490_v38 = vld [vmem:[%s1256_s0 + $0xc8] sm:$0xff]  ;;  %489 = vst [vmem:[%s1257_s1 + $0x248] sm:$0xff] %v488_v37 }
   0xe   :  { %v441_v13 = vld [vmem:[%s1256_s0 + $0x260] sm:$0xff]  ;;  %440 = vst [vmem:[%s1257_s1 + $0xc0] sm:$0xff] %v439_v12  ;;  %491 = vst [vmem:[%s1257_s1 + $0xc8] sm:$0xff] %v490_v38  ;;  %v492_v39 = vld [vmem:[%s1256_s0 + $0x268] sm:$0xff] }
   0xf   :  { %v443_v14 = vld [vmem:[%s1256_s0 + $0xa0] sm:$0xff]  ;;  %442 = vst [vmem:[%s1257_s1 + $0x260] sm:$0xff] %v441_v13  ;;  %v494_v40 = vld [vmem:[%s1256_s0 + $0xa8] sm:$0xff]  ;;  %493 = vst [vmem:[%s1257_s1 + $0x268] sm:$0xff] %v492_v39 }
  0x10   :  { %444 = vst [vmem:[%s1257_s1 + $0xe0] sm:$0xff] %v443_v14  ;;  %v445_v15 = vld [vmem:[%s1256_s0 + $0x240] sm:$0xff]  ;;  %v496_v41 = vld [vmem:[%s1256_s0 + $0x248] sm:$0xff]  ;;  %495 = vst [vmem:[%s1257_s1 + $0xe8] sm:$0xff] %v494_v40 }
  0x11   :  { %v447_v16 = vld [vmem:[%s1256_s0 + $0x80] sm:$0xff]  ;;  %446 = vst [vmem:[%s1257_s1 + $0x280] sm:$0xff] %v445_v15  ;;  %497 = vst [vmem:[%s1257_s1 + $0x288] sm:$0xff] %v496_v41  ;;  %v498_v42 = vld [vmem:[%s1256_s0 + $0x88] sm:$0xff] }
  0x12   :  { %v449_v17 = vld [vmem:[%s1256_s0 + $0x220] sm:$0xff]  ;;  %448 = vst [vmem:[%s1257_s1 + $0x100] sm:$0xff] %v447_v16  ;;  %v500_v43 = vld [vmem:[%s1256_s0 + $0x228] sm:$0xff]  ;;  %499 = vst [vmem:[%s1257_s1 + $0x108] sm:$0xff] %v498_v42 }
  0x13   :  { %450 = vst [vmem:[%s1257_s1 + $0x2a0] sm:$0xff] %v449_v17  ;;  %v451_v18 = vld [vmem:[%s1256_s0 + $0x60] sm:$0xff]  ;;  %v502_v44 = vld [vmem:[%s1256_s0 + $0x68] sm:$0xff]  ;;  %501 = vst [vmem:[%s1257_s1 + $0x2a8] sm:$0xff] %v500_v43 }
  0x14   :  { %v453_v19 = vld [vmem:[%s1256_s0 + $0x200] sm:$0xff]  ;;  %452 = vst [vmem:[%s1257_s1 + $0x120] sm:$0xff] %v451_v18  ;;  %503 = vst [vmem:[%s1257_s1 + $0x128] sm:$0xff] %v502_v44  ;;  %v504_v45 = vld [vmem:[%s1256_s0 + $0x208] sm:$0xff] }
  0x15   :  { %v455_v20 = vld [vmem:[%s1256_s0 + $0x40] sm:$0xff]  ;;  %454 = vst [vmem:[%s1257_s1 + $0x2c0] sm:$0xff] %v453_v19  ;;  %v506_v46 = vld [vmem:[%s1256_s0 + $0x48] sm:$0xff]  ;;  %505 = vst [vmem:[%s1257_s1 + $0x2c8] sm:$0xff] %v504_v45 }
  0x16   :  { %456 = vst [vmem:[%s1257_s1 + $0x140] sm:$0xff] %v455_v20  ;;  %v457_v21 = vld [vmem:[%s1256_s0 + $0x1e0] sm:$0xff]  ;;  %v508_v47 = vld [vmem:[%s1256_s0 + $0x1e8] sm:$0xff]  ;;  %507 = vst [vmem:[%s1257_s1 + $0x148] sm:$0xff] %v506_v46 }
  0x17   :  { %v459_v22 = vld [vmem:[%s1256_s0 + $0x20] sm:$0xff]  ;;  %458 = vst [vmem:[%s1257_s1 + $0x2e0] sm:$0xff] %v457_v21  ;;  %509 = vst [vmem:[%s1257_s1 + $0x2e8] sm:$0xff] %v508_v47  ;;  %v510_v48 = vld [vmem:[%s1256_s0 + $0x28] sm:$0xff] }
  0x18   :  { %v461_v23 = vld [vmem:[%s1256_s0 + $0x1c0] sm:$0xff]  ;;  %460 = vst [vmem:[%s1257_s1 + $0x160] sm:$0xff] %v459_v22  ;;  %v512_v49 = vld [vmem:[%s1256_s0 + $0x1c8] sm:$0xff]  ;;  %511 = vst [vmem:[%s1257_s1 + $0x168] sm:$0xff] %v510_v48 }
  0x19   :  { %462 = vst [vmem:[%s1257_s1 + $0x300] sm:$0xff] %v461_v23  ;;  %v97_v24 = vld [vmem:[%s1256_s0] sm:$0xff]  ;;  %v514_v50 = vld [vmem:[%s1256_s0 + $0x8] sm:$0xff]  ;;  %513 = vst [vmem:[%s1257_s1 + $0x308] sm:$0xff] %v512_v49 }
  0x1a   :  { %v464_v25 = vld [vmem:[%s1256_s0 + $0x1a0] sm:$0xff]  ;;  %463 = vst [vmem:[%s1257_s1 + $0x180] sm:$0xff] %v97_v24  ;;  %515 = vst [vmem:[%s1257_s1 + $0x188] sm:$0xff] %v514_v50  ;;  %v516_v51 = vld [vmem:[%s1256_s0 + $0x1a8] sm:$0xff] }
  0x1b   :  { %465 = vst [vmem:[%s1257_s1 + $0x320] sm:$0xff] %v464_v25  ;;  %v520_v53 = vld [vmem:[%s1256_s0 + $0x330] sm:$0xff]  ;;  %517 = vst [vmem:[%s1257_s1 + $0x328] sm:$0xff] %v516_v51  ;;  %v570_v14 = vld [vmem:[%s1256_s0 + $0x198] sm:$0xff] }
  0x1c   :  { %519 = vst [vmem:[%s1257_s1 + $0x10] sm:$0xff] %v518_v52  ;;  %521 = vst [vmem:[%s1257_s1 + $0x1b0] sm:$0xff] %v520_v53  ;;  %v522_v54 = vld [vmem:[%s1256_s0 + $0x170] sm:$0xff]  ;;  %v572_v15 = vld [vmem:[%s1256_s0 + $0x338] sm:$0xff] }
  0x1d   :  { %v524_v55 = vld [vmem:[%s1256_s0 + $0x310] sm:$0xff]  ;;  %523 = vst [vmem:[%s1257_s1 + $0x30] sm:$0xff] %v522_v54  ;;  %v574_v16 = vld [vmem:[%s1256_s0 + $0x178] sm:$0xff]  ;;  %571 = vst [vmem:[%s1257_s1 + $0x18] sm:$0xff] %v570_v14 }
  0x1e   :  { %v526_v56 = vld [vmem:[%s1256_s0 + $0x150] sm:$0xff]  ;;  %525 = vst [vmem:[%s1257_s1 + $0x1d0] sm:$0xff] %v524_v55  ;;  %573 = vst [vmem:[%s1257_s1 + $0x1b8] sm:$0xff] %v572_v15  ;;  %v576_v17 = vld [vmem:[%s1256_s0 + $0x318] sm:$0xff] }
  0x1f   :  { %527 = vst [vmem:[%s1257_s1 + $0x50] sm:$0xff] %v526_v56  ;;  %v528_v57 = vld [vmem:[%s1256_s0 + $0x2f0] sm:$0xff]  ;;  %575 = vst [vmem:[%s1257_s1 + $0x38] sm:$0xff] %v574_v16  ;;  %v578_v18 = vld [vmem:[%s1256_s0 + $0x158] sm:$0xff] }
  0x20   :  { %v530_v58 = vld [vmem:[%s1256_s0 + $0x130] sm:$0xff]  ;;  %529 = vst [vmem:[%s1257_s1 + $0x1f0] sm:$0xff] %v528_v57  ;;  %v580_v19 = vld [vmem:[%s1256_s0 + $0x2f8] sm:$0xff]  ;;  %577 = vst [vmem:[%s1257_s1 + $0x1d8] sm:$0xff] %v576_v17 }
  0x21   :  { %v532_v59 = vld [vmem:[%s1256_s0 + $0x2d0] sm:$0xff]  ;;  %531 = vst [vmem:[%s1257_s1 + $0x70] sm:$0xff] %v530_v58  ;;  %579 = vst [vmem:[%s1257_s1 + $0x58] sm:$0xff] %v578_v18  ;;  %v582_v20 = vld [vmem:[%s1256_s0 + $0x138] sm:$0xff] }
  0x22   :  { %533 = vst [vmem:[%s1257_s1 + $0x210] sm:$0xff] %v532_v59  ;;  %v534_v60 = vld [vmem:[%s1256_s0 + $0x110] sm:$0xff]  ;;  %581 = vst [vmem:[%s1257_s1 + $0x1f8] sm:$0xff] %v580_v19  ;;  %v584_v21 = vld [vmem:[%s1256_s0 + $0x2d8] sm:$0xff] }
  0x23   :  { %v536_v61 = vld [vmem:[%s1256_s0 + $0x2b0] sm:$0xff]  ;;  %535 = vst [vmem:[%s1257_s1 + $0x90] sm:$0xff] %v534_v60  ;;  %v586_v22 = vld [vmem:[%s1256_s0 + $0x118] sm:$0xff]  ;;  %583 = vst [vmem:[%s1257_s1 + $0x78] sm:$0xff] %v582_v20 }
  0x24   :  { %v538_v62 = vld [vmem:[%s1256_s0 + $0xf0] sm:$0xff]  ;;  %537 = vst [vmem:[%s1257_s1 + $0x230] sm:$0xff] %v536_v61  ;;  %585 = vst [vmem:[%s1257_s1 + $0x218] sm:$0xff] %v584_v21  ;;  %v588_v23 = vld [vmem:[%s1256_s0 + $0x2b8] sm:$0xff] }
  0x25   :  { %539 = vst [vmem:[%s1257_s1 + $0xb0] sm:$0xff] %v538_v62  ;;  %v540_v63 = vld [vmem:[%s1256_s0 + $0x290] sm:$0xff]  ;;  %587 = vst [vmem:[%s1257_s1 + $0x98] sm:$0xff] %v586_v22  ;;  %v590_v24 = vld [vmem:[%s1256_s0 + $0xf8] sm:$0xff] }
  0x26   :  { %v542_v0 = vld [vmem:[%s1256_s0 + $0xd0] sm:$0xff]  ;;  %541 = vst [vmem:[%s1257_s1 + $0x250] sm:$0xff] %v540_v63  ;;  %v592_v25 = vld [vmem:[%s1256_s0 + $0x298] sm:$0xff]  ;;  %589 = vst [vmem:[%s1257_s1 + $0x238] sm:$0xff] %v588_v23 }
  0x27   :  { %v544_v1 = vld [vmem:[%s1256_s0 + $0x270] sm:$0xff]  ;;  %543 = vst [vmem:[%s1257_s1 + $0xd0] sm:$0xff] %v542_v0  ;;  %591 = vst [vmem:[%s1257_s1 + $0xb8] sm:$0xff] %v590_v24  ;;  %v594_v26 = vld [vmem:[%s1256_s0 + $0xd8] sm:$0xff] }
  0x28   :  { %545 = vst [vmem:[%s1257_s1 + $0x270] sm:$0xff] %v544_v1  ;;  %v546_v2 = vld [vmem:[%s1256_s0 + $0xb0] sm:$0xff]  ;;  %593 = vst [vmem:[%s1257_s1 + $0x258] sm:$0xff] %v592_v25  ;;  %v596_v27 = vld [vmem:[%s1256_s0 + $0x278] sm:$0xff] }
  0x29   :  { %v548_v3 = vld [vmem:[%s1256_s0 + $0x250] sm:$0xff]  ;;  %547 = vst [vmem:[%s1257_s1 + $0xf0] sm:$0xff] %v546_v2  ;;  %v598_v28 = vld [vmem:[%s1256_s0 + $0xb8] sm:$0xff]  ;;  %595 = vst [vmem:[%s1257_s1 + $0xd8] sm:$0xff] %v594_v26 }
  0x2a   :  { %v550_v4 = vld [vmem:[%s1256_s0 + $0x90] sm:$0xff]  ;;  %549 = vst [vmem:[%s1257_s1 + $0x290] sm:$0xff] %v548_v3  ;;  %597 = vst [vmem:[%s1257_s1 + $0x278] sm:$0xff] %v596_v27  ;;  %v600_v29 = vld [vmem:[%s1256_s0 + $0x258] sm:$0xff] }
  0x2b   :  { %551 = vst [vmem:[%s1257_s1 + $0x110] sm:$0xff] %v550_v4  ;;  %v552_v5 = vld [vmem:[%s1256_s0 + $0x230] sm:$0xff]  ;;  %599 = vst [vmem:[%s1257_s1 + $0xf8] sm:$0xff] %v598_v28  ;;  %v602_v30 = vld [vmem:[%s1256_s0 + $0x98] sm:$0xff] }
  0x2c   :  { %v554_v6 = vld [vmem:[%s1256_s0 + $0x70] sm:$0xff]  ;;  %553 = vst [vmem:[%s1257_s1 + $0x2b0] sm:$0xff] %v552_v5  ;;  %v604_v31 = vld [vmem:[%s1256_s0 + $0x238] sm:$0xff]  ;;  %601 = vst [vmem:[%s1257_s1 + $0x298] sm:$0xff] %v600_v29 }
  0x2d   :  { %v556_v7 = vld [vmem:[%s1256_s0 + $0x210] sm:$0xff]  ;;  %555 = vst [vmem:[%s1257_s1 + $0x130] sm:$0xff] %v554_v6  ;;  %603 = vst [vmem:[%s1257_s1 + $0x118] sm:$0xff] %v602_v30  ;;  %v606_v32 = vld [vmem:[%s1256_s0 + $0x78] sm:$0xff] }
  0x2e   :  { %557 = vst [vmem:[%s1257_s1 + $0x2d0] sm:$0xff] %v556_v7  ;;  %v558_v8 = vld [vmem:[%s1256_s0 + $0x50] sm:$0xff]  ;;  %605 = vst [vmem:[%s1257_s1 + $0x2b8] sm:$0xff] %v604_v31  ;;  %v608_v33 = vld [vmem:[%s1256_s0 + $0x218] sm:$0xff] }
  0x2f   :  { %v560_v9 = vld [vmem:[%s1256_s0 + $0x1f0] sm:$0xff]  ;;  %559 = vst [vmem:[%s1257_s1 + $0x150] sm:$0xff] %v558_v8  ;;  %v610_v34 = vld [vmem:[%s1256_s0 + $0x58] sm:$0xff]  ;;  %607 = vst [vmem:[%s1257_s1 + $0x138] sm:$0xff] %v606_v32 }
  0x30   :  { %v562_v10 = vld [vmem:[%s1256_s0 + $0x30] sm:$0xff]  ;;  %561 = vst [vmem:[%s1257_s1 + $0x2f0] sm:$0xff] %v560_v9  ;;  %609 = vst [vmem:[%s1257_s1 + $0x2d8] sm:$0xff] %v608_v33  ;;  %v612_v35 = vld [vmem:[%s1256_s0 + $0x1f8] sm:$0xff] }
  0x31   :  { %563 = vst [vmem:[%s1257_s1 + $0x170] sm:$0xff] %v562_v10  ;;  %v564_v11 = vld [vmem:[%s1256_s0 + $0x1d0] sm:$0xff]  ;;  %611 = vst [vmem:[%s1257_s1 + $0x158] sm:$0xff] %v610_v34  ;;  %v614_v36 = vld [vmem:[%s1256_s0 + $0x38] sm:$0xff] }
  0x32   :  { %v566_v12 = vld [vmem:[%s1256_s0 + $0x10] sm:$0xff]  ;;  %565 = vst [vmem:[%s1257_s1 + $0x310] sm:$0xff] %v564_v11  ;;  %v616_v37 = vld [vmem:[%s1256_s0 + $0x1d8] sm:$0xff]  ;;  %613 = vst [vmem:[%s1257_s1 + $0x2f8] sm:$0xff] %v612_v35 }
  0x33   :  { %v568_v13 = vld [vmem:[%s1256_s0 + $0x1b0] sm:$0xff]  ;;  %567 = vst [vmem:[%s1257_s1 + $0x190] sm:$0xff] %v566_v12  ;;  %615 = vst [vmem:[%s1257_s1 + $0x178] sm:$0xff] %v614_v36  ;;  %v618_v38 = vld [vmem:[%s1256_s0 + $0x18] sm:$0xff] }
  0x34   :  { %569 = vst [vmem:[%s1257_s1 + $0x330] sm:$0xff] %v568_v13  ;;  %617 = vst [vmem:[%s1257_s1 + $0x318] sm:$0xff] %v616_v37  ;;  %v620_v39 = vld [vmem:[%s1256_s0 + $0x1b8] sm:$0xff] }
  0x35   :  { %619 = vst [vmem:[%s1257_s1 + $0x198] sm:$0xff] %v618_v38  ;;  %621 = vst [vmem:[%s1257_s1 + $0x338] sm:$0xff] %v620_v39 }

// kernel: _lambda_.6
= control target key start
LH: loop header
LB: loop body
LE: loop exit
PB: predicated region body
PF: predicated region fallthrough
CT: control target
= control target key end

     0   :  { %s6788_s18 = smov 0   ;;  %s7775_s0 = inlined_call_operand.vmem [shape: f32[2,16,8,32], index: 0, kind: input, shape index: {}]   ;;  %s7776_s1 = inlined_call_operand.vmem [shape: f32[2,16,8,32], index: 1, kind: input, shape index: {}]   ;;  %s7777_s2 = inlined_call_operand.vmem [shape: f32[2,16,32,128], index: 2, kind: input, shape index: {}]   ;;  %s7778_s3 = inlined_call_operand.vmem [shape: f32[2,16,32,128], index: 3, kind: input, shape index: {}]   ;;  %s7779_s4 = inlined_call_operand.vmem [shape: f32[2,16,8,128], index: 4, kind: output, shape index: {0}]   ;;  %s7780_s5 = inlined_call_operand.vmem [shape: f32[2,16,8,128], index: 5, kind: output, shape index: {1}]  }
   0x1 LB: > { %s5207_s19 = sadd.s32 4294967295, %s6753_s18   ;;  %p5211_p0 = scmp.ge.s32.totalorder %s6753_s18, 1  ;;  %s6753_s18 = sphi %s6788_s18, %s16_s18  }
   0x2   : > { %p220_p1 = scmp.lt.s32.totalorder %s6753_s18, 3 }
   0x4   : > { %p221_p2 = pnand %p5211_p0, %p220_p1 }
   0x6   : > { %224 = sbr.rel (%p221_p2) target bundleno = 490 (0x1ea), region = 36 }
   0xd   : > { %p268_p3 = scmp.lt.s32.totalorder %s5207_s19, 1  ;;  %v6755_v0 = vmov 0.0|0.0   ;;  %vm6756_vm0 = vmmov 0   ;;  %v7781_v1 = vmov 0.0   ;;  %vm458_vm1 = vcmask 261120  }
   0xe   : > { %6320 = vmatprep.subr.bf16.mxu0 %v6755_v0  ;;  %6326 = vmatprep.subr.bf16.mxu1 %v6755_v0 }
   0xf   : > { %s7899_s19 = smov (!%p268_p3, %s5207_s19), 1  ;;  %5624 = vmatprep.mubr.msk.f32.mxu0 %vm6756_vm0, %v7781_v1  ;;  %5635 = vmatprep.mubr.msk.f32.mxu1 %vm6756_vm0, %v7781_v1 }
  0x10   : > { %s5292_s20 = sshll.u32 %s7899_s19, 9  ;;  %s6821_s24 = sshll.u32 %s7899_s19, 7 }
  0x11   : > { %s6810_s23 = scalar_lea.vmem %s7777_s2, %s5292_s20  ;;  %s6838_s27 = scalar_lea.vmem %s7775_s0, %s6821_s24 }
  0x12   : > { %v330_v2 = vld [vmem:[%s6810_s23] sm:$0xff]  ;;  %v331_v3 = vld [vmem:[%s6810_s23 + $0x8] sm:$0xff]  ;;  %v332_v7 = vld [vmem:[%s6810_s23 + $0x10] sm:$0xff]  ;;  %s7093_s30 = scalar_lea.vmem %s7778_s3, %s5292_s20  ;;  %s7151_s8 = scalar_lea.vmem %s7776_s1, %s6821_s24 }
  0x13   : > { %v334_v4 = vld [vmem:[%s6810_s23 + $0x20] sm:$0xff]  ;;  %v6815_v5 = vpack.c.bf16 %v331_v3, %v330_v2  ;;  %v335_v6 = vld [vmem:[%s6810_s23 + $0x28] sm:$0xff]  ;;  %v333_v8 = vld [vmem:[%s6810_s23 + $0x18] sm:$0xff]  ;;  %s7720_s11 = scalar_lea.vmem %s7779_s4, %s6821_s24  ;;  %s7754_s14 = scalar_lea.vmem %s7780_s5, %s6821_s24 }
  0x14   : > { %v6823_v9 = vpack.c.bf16 %v335_v6, %v334_v4  ;;  %v336_v10 = vld [vmem:[%s6810_s23 + $0x30] sm:$0xff]  ;;  %v337_v11 = vld [vmem:[%s6810_s23 + $0x38] sm:$0xff]  ;;  %v6828_v12 = vpack.c.bf16 %v333_v8, %v332_v7  ;;  %v338_v14 = vld [vmem:[%s6810_s23 + $0x40] sm:$0xff] }
  0x15   : > { %6322 = vmatpush3.bf16.msra.mxu0 %v6815_v5  ;;  %v6832_v13 = vpack.c.bf16 %v337_v11, %v336_v10  ;;  %v339_v15 = vld [vmem:[%s6810_s23 + $0x48] sm:$0xff]  ;;  %v342_v16 = vld [vmem:[%s6810_s23 + $0x60] sm:$0xff]  ;;  %v340_v22 = vld [vmem:[%s6810_s23 + $0x50] sm:$0xff] }
  0x16   : > { %6328 = vmatpush3.bf16.msra.mxu1 %v6823_v9  ;;  %6323 = vmatprep.subr.bf16.mxu0 %v6755_v0  ;;  %v343_v17 = vld [vmem:[%s6810_s23 + $0x68] sm:$0xff]  ;;  %v6847_v18 = vld [vmem:[%s6838_s27] sm:$0xff]  ;;  %v6849_v19 = vpack.c.bf16 %v339_v15, %v338_v14  ;;  %v341_v23 = vld [vmem:[%s6810_s23 + $0x58] sm:$0xff] }
  0x17   : > { %6329 = vmatprep.subr.bf16.mxu1 %v6755_v0  ;;  %v6853_v20 = vld [vmem:[%s6838_s27 + $0x8] sm:$0xff]  ;;  %v6856_v21 = vpack.c.bf16 %v343_v17, %v342_v16  ;;  %v344_v24 = vld [vmem:[%s6810_s23 + $0x70] sm:$0xff]  ;;  %v345_v25 = vld [vmem:[%s6810_s23 + $0x78] sm:$0xff]  ;;  %v6868_v26 = vpack.c.bf16 %v341_v23, %v340_v22 }
  0x18   : > { %7821 = vst [vmem:[#allocation2_spill] sm:$0xff] %v6849_v19  ;;  %v6872_v27 = vpack.c.bf16 %v345_v25, %v344_v24  ;;  %v346_v28 = vld [vmem:[%s6810_s23 + $0x80] sm:$0xff]  ;;  %v347_v29 = vld [vmem:[%s6810_s23 + $0x88] sm:$0xff]  ;;  %v6885_v32 = vld [vmem:[%s6838_s27 + $0x10] sm:$0xff] }
  0x19   : > { %6325 = vmatpush3.bf16.msra.mxu0 %v6828_v12  ;;  %7822 = vst [vmem:[#allocation3_spill] sm:$0xff] %v6856_v21  ;;  %7823 = vst [vmem:[#allocation4_spill] sm:$0xff] %v6868_v26  ;;  %v350_v30 = vld [vmem:[%s6810_s23 + $0xa0] sm:$0xff]  ;;  %v351_v31 = vld [vmem:[%s6810_s23 + $0xa8] sm:$0xff]  ;;  %v6887_v33 = vpack.c.bf16 %v347_v29, %v346_v28 }
  0x1a   : > { %6331 = vmatpush3.bf16.msra.mxu1 %v6832_v13  ;;  %6332 = vmatprep.subr.bf16.mxu0 %v6755_v0  ;;  %7824 = vst [vmem:[#allocation5_spill] sm:$0xff] %v6872_v27  ;;  %v6891_v34 = vld [vmem:[%s6838_s27 + $0x18] sm:$0xff]  ;;  %v6894_v35 = vpack.c.bf16 %v351_v31, %v350_v30  ;;  %v348_v36 = vld [vmem:[%s6810_s23 + $0x90] sm:$0xff]  ;;  %v354_v42 = vld [vmem:[%s6810_s23 + $0xc0] sm:$0xff] }
  0x1b   : > { %6338 = vmatprep.subr.bf16.mxu1 %v6755_v0  ;;  %7825 = vst [vmem:[#allocation6_spill] sm:$0xff] %v6887_v33  ;;  %v349_v37 = vld [vmem:[%s6810_s23 + $0x98] sm:$0xff]  ;;  %v352_v38 = vld [vmem:[%s6810_s23 + $0xb0] sm:$0xff]  ;;  %v355_v43 = vld [vmem:[%s6810_s23 + $0xc8] sm:$0xff] }
  0x1c   : > { %5625 = vmatmul.mubr.msk.f32.vlgmr.msra.gmra.mrb[0].mxu0 %vm458_vm1, %v6847_v18  ;;  %7826 = vst [vmem:[#allocation7_spill] sm:$0xff] %v6894_v35  ;;  %v353_v39 = vld [vmem:[%s6810_s23 + $0xb8] sm:$0xff]  ;;  %v6906_v40 = vpack.c.bf16 %v349_v37, %v348_v36  ;;  %v358_v44 = vld [vmem:[%s6810_s23 + $0xe0] sm:$0xff]  ;;  %v359_v45 = vld [vmem:[%s6810_s23 + $0xe8] sm:$0xff]  ;;  %v6925_v47 = vpack.c.bf16 %v355_v43, %v354_v42 }
  0x1d   : > { %5636 = vmatmul.mubr.msk.f32.vlgmr.msra.gmra.mrb[0].mxu1 %vm458_vm1, %v6853_v20  ;;  %6334 = vmatpush3.bf16.msra.mxu0 %v6849_v19  ;;  %v6910_v41 = vpack.c.bf16 %v353_v39, %v352_v38  ;;  %v6923_v46 = vld [vmem:[%s6838_s27 + $0x20] sm:$0xff]  ;;  %v6929_v48 = vld [vmem:[%s6838_s27 + $0x28] sm:$0xff]  ;;  %v6932_v49 = vpack.c.bf16 %v359_v45, %v358_v44  ;;  %v356_v50 = vld [vmem:[%s6810_s23 + $0xd0] sm:$0xff] }
  0x1e   : > { %6340 = vmatpush3.bf16.msra.mxu1 %v6856_v21  ;;  %6335 = vmatprep.subr.bf16.mxu0 %v6755_v0  ;;  %7827 = vst [vmem:[#allocation8_spill] sm:$0xff] %v6906_v40  ;;  %7829 = vst [vmem:[#allocation10_spill] sm:$0xff] %v6925_v47  ;;  %v357_v51 = vld [vmem:[%s6810_s23 + $0xd8] sm:$0xff]  ;;  %v360_v52 = vld [vmem:[%s6810_s23 + $0xf0] sm:$0xff] }
  0x1f   : > { %6341 = vmatprep.subr.bf16.mxu1 %v6755_v0  ;;  %5646 = vmatprep.mubr.msk.f32.mxu0 %vm6756_vm0, %v7781_v1  ;;  %7828 = vst [vmem:[#allocation9_spill] sm:$0xff] %v6910_v41  ;;  %7830 = vst [vmem:[#allocation11_spill] sm:$0xff] %v6932_v49  ;;  %v361_v53 = vld [vmem:[%s6810_s23 + $0xf8] sm:$0xff]  ;;  %v6944_v54 = vpack.c.bf16 %v357_v51, %v356_v50  ;;  %v362_v56 = vld [vmem:[%s6810_s23 + $0x100] sm:$0xff] }
  0x20   : > { %5657 = vmatprep.mubr.msk.f32.mxu1 %vm6756_vm0, %v7781_v1  ;;  %v6948_v55 = vpack.c.bf16 %v361_v53, %v360_v52  ;;  %v363_v57 = vld [vmem:[%s6810_s23 + $0x108] sm:$0xff]  ;;  %v366_v58 = vld [vmem:[%s6810_s23 + $0x120] sm:$0xff]  ;;  %v6961_v60 = vld [vmem:[%s6838_s27 + $0x30] sm:$0xff] }
  0x21   : > { %6337 = vmatpush3.bf16.msra.mxu0 %v6868_v26  ;;  %7831 = vst [vmem:[#allocation12_spill] sm:$0xff] %v6944_v54  ;;  %v367_v59 = vld [vmem:[%s6810_s23 + $0x128] sm:$0xff]  ;;  %v6963_v61 = vpack.c.bf16 %v363_v57, %v362_v56  ;;  %v6967_v62 = vld [vmem:[%s6838_s27 + $0x38] sm:$0xff]  ;;  %v364_v2 = vld [vmem:[%s6810_s23 + $0x110] sm:$0xff] }
  0x22   : > { %6343 = vmatpush3.bf16.msra.mxu1 %v6872_v27  ;;  %6344 = vmatprep.subr.bf16.mxu0 %v6755_v0  ;;  %7832 = vst [vmem:[#allocation13_spill] sm:$0xff] %v6948_v55  ;;  %v6970_v63 = vpack.c.bf16 %v367_v59, %v366_v58  ;;  %v365_v3 = vld [vmem:[%s6810_s23 + $0x118] sm:$0xff]  ;;  %v368_v4 = vld [vmem:[%s6810_s23 + $0x130] sm:$0xff]  ;;  %v370_v10 = vld [vmem:[%s6810_s23 + $0x140] sm:$0xff] }
  0x23   : > { %6350 = vmatprep.subr.bf16.mxu1 %v6755_v0  ;;  %7833 = vst [vmem:[#allocation14_spill] sm:$0xff] %v6963_v61  ;;  %v369_v6 = vld [vmem:[%s6810_s23 + $0x138] sm:$0xff]  ;;  %v6982_v7 = vpack.c.bf16 %v365_v3, %v364_v2  ;;  %v371_v11 = vld [vmem:[%s6810_s23 + $0x148] sm:$0xff]  ;;  %v374_v14 = vld [vmem:[%s6810_s23 + $0x160] sm:$0xff] }
  0x24   : > { %5647 = vmatmul.mubr.msk.f32.vlgmr.msra.gmra.mrb[2].mxu0 %vm458_vm1, %v6885_v32  ;;  %7834 = vst [vmem:[#allocation15_spill] sm:$0xff] %v6970_v63  ;;  %v6986_v8 = vpack.c.bf16 %v369_v6, %v368_v4  ;;  %v375_v15 = vld [vmem:[%s6810_s23 + $0x168] sm:$0xff]  ;;  %v6999_v16 = vld [vmem:[%s6838_s27 + $0x40] sm:$0xff]  ;;  %v7001_v17 = vpack.c.bf16 %v371_v11, %v370_v10  ;;  %v372_v24 = vld [vmem:[%s6810_s23 + $0x150] sm:$0xff] }
  0x25   : > { %5658 = vmatmul.mubr.msk.f32.vlgmr.msra.gmra.mrb[2].mxu1 %vm458_vm1, %v6891_v34  ;;  %6346 = vmatpush3.bf16.msra.mxu0 %v6887_v33  ;;  %7835 = vst [vmem:[#allocation16_spill] sm:$0xff] %v6982_v7  ;;  %v7005_v22 = vld [vmem:[%s6838_s27 + $0x48] sm:$0xff]  ;;  %v7008_v23 = vpack.c.bf16 %v375_v15, %v374_v14  ;;  %v373_v25 = vld [vmem:[%s6810_s23 + $0x158] sm:$0xff]  ;;  %v376_v28 = vld [vmem:[%s6810_s23 + $0x170] sm:$0xff] }
  0x26   : > { %6352 = vmatpush3.bf16.msra.mxu1 %v6894_v35  ;;  %6347 = vmatprep.subr.bf16.mxu0 %v6755_v0  ;;  %7836 = vst [vmem:[#allocation17_spill] sm:$0xff] %v6986_v8  ;;  %7837 = vst [vmem:[#allocation18_spill] sm:$0xff] %v7001_v17  ;;  %v377_v29 = vld [vmem:[%s6810_s23 + $0x178] sm:$0xff]  ;;  %v7020_v30 = vpack.c.bf16 %v373_v25, %v372_v24  ;;  %v378_v36 = vld [vmem:[%s6810_s23 + $0x180] sm:$0xff] }
  0x27   : > { %6353 = vmatprep.subr.bf16.mxu1 %v6755_v0  ;;  %5668 = vmatprep.mubr.msk.f32.mxu0 %vm6756_vm0, %v7781_v1  ;;  %7838 = vst [vmem:[#allocation19_spill] sm:$0xff] %v7008_v23  ;;  %v7024_v31 = vpack.c.bf16 %v377_v29, %v376_v28  ;;  %v379_v37 = vld [vmem:[%s6810_s23 + $0x188] sm:$0xff]  ;;  %v382_v38 = vld [vmem:[%s6810_s23 + $0x1a0] sm:$0xff]  ;;  %v7037_v42 = vld [vmem:[%s6838_s27 + $0x50] sm:$0xff] }
  0x28   : > { %5679 = vmatprep.mubr.msk.f32.mxu1 %vm6756_vm0, %v7781_v1  ;;  %7839 = vst [vmem:[#allocation20_spill] sm:$0xff] %v7020_v30  ;;  %v383_v39 = vld [vmem:[%s6810_s23 + $0x1a8] sm:$0xff]  ;;  %v7039_v43 = vpack.c.bf16 %v379_v37, %v378_v36  ;;  %v7043_v44 = vld [vmem:[%s6838_s27 + $0x58] sm:$0xff]  ;;  %v380_v50 = vld [vmem:[%s6810_s23 + $0x190] sm:$0xff] }
  0x29   : > { %6349 = vmatpush3.bf16.msra.mxu0 %v6906_v40  ;;  %7840 = vst [vmem:[#allocation21_spill] sm:$0xff] %v7024_v31  ;;  %v7046_v45 = vpack.c.bf16 %v383_v39, %v382_v38  ;;  %v381_v51 = vld [vmem:[%s6810_s23 + $0x198] sm:$0xff]  ;;  %v384_v52 = vld [vmem:[%s6810_s23 + $0x1b0] sm:$0xff]  ;;  %v386_v58 = vld [vmem:[%s6810_s23 + $0x1c0] sm:$0xff] }
  0x2a   : > { %6355 = vmatpush3.bf16.msra.mxu1 %v6910_v41  ;;  %6356 = vmatprep.subr.bf16.mxu0 %v6755_v0  ;;  %7841 = vst [vmem:[#allocation22_spill] sm:$0xff] %v7039_v43  ;;  %v385_v53 = vld [vmem:[%s6810_s23 + $0x1b8] sm:$0xff]  ;;  %v7058_v56 = vpack.c.bf16 %v381_v51, %v380_v50  ;;  %v387_v59 = vld [vmem:[%s6810_s23 + $0x1c8] sm:$0xff]  ;;  %v390_v2 = vld [vmem:[%s6810_s23 + $0x1e0] sm:$0xff] }
  0x2b   : > { %6362 = vmatprep.subr.bf16.mxu1 %v6755_v0  ;;  %7842 = vst [vmem:[#allocation23_spill] sm:$0xff] %v7046_v45  ;;  %v7062_v57 = vpack.c.bf16 %v385_v53, %v384_v52  ;;  %v391_v3 = vld [vmem:[%s6810_s23 + $0x1e8] sm:$0xff]  ;;  %v7075_v4 = vld [vmem:[%s6838_s27 + $0x60] sm:$0xff]  ;;  %v7077_v6 = vpack.c.bf16 %v387_v59, %v386_v58  ;;  %v388_v14 = vld [vmem:[%s6810_s23 + $0x1d0] sm:$0xff] }
  0x2c   : > { %5669 = vmatmul.mubr.msk.f32.vlgmr.msra.gmra.mrb[4].mxu0 %vm458_vm1, %v6923_v46  ;;  %7843 = vst [vmem:[#allocation24_spill] sm:$0xff] %v7058_v56  ;;  %v7081_v10 = vld [vmem:[%s6838_s27 + $0x68] sm:$0xff]  ;;  %v7084_v11 = vpack.c.bf16 %v391_v3, %v390_v2  ;;  %v389_v15 = vld [vmem:[%s6810_s23 + $0x1d8] sm:$0xff]  ;;  %v392_v24 = vld [vmem:[%s6810_s23 + $0x1f0] sm:$0xff] }
  0x2d   : > { %5680 = vmatmul.mubr.msk.f32.vlgmr.msra.gmra.mrb[4].mxu1 %vm458_vm1, %v6929_v48  ;;  %6358 = vmatpush3.bf16.msra.mxu0 %v6925_v47  ;;  %7844 = vst [vmem:[#allocation25_spill] sm:$0xff] %v7062_v57  ;;  %7845 = vst [vmem:[#allocation26_spill] sm:$0xff] %v7077_v6  ;;  %v393_v25 = vld [vmem:[%s6810_s23 + $0x1f8] sm:$0xff]  ;;  %v7103_v28 = vpack.c.bf16 %v389_v15, %v388_v14  ;;  %v394_v36 = vld [vmem:[%s7093_s30] sm:$0xff] }
  0x2e   : > { %6364 = vmatpush3.bf16.msra.mxu1 %v6932_v49  ;;  %6359 = vmatprep.subr.bf16.mxu0 %v6755_v0  ;;  %7846 = vst [vmem:[#allocation27_spill] sm:$0xff] %v7084_v11  ;;  %v7107_v29 = vpack.c.bf16 %v393_v25, %v392_v24  ;;  %v395_v37 = vld [vmem:[%s7093_s30 + $0x8] sm:$0xff]  ;;  %v398_v38 = vld [vmem:[%s7093_s30 + $0x20] sm:$0xff]  ;;  %v7120_v50 = vld [vmem:[%s6838_s27 + $0x70] sm:$0xff] }
  0x2f   : > { %6365 = vmatprep.subr.bf16.mxu1 %v6755_v0  ;;  %5690 = vmatprep.mubr.msk.f32.mxu0 %vm6756_vm0, %v7781_v1  ;;  %7847 = vst [vmem:[#allocation28_spill] sm:$0xff] %v7103_v28  ;;  %v399_v39 = vld [vmem:[%s7093_s30 + $0x28] sm:$0xff]  ;;  %v7122_v51 = vpack.c.bf16 %v395_v37, %v394_v36  ;;  %v7126_v52 = vld [vmem:[%s6838_s27 + $0x78] sm:$0xff]  ;;  %v396_v58 = vld [vmem:[%s7093_s30 + $0x10] sm:$0xff] }
  0x30   : > { %5701 = vmatprep.mubr.msk.f32.mxu1 %vm6756_vm0, %v7781_v1  ;;  %7848 = vst [vmem:[#allocation29_spill] sm:$0xff] %v7107_v29  ;;  %v7129_v53 = vpack.c.bf16 %v399_v39, %v398_v38  ;;  %v397_v59 = vld [vmem:[%s7093_s30 + $0x18] sm:$0xff]  ;;  %v400_v2 = vld [vmem:[%s7093_s30 + $0x30] sm:$0xff]  ;;  %v402_v24 = vld [vmem:[%s7093_s30 + $0x40] sm:$0xff] }
  0x31   : > { %6361 = vmatpush3.bf16.msra.mxu0 %v6944_v54  ;;  %v401_v3 = vld [vmem:[%s7093_s30 + $0x38] sm:$0xff]  ;;  %v7141_v14 = vpack.c.bf16 %v397_v59, %v396_v58  ;;  %v403_v25 = vld [vmem:[%s7093_s30 + $0x48] sm:$0xff]  ;;  %v406_v36 = vld [vmem:[%s7093_s30 + $0x60] sm:$0xff] }
  0x32   : > { %6367 = vmatpush3.bf16.msra.mxu1 %v6948_v55  ;;  %6368 = vmatprep.subr.bf16.mxu0 %v6755_v0  ;;  %v7145_v15 = vpack.c.bf16 %v401_v3, %v400_v2  ;;  %v407_v37 = vld [vmem:[%s7093_s30 + $0x68] sm:$0xff]  ;;  %v7164_v38 = vld [vmem:[%s7151_s8] sm:$0xff]  ;;  %v7166_v39 = vpack.c.bf16 %v403_v25, %v402_v24  ;;  %v404_v2 = vld [vmem:[%s7093_s30 + $0x50] sm:$0xff] }
  0x33   : > { %6374 = vmatprep.subr.bf16.mxu1 %v6755_v0  ;;  %v7170_v58 = vld [vmem:[%s7151_s8 + $0x8] sm:$0xff]  ;;  %v7173_v59 = vpack.c.bf16 %v407_v37, %v406_v36  ;;  %v405_v3 = vld [vmem:[%s7093_s30 + $0x58] sm:$0xff]  ;;  %v410_v36 = vld [vmem:[%s7093_s30 + $0x80] sm:$0xff] }
  0x34   : > { %5691 = vmatmul.mubr.msk.f32.vlgmr.msra.gmra.mrb[6].mxu0 %vm458_vm1, %v6961_v60  ;;  %v7185_v24 = vpack.c.bf16 %v405_v3, %v404_v2  ;;  %v411_v37 = vld [vmem:[%s7093_s30 + $0x88] sm:$0xff]  ;;  %v7202_v3 = vld [vmem:[%s7151_s8 + $0x10] sm:$0xff]  ;;  %v429_v54 = vld [vmem:[%s7093_s30 + $0x118] sm:$0xff] }
  0x35   : > { %5702 = vmatmul.mubr.msk.f32.vlgmr.msra.gmra.mrb[6].mxu1 %vm458_vm1, %v6967_v62  ;;  %6370 = vmatpush3.bf16.msra.mxu0 %v6963_v61  ;;  %v415_v2 = vld [vmem:[%s7093_s30 + $0xa8] sm:$0xff]  ;;  %7850 = vst [vmem:[#allocation30_spill] sm:$0xff] %v7202_v3  ;;  %v428_v55 = vld [vmem:[%s7093_s30 + $0x110] sm:$0xff]  ;;  %v433_v47 = vld [vmem:[%s7093_s30 + $0x138] sm:$0xff] }
  0x36   : > { %6376 = vmatpush3.bf16.msra.mxu1 %v6970_v63  ;;  %6371 = vmatprep.subr.bf16.mxu0 %v6755_v0  ;;  %v430_v63 = vld [vmem:[%s7093_s30 + $0x120] sm:$0xff]  ;;  %v432_v49 = vld [vmem:[%s7093_s30 + $0x130] sm:$0xff]  ;;  %v441_v40 = vld [vmem:[%s7093_s30 + $0x178] sm:$0xff] }
  0x37   : > { %6377 = vmatprep.subr.bf16.mxu1 %v6755_v0  ;;  %5712 = vmatprep.mubr.msk.f32.mxu0 %vm6756_vm0, %v7781_v1  ;;  %v440_v41 = vld [vmem:[%s7093_s30 + $0x170] sm:$0xff]  ;;  %v445_v33 = vld [vmem:[%s7093_s30 + $0x198] sm:$0xff] }
  0x38   : > { %5723 = vmatprep.mubr.msk.f32.mxu1 %vm6756_vm0, %v7781_v1  ;;  %v444_v35 = vld [vmem:[%s7093_s30 + $0x190] sm:$0xff]  ;;  %v453_v26 = vld [vmem:[%s7093_s30 + $0x1d8] sm:$0xff] }
  0x39   : > { %6373 = vmatpush3.bf16.msra.mxu0 %v6982_v7  ;;  %v425_v7 = vld [vmem:[%s7093_s30 + $0xf8] sm:$0xff]  ;;  %v452_v27 = vld [vmem:[%s7093_s30 + $0x1d0] sm:$0xff] }
  0x3a   : > { %6379 = vmatpush3.bf16.msra.mxu1 %v6986_v8  ;;  %6380 = vmatprep.subr.bf16.mxu0 %v6755_v0  ;;  %v424_v8 = vld [vmem:[%s7093_s30 + $0xf0] sm:$0xff]  ;;  %v457_v19 = vld [vmem:[%s7093_s30 + $0x1f8] sm:$0xff] }
  0x3b   : > { %6386 = vmatprep.subr.bf16.mxu1 %v6755_v0  ;;  %v456_v21 = vld [vmem:[%s7093_s30 + $0x1f0] sm:$0xff] }
  0x3c   : > { %5713 = vmatmul.mubr.msk.f32.vlgmr.msra.gmra.mrb[8].mxu0 %vm458_vm1, %v6999_v16 }
  0x3d   : > { %5724 = vmatmul.mubr.msk.f32.vlgmr.msra.gmra.mrb[8].mxu1 %vm458_vm1, %v7005_v22  ;;  %6382 = vmatpush3.bf16.msra.mxu0 %v7001_v17  ;;  %v421_v17 = vld [vmem:[%s7093_s30 + $0xd8] sm:$0xff] }
  0x3e   : > { %6388 = vmatpush3.bf16.msra.mxu1 %v7008_v23  ;;  %6383 = vmatprep.subr.bf16.mxu0 %v6755_v0  ;;  %v420_v23 = vld [vmem:[%s7093_s30 + $0xd0] sm:$0xff] }
  0x3f   : > { %6389 = vmatprep.subr.bf16.mxu1 %v6755_v0  ;;  %5734 = vmatprep.mubr.msk.f32.mxu0 %vm6756_vm0, %v7781_v1 }
  0x40   : > { %5745 = vmatprep.mubr.msk.f32.mxu1 %vm6756_vm0, %v7781_v1 }
  0x41   : > { %6385 = vmatpush3.bf16.msra.mxu0 %v7020_v30 }
  0x42   : > { %6391 = vmatpush3.bf16.msra.mxu1 %v7024_v31  ;;  %6392 = vmatprep.subr.bf16.mxu0 %v6755_v0  ;;  %v422_v31 = vld [vmem:[%s7093_s30 + $0xe0] sm:$0xff] }
  0x43   : > { %6398 = vmatprep.subr.bf16.mxu1 %v6755_v0 }
  0x44   : > { %5735 = vmatmul.mubr.msk.f32.vlgmr.msra.gmra.mrb[10].mxu0 %vm458_vm1, %v7037_v42 }
  0x45   : > { %5746 = vmatmul.mubr.msk.f32.vlgmr.msra.gmra.mrb[10].mxu1 %vm458_vm1, %v7043_v44  ;;  %6394 = vmatpush3.bf16.msra.mxu0 %v7039_v43  ;;  %v417_v43 = vld [vmem:[%s7093_s30 + $0xb8] sm:$0xff] }
  0x46   : > { %6400 = vmatpush3.bf16.msra.mxu1 %v7046_v45  ;;  %6395 = vmatprep.subr.bf16.mxu0 %v6755_v0  ;;  %v416_v45 = vld [vmem:[%s7093_s30 + $0xb0] sm:$0xff] }
  0x47   : > { %6401 = vmatprep.subr.bf16.mxu1 %v6755_v0  ;;  %5756 = vmatprep.mubr.msk.f32.mxu0 %vm6756_vm0, %v7781_v1 }
  0x48   : > { %5767 = vmatprep.mubr.msk.f32.mxu1 %vm6756_vm0, %v7781_v1 }
  0x49   : > { %6397 = vmatpush3.bf16.msra.mxu0 %v7058_v56  ;;  %v413_v56 = vld [vmem:[%s7093_s30 + $0x98] sm:$0xff] }
  0x4a   : > { %6403 = vmatpush3.bf16.msra.mxu1 %v7062_v57  ;;  %6404 = vmatprep.subr.bf16.mxu0 %v6755_v0  ;;  %v412_v57 = vld [vmem:[%s7093_s30 + $0x90] sm:$0xff] }
  0x4b   : > { %6410 = vmatprep.subr.bf16.mxu1 %v6755_v0 }
  0x4c   : > { %5757 = vmatmul.mubr.msk.f32.vlgmr.msra.gmra.mrb[12].mxu0 %vm458_vm1, %v7075_v4 }
  0x4d   : > { %5768 = vmatmul.mubr.msk.f32.vlgmr.msra.gmra.mrb[12].mxu1 %vm458_vm1, %v7081_v10  ;;  %6406 = vmatpush3.bf16.msra.mxu0 %v7077_v6 }
  0x4e   : > { %6412 = vmatpush3.bf16.msra.mxu1 %v7084_v11  ;;  %6407 = vmatprep.subr.bf16.mxu0 %v6755_v0  ;;  %v414_v11 = vld [vmem:[%s7093_s30 + $0xa0] sm:$0xff] }
  0x4f   : > { %6413 = vmatprep.subr.bf16.mxu1 %v6755_v0  ;;  %5778 = vmatprep.mubr.msk.f32.mxu0 %vm6756_vm0, %v7781_v1  ;;  %v7211_v6 = vpack.c.bf16 %v415_v2, %v414_v11  ;;  %v7223_v11 = vpack.c.bf16 %v413_v56, %v412_v57  ;;  %v419_v2 = vld [vmem:[%s7093_s30 + $0xc8] sm:$0xff]  ;;  %v7240_v57 = vld [vmem:[%s7151_s8 + $0x20] sm:$0xff] }
  0x50   : > { %5789 = vmatprep.mubr.msk.f32.mxu1 %vm6756_vm0, %v7781_v1  ;;  %v423_v56 = vld [vmem:[%s7093_s30 + $0xe8] sm:$0xff]  ;;  %7852 = vst [vmem:[#allocation32_spill] sm:$0xff] %v7240_v57 }
  0x51   : > { %6409 = vmatpush3.bf16.msra.mxu0 %v7103_v28  ;;  %v7849_v28 = vmov 0.0   ;;  %v7249_v30 = vpack.c.bf16 %v423_v56, %v422_v31  ;;  %v7261_v31 = vpack.c.bf16 %v421_v17, %v420_v23  ;;  %v427_v56 = vld [vmem:[%s7093_s30 + $0x108] sm:$0xff]  ;;  %v7278_v23 = vld [vmem:[%s7151_s8 + $0x30] sm:$0xff] }
  0x52   : > { %6415 = vmatpush3.bf16.msra.mxu1 %v7107_v29  ;;  %6416 = vmatprep.subr.bf16.mxu0 %v6755_v0  ;;  %v409_v29 = vld [vmem:[%s7093_s30 + $0x78] sm:$0xff]  ;;  %v431_v17 = vld [vmem:[%s7093_s30 + $0x128] sm:$0xff]  ;;  %7854 = vst [vmem:[#allocation34_spill] sm:$0xff] %v7278_v23 }
  0x53   : > { %6422 = vmatprep.subr.bf16.mxu1 %v6755_v0  ;;  %v7287_v61 = vpack.c.bf16 %v431_v17, %v430_v63  ;;  %v7299_v63 = vpack.c.bf16 %v429_v54, %v428_v55  ;;  %v435_v17 = vld [vmem:[%s7093_s30 + $0x148] sm:$0xff]  ;;  %v7316_v55 = vld [vmem:[%s7151_s8 + $0x40] sm:$0xff] }
  0x54   : > { %5779 = vmatmul.mubr.msk.f32.vlgmr.msra.gmra.mrb[14].mxu0 %vm458_vm1, %v7120_v50  ;;  %v439_v54 = vld [vmem:[%s7093_s30 + $0x168] sm:$0xff]  ;;  %7856 = vst [vmem:[#allocation36_spill] sm:$0xff] %v7316_v55 }
  0x55   : > { %5790 = vmatmul.mubr.msk.f32.vlgmr.msra.gmra.mrb[14].mxu1 %vm458_vm1, %v7126_v52  ;;  %6418 = vmatpush3.bf16.msra.mxu0 %v7122_v51 }
  0x56   : > { %6424 = vmatpush3.bf16.msra.mxu1 %v7129_v53  ;;  %6419 = vmatprep.subr.bf16.mxu0 %v6755_v0 }
  0x57   : > { %6425 = vmatprep.subr.bf16.mxu1 %v6755_v0  ;;  %5800 = vmatprep.mubr.msk.f32.mxu0 %vm6756_vm0, %v7781_v1 }
  0x58   : > { %5811 = vmatprep.mubr.msk.f32.mxu1 %vm6756_vm0, %v7781_v1  ;;  %v408_v1 = vld [vmem:[%s7093_s30 + $0x70] sm:$0xff] }
  0x59   : > { %6421 = vmatpush3.bf16.msra.mxu0 %v7141_v14  ;;  %v7189_v25 = vpack.c.bf16 %v409_v29, %v408_v1  ;;  %v7204_v1 = vpack.c.bf16 %v411_v37, %v410_v36  ;;  %v7208_v29 = vld [vmem:[%s7151_s8 + $0x18] sm:$0xff]  ;;  %v7227_v36 = vpack.c.bf16 %v417_v43, %v416_v45  ;;  %v418_v37 = vld [vmem:[%s7093_s30 + $0xc0] sm:$0xff]  ;;  %v7246_v45 = vld [vmem:[%s7151_s8 + $0x28] sm:$0xff] }
  0x5a   : > { %6427 = vmatpush3.bf16.msra.mxu1 %v7145_v15  ;;  %6428 = vmatprep.subr.bf16.mxu0 %v6755_v0  ;;  %7851 = vst [vmem:[#allocation31_spill] sm:$0xff] %v7208_v29  ;;  %v7242_v43 = vpack.c.bf16 %v419_v2, %v418_v37  ;;  %7853 = vst [vmem:[#allocation33_spill] sm:$0xff] %v7246_v45  ;;  %v7265_v37 = vpack.c.bf16 %v425_v7, %v424_v8  ;;  %v426_v2 = vld [vmem:[%s7093_s30 + $0x100] sm:$0xff]  ;;  %v7284_v8 = vld [vmem:[%s7151_s8 + $0x38] sm:$0xff] }
  0x5b   : > { %6434 = vmatprep.subr.bf16.mxu1 %v6755_v0  ;;  %v7280_v7 = vpack.c.bf16 %v427_v56, %v426_v2  ;;  %7855 = vst [vmem:[#allocation35_spill] sm:$0xff] %v7284_v8  ;;  %v7303_v2 = vpack.c.bf16 %v433_v47, %v432_v49  ;;  %v434_v56 = vld [vmem:[%s7093_s30 + $0x140] sm:$0xff]  ;;  %v7322_v49 = vld [vmem:[%s7151_s8 + $0x48] sm:$0xff] }
  0x5c   : > { %5801 = vmatmul.mubr.msk.f32.vlgmr.msra.gmra.mrb[16].mxu0 %vm458_vm1, %v7164_v38  ;;  %v7318_v47 = vpack.c.bf16 %v435_v17, %v434_v56  ;;  %7857 = vst [vmem:[#allocation37_spill] sm:$0xff] %v7322_v49  ;;  %v7341_v56 = vpack.c.bf16 %v441_v40, %v440_v41  ;;  %v442_v17 = vld [vmem:[%s7093_s30 + $0x180] sm:$0xff]  ;;  %v7360_v41 = vld [vmem:[%s7151_s8 + $0x58] sm:$0xff] }
  0x5d   : > { %5812 = vmatmul.mubr.msk.f32.vlgmr.msra.gmra.mrb[16].mxu1 %vm458_vm1, %v7170_v58  ;;  %6430 = vmatpush3.bf16.msra.mxu0 %v7166_v39  ;;  %7859 = vst [vmem:[#allocation39_spill] sm:$0xff] %v7360_v41 }
  0x5e   : > { %6436 = vmatpush3.bf16.msra.mxu1 %v7173_v59  ;;  %6431 = vmatprep.subr.bf16.mxu0 %v6755_v0 }
  0x5f   : > { %6437 = vmatprep.subr.bf16.mxu1 %v6755_v0  ;;  %5822 = vmatprep.mubr.msk.f32.mxu0 %vm6756_vm0, %v7849_v28 }
  0x60   : > { %5833 = vmatprep.mubr.msk.f32.mxu1 %vm6756_vm0, %v7849_v28 }
  0x61   : > { %6433 = vmatpush3.bf16.msra.mxu0 %v7185_v24 }
  0x62   : > { %6439 = vmatpush3.bf16.msra.mxu1 %v7189_v25  ;;  %6440 = vmatprep.subr.bf16.mxu0 %v6755_v0 }
  0x63   : > { %6446 = vmatprep.subr.bf16.mxu1 %v6755_v0 }
  0x64   : > { %5823 = vmatmul.mubr.msk.f32.vlgmr.msra.gmra.mrb[18].mxu0 %vm458_vm1, %v7202_v3  ;;  %v449_v3 = vld [vmem:[%s7093_s30 + $0x1b8] sm:$0xff] }
  0x65   : > { %5834 = vmatmul.mubr.msk.f32.vlgmr.msra.gmra.mrb[18].mxu1 %vm458_vm1, %v7208_v29  ;;  %6442 = vmatpush3.bf16.msra.mxu0 %v7204_v1  ;;  %v448_v29 = vld [vmem:[%s7093_s30 + $0x1b0] sm:$0xff] }
  0x66   : > { %6448 = vmatpush3.bf16.msra.mxu1 %v7211_v6  ;;  %6443 = vmatprep.subr.bf16.mxu0 %v6755_v0 }
  0x67   : > { %6449 = vmatprep.subr.bf16.mxu1 %v6755_v0  ;;  %5844 = vmatprep.mubr.msk.f32.mxu0 %vm6756_vm0, %v7849_v28 }
  0x68   : > { %5855 = vmatprep.mubr.msk.f32.mxu1 %vm6756_vm0, %v7849_v28 }
  0x69   : > { %6445 = vmatpush3.bf16.msra.mxu0 %v7223_v11 }
  0x6a   : > { %6451 = vmatpush3.bf16.msra.mxu1 %v7227_v36  ;;  %6452 = vmatprep.subr.bf16.mxu0 %v6755_v0 }
  0x6b   : > { %6458 = vmatprep.subr.bf16.mxu1 %v6755_v0 }
  0x6c   : > { %5845 = vmatmul.mubr.msk.f32.vlgmr.msra.gmra.mrb[20].mxu0 %vm458_vm1, %v7240_v57  ;;  %v437_v57 = vld [vmem:[%s7093_s30 + $0x158] sm:$0xff] }
  0x6d   : > { %5856 = vmatmul.mubr.msk.f32.vlgmr.msra.gmra.mrb[20].mxu1 %vm458_vm1, %v7246_v45  ;;  %6454 = vmatpush3.bf16.msra.mxu0 %v7242_v43  ;;  %v436_v45 = vld [vmem:[%s7093_s30 + $0x150] sm:$0xff] }
  0x6e   : > { %6460 = vmatpush3.bf16.msra.mxu1 %v7249_v30  ;;  %6455 = vmatprep.subr.bf16.mxu0 %v6755_v0 }
  0x6f   : > { %6461 = vmatprep.subr.bf16.mxu1 %v6755_v0  ;;  %5866 = vmatprep.mubr.msk.f32.mxu0 %vm6756_vm0, %v7849_v28 }
  0x70   : > { %5877 = vmatprep.mubr.msk.f32.mxu1 %vm6756_vm0, %v7849_v28 }
  0x71   : > { %6457 = vmatpush3.bf16.msra.mxu0 %v7261_v31 }
  0x72   : > { %6463 = vmatpush3.bf16.msra.mxu1 %v7265_v37  ;;  %6464 = vmatprep.subr.bf16.mxu0 %v6755_v0 }
  0x73   : > { %6470 = vmatprep.subr.bf16.mxu1 %v6755_v0 }
  0x74   : > { %5867 = vmatmul.mubr.msk.f32.vlgmr.msra.gmra.mrb[22].mxu0 %vm458_vm1, %v7278_v23 }
  0x75   : > { %5878 = vmatmul.mubr.msk.f32.vlgmr.msra.gmra.mrb[22].mxu1 %vm458_vm1, %v7284_v8  ;;  %6466 = vmatpush3.bf16.msra.mxu0 %v7280_v7  ;;  %v438_v8 = vld [vmem:[%s7093_s30 + $0x160] sm:$0xff] }
  0x76   : > { %6472 = vmatpush3.bf16.msra.mxu1 %v7287_v61  ;;  %6467 = vmatprep.subr.bf16.mxu0 %v6755_v0  ;;  %v7325_v23 = vpack.c.bf16 %v439_v54, %v438_v8  ;;  %v7337_v8 = vpack.c.bf16 %v437_v57, %v436_v45  ;;  %v443_v54 = vld [vmem:[%s7093_s30 + $0x188] sm:$0xff]  ;;  %v7354_v45 = vld [vmem:[%s7151_s8 + $0x50] sm:$0xff] }
  0x77   : > { %6473 = vmatprep.subr.bf16.mxu1 %v6755_v0  ;;  %5888 = vmatprep.mubr.msk.f32.mxu0 %vm6756_vm0, %v7849_v28  ;;  %v447_v57 = vld [vmem:[%s7093_s30 + $0x1a8] sm:$0xff]  ;;  %7858 = vst [vmem:[#allocation38_spill] sm:$0xff] %v7354_v45  ;;  %v7356_v40 = vpack.c.bf16 %v443_v54, %v442_v17  ;;  %v7379_v17 = vpack.c.bf16 %v449_v3, %v448_v29  ;;  %v450_v54 = vld [vmem:[%s7093_s30 + $0x1c0] sm:$0xff] }
  0x78   : > { %5899 = vmatprep.mubr.msk.f32.mxu1 %vm6756_vm0, %v7849_v28  ;;  %v7398_v29 = vld [vmem:[%s7151_s8 + $0x68] sm:$0xff] }
  0x79   : > { %6469 = vmatpush3.bf16.msra.mxu0 %v7299_v63 }
  0x7a   : > { %6475 = vmatpush3.bf16.msra.mxu1 %v7303_v2  ;;  %6476 = vmatprep.subr.bf16.mxu0 %v6755_v0 }
  0x7b   : > { %6482 = vmatprep.subr.bf16.mxu1 %v6755_v0 }
  0x7c   : > { %5889 = vmatmul.mubr.msk.f32.vlgmr.msra.gmra.mrb[24].mxu0 %vm458_vm1, %v7316_v55 }
  0x7d   : > { %5900 = vmatmul.mubr.msk.f32.vlgmr.msra.gmra.mrb[24].mxu1 %vm458_vm1, %v7322_v49  ;;  %6478 = vmatpush3.bf16.msra.mxu0 %v7318_v47  ;;  %v446_v49 = vld [vmem:[%s7093_s30 + $0x1a0] sm:$0xff] }
  0x7e   : > { %6484 = vmatpush3.bf16.msra.mxu1 %v7325_v23  ;;  %6479 = vmatprep.subr.bf16.mxu0 %v6755_v0  ;;  %v7363_v55 = vpack.c.bf16 %v447_v57, %v446_v49  ;;  %v7375_v49 = vpack.c.bf16 %v445_v33, %v444_v35  ;;  %v451_v57 = vld [vmem:[%s7093_s30 + $0x1c8] sm:$0xff]  ;;  %v7392_v35 = vld [vmem:[%s7151_s8 + $0x60] sm:$0xff] }
  0x7f   : > { %6485 = vmatprep.subr.bf16.mxu1 %v6755_v0  ;;  %5910 = vmatprep.mubr.msk.f32.mxu0 %vm6756_vm0, %v7849_v28  ;;  %v455_v33 = vld [vmem:[%s7093_s30 + $0x1e8] sm:$0xff]  ;;  %v7394_v3 = vpack.c.bf16 %v451_v57, %v450_v54  ;;  %v7413_v54 = vpack.c.bf16 %v453_v26, %v452_v27  ;;  %v7426_v57 = vld [vmem:[%s7151_s8 + $0x70] sm:$0xff]  ;;  %v7430_v26 = vld [vmem:[%s7151_s8 + $0x78] sm:$0xff] }
  0x80   : > { %5921 = vmatprep.mubr.msk.f32.mxu1 %vm6756_vm0, %v7849_v28  ;;  %v7868_v27 = vld [vmem:[#allocation8_spill] sm:$0xff] }
  0x81   : > { %6481 = vmatpush3.bf16.msra.mxu0 %v7337_v8 }
  0x82   : > { %6487 = vmatpush3.bf16.msra.mxu1 %v7341_v56  ;;  %6488 = vmatprep.subr.bf16.mxu0 %v6755_v0 }
  0x83   : > { %6494 = vmatprep.subr.bf16.mxu1 %v6755_v0 }
  0x84   : > { %5911 = vmatmul.mubr.msk.f32.vlgmr.msra.gmra.mrb[26].mxu0 %vm458_vm1, %v7354_v45 }
  0x85   : > { %5922 = vmatmul.mubr.msk.f32.vlgmr.msra.gmra.mrb[26].mxu1 %vm458_vm1, %v7360_v41  ;;  %6490 = vmatpush3.bf16.msra.mxu0 %v7356_v40  ;;  %v454_v41 = vld [vmem:[%s7093_s30 + $0x1e0] sm:$0xff] }
  0x86   : > { %6496 = vmatpush3.bf16.msra.mxu1 %v7363_v55  ;;  %6491 = vmatprep.subr.bf16.mxu0 %v6755_v0  ;;  %v7401_v45 = vpack.c.bf16 %v455_v33, %v454_v41  ;;  %v7417_v41 = vpack.c.bf16 %v457_v19, %v456_v21  ;;  %v7865_v19 = vld [vmem:[#allocation31_spill] sm:$0xff] }
  0x87   : > { %6497 = vmatprep.subr.bf16.mxu1 %v6755_v0  ;;  %5932 = vmatprep.mubr.msk.f32.mxu0 %vm6756_vm0, %v7849_v28  ;;  %v7867_v21 = vld [vmem:[#allocation7_spill] sm:$0xff] }
  0x88   : > { %5943 = vmatprep.mubr.msk.f32.mxu1 %vm6756_vm0, %v7849_v28 }
  0x89   : > { %6493 = vmatpush3.bf16.msra.mxu0 %v7375_v49 }
  0x8a   : > { %6499 = vmatpush3.bf16.msra.mxu1 %v7379_v17  ;;  %6500 = vmatprep.subr.bf16.mxu0 %v6755_v0 }
  0x8b   : > { %6506 = vmatprep.subr.bf16.mxu1 %v6755_v0 }
  0x8c   : > { %5933 = vmatmul.mubr.msk.f32.vlgmr.msra.gmra.mrb[28].mxu0 %vm458_vm1, %v7392_v35 }
  0x8d   : > { %5944 = vmatmul.mubr.msk.f32.vlgmr.msra.gmra.mrb[28].mxu1 %vm458_vm1, %v7398_v29  ;;  %6502 = vmatpush3.bf16.msra.mxu0 %v7394_v3 }
  0x8e   : > { %6508 = vmatpush3.bf16.msra.mxu1 %v7401_v45  ;;  %6503 = vmatprep.subr.bf16.mxu0 %v6755_v0 }
  0x8f   : > { %6509 = vmatprep.subr.bf16.mxu1 %v6755_v0  ;;  %5954 = vmatprep.mubr.msk.f32.mxu0 %vm6756_vm0, %v7849_v28 }
  0x90   : > { %5965 = vmatprep.mubr.msk.f32.mxu1 %vm6756_vm0, %v7849_v28 }
  0x91   : > { %6505 = vmatpush3.bf16.msra.mxu0 %v7413_v54 }
  0x92   : > { %6511 = vmatpush3.bf16.msra.mxu1 %v7417_v41  ;;  %6512 = vmatprep.subr.bf16.mxu0 %v6755_v0 }
  0x93   : > { %6518 = vmatprep.subr.bf16.mxu1 %v6755_v0 }
  0x94   : > { %5955 = vmatmul.mubr.msk.f32.vlgmr.msra.gmra.mrb[30].mxu0 %vm458_vm1, %v7426_v57 }
  0x95   : > { %5966 = vmatmul.mubr.msk.f32.vlgmr.msra.gmra.mrb[30].mxu1 %vm458_vm1, %v7430_v26  ;;  %6514 = vmatpush3.bf16.msra.mxu0 %v7122_v51 }
  0x96   : > { %6520 = vmatpush3.bf16.msra.mxu1 %v7129_v53  ;;  %6515 = vmatprep.subr.bf16.mxu0 %v6755_v0 }
  0x97   : > { %6521 = vmatprep.subr.bf16.mxu1 %v6755_v0  ;;  %5976 = vmatprep.mubr.msk.f32.mxu0 %vm6756_vm0, %v7849_v28 }
  0x98   : > { %5987 = vmatprep.mubr.msk.f32.mxu1 %vm6756_vm0, %v7849_v28 }
  0x99   : > { %6517 = vmatpush3.bf16.msra.mxu0 %v7141_v14  ;;  %v7880_v14 = vld [vmem:[#allocation16_spill] sm:$0xff] }
  0x9a   : > { %6523 = vmatpush3.bf16.msra.mxu1 %v7145_v15  ;;  %6524 = vmatprep.subr.bf16.mxu0 %v6755_v0  ;;  %v7881_v15 = vld [vmem:[#allocation17_spill] sm:$0xff] }
  0x9b   : > { %6530 = vmatprep.subr.bf16.mxu1 %v6755_v0 }
  0x9c   : > { %5977 = vmatmul.mubr.msk.f32.vlgmr.msra.gmra.mrb[32].mxu0 %vm458_vm1, %v6847_v18  ;;  %v7864_v18 = vld [vmem:[#allocation30_spill] sm:$0xff] }
  0x9d   : > { %5988 = vmatmul.mubr.msk.f32.vlgmr.msra.gmra.mrb[32].mxu1 %vm458_vm1, %v6853_v20  ;;  %6526 = vmatpush3.bf16.msra.mxu0 %v7166_v39  ;;  %v7866_v20 = vld [vmem:[#allocation6_spill] sm:$0xff]  ;;  %v7883_v39 = vld [vmem:[#allocation37_spill] sm:$0xff] }
  0x9e   : > { %6532 = vmatpush3.bf16.msra.mxu1 %v7173_v59  ;;  %6527 = vmatprep.subr.bf16.mxu0 %v6755_v0  ;;  %v7885_v59 = vld [vmem:[#allocation19_spill] sm:$0xff] }
  0x9f   : > { %6533 = vmatprep.subr.bf16.mxu1 %v6755_v0  ;;  %5998 = vmatprep.mubr.msk.f32.mxu0 %vm6756_vm0, %v7849_v28 }
  0xa0   : > { %6009 = vmatprep.mubr.msk.f32.mxu1 %vm6756_vm0, %v7849_v28 }
  0xa1   : > { %6529 = vmatpush3.bf16.msra.mxu0 %v7185_v24 }
  0xa2   : > { %6535 = vmatpush3.bf16.msra.mxu1 %v7189_v25  ;;  %6536 = vmatprep.subr.bf16.mxu0 %v6755_v0 }
  0xa3   : > { %6542 = vmatprep.subr.bf16.mxu1 %v6755_v0 }
  0xa4   : > { %5999 = vmatmul.mubr.msk.f32.vlgmr.msra.gmra.mrb[34].mxu0 %vm458_vm1, %v6885_v32  ;;  %v7869_v32 = vld [vmem:[#allocation9_spill] sm:$0xff] }
  0xa5   : > { %6010 = vmatmul.mubr.msk.f32.vlgmr.msra.gmra.mrb[34].mxu1 %vm458_vm1, %v6891_v34  ;;  %6538 = vmatpush3.bf16.msra.mxu0 %v7204_v1  ;;  %v7870_v34 = vld [vmem:[#allocation32_spill] sm:$0xff] }
  0xa6   : > { %6544 = vmatpush3.bf16.msra.mxu1 %v7211_v6  ;;  %6539 = vmatprep.subr.bf16.mxu0 %v6755_v0  ;;  %v7878_v6 = vld [vmem:[#allocation14_spill] sm:$0xff] }
  0xa7   : > { %6545 = vmatprep.subr.bf16.mxu1 %v6755_v0  ;;  %6020 = vmatprep.mubr.msk.f32.mxu0 %vm6756_vm0, %v7849_v28 }
  0xa8   : > { %6031 = vmatprep.mubr.msk.f32.mxu1 %vm6756_vm0, %v7849_v28 }
  0xa9   : > { %6541 = vmatpush3.bf16.msra.mxu0 %v7223_v11 }
  0xaa   : > { %6547 = vmatpush3.bf16.msra.mxu1 %v7227_v36  ;;  %6548 = vmatprep.subr.bf16.mxu0 %v6755_v0  ;;  %v7886_v36 = vld [vmem:[#allocation20_spill] sm:$0xff] }
  0xab   : > { %6554 = vmatprep.subr.bf16.mxu1 %v6755_v0 }
  0xac   : > { %6021 = vmatmul.mubr.msk.f32.vlgmr.msra.gmra.mrb[36].mxu0 %vm458_vm1, %v6923_v46  ;;  %v7871_v46 = vld [vmem:[#allocation33_spill] sm:$0xff] }
  0xad   : > { %6032 = vmatmul.mubr.msk.f32.vlgmr.msra.gmra.mrb[36].mxu1 %vm458_vm1, %v6929_v48  ;;  %6550 = vmatpush3.bf16.msra.mxu0 %v7242_v43  ;;  %v7872_v48 = vld [vmem:[#allocation10_spill] sm:$0xff]  ;;  %v7887_v43 = vld [vmem:[#allocation21_spill] sm:$0xff] }
  0xae   : > { %6556 = vmatpush3.bf16.msra.mxu1 %v7249_v30  ;;  %6551 = vmatprep.subr.bf16.mxu0 %v6755_v0  ;;  %v7874_v30 = vld [vmem:[#allocation12_spill] sm:$0xff] }
  0xaf   : > { %6557 = vmatprep.subr.bf16.mxu1 %v6755_v0  ;;  %6042 = vmatprep.mubr.msk.f32.mxu0 %vm6756_vm0, %v7849_v28 }
  0xb0   : > { %6053 = vmatprep.mubr.msk.f32.mxu1 %vm6756_vm0, %v7849_v28 }
  0xb1   : > { %6553 = vmatpush3.bf16.msra.mxu0 %v7261_v31  ;;  %v7888_v31 = vld [vmem:[#allocation38_spill] sm:$0xff] }
  0xb2   : > { %6559 = vmatpush3.bf16.msra.mxu1 %v7265_v37  ;;  %6560 = vmatprep.subr.bf16.mxu0 %v6755_v0  ;;  %v7889_v37 = vld [vmem:[#allocation39_spill] sm:$0xff] }
  0xb3   : > { %6566 = vmatprep.subr.bf16.mxu1 %v6755_v0 }
  0xb4   : > { %6043 = vmatmul.mubr.msk.f32.vlgmr.msra.gmra.mrb[38].mxu0 %vm458_vm1, %v6961_v60  ;;  %v7873_v60 = vld [vmem:[#allocation11_spill] sm:$0xff] }
  0xb5   : > { %6054 = vmatmul.mubr.msk.f32.vlgmr.msra.gmra.mrb[38].mxu1 %vm458_vm1, %v6967_v62  ;;  %6562 = vmatpush3.bf16.msra.mxu0 %v7280_v7  ;;  %v7891_v7 = vld [vmem:[#allocation23_spill] sm:$0xff] }
  0xb6   : > { %6568 = vmatpush3.bf16.msra.mxu1 %v7287_v61  ;;  %6563 = vmatprep.subr.bf16.mxu0 %v6755_v0 }
  0xb7   : > { %6569 = vmatprep.subr.bf16.mxu1 %v6755_v0  ;;  %6064 = vmatprep.mubr.msk.f32.mxu0 %vm6756_vm0, %v7849_v28 }
  0xb8   : > { %6075 = vmatprep.mubr.msk.f32.mxu1 %vm6756_vm0, %v7849_v28 }
  0xb9   : > { %6565 = vmatpush3.bf16.msra.mxu0 %v7299_v63 }
  0xba   : > { %6571 = vmatpush3.bf16.msra.mxu1 %v7303_v2  ;;  %6572 = vmatprep.subr.bf16.mxu0 %v6755_v0 }
  0xbb   : > { %6578 = vmatprep.subr.bf16.mxu1 %v6755_v0 }
  0xbc   : > { %6065 = vmatmul.mubr.msk.f32.vlgmr.msra.gmra.mrb[40].mxu0 %vm458_vm1, %v6999_v16 }
  0xbd   : > { %6076 = vmatmul.mubr.msk.f32.vlgmr.msra.gmra.mrb[40].mxu1 %vm458_vm1, %v7005_v22  ;;  %6574 = vmatpush3.bf16.msra.mxu0 %v7318_v47 }
  0xbe   : > { %6580 = vmatpush3.bf16.msra.mxu1 %v7325_v23  ;;  %6575 = vmatprep.subr.bf16.mxu0 %v6755_v0  ;;  %v7890_v23 = vld [vmem:[#allocation22_spill] sm:$0xff] }
  0xbf   : > { %6581 = vmatprep.subr.bf16.mxu1 %v6755_v0  ;;  %6086 = vmatprep.mubr.msk.f32.mxu0 %vm6756_vm0, %v7849_v28 }
  0xc0   : > { %6097 = vmatprep.mubr.msk.f32.mxu1 %vm6756_vm0, %v7849_v28 }
  0xc1   : > { %6577 = vmatpush3.bf16.msra.mxu0 %v7337_v8  ;;  %v7892_v8 = vld [vmem:[#allocation24_spill] sm:$0xff] }
  0xc2   : > { %6583 = vmatpush3.bf16.msra.mxu1 %v7341_v56  ;;  %6584 = vmatprep.subr.bf16.mxu0 %v6755_v0  ;;  %v7893_v56 = vld [vmem:[#allocation25_spill] sm:$0xff] }
  0xc3   : > { %6590 = vmatprep.subr.bf16.mxu1 %v6755_v0 }
  0xc4   : > { %6087 = vmatmul.mubr.msk.f32.vlgmr.msra.gmra.mrb[42].mxu0 %vm458_vm1, %v7037_v42  ;;  %v7875_v42 = vld [vmem:[#allocation13_spill] sm:$0xff] }
  0xc5   : > { %6098 = vmatmul.mubr.msk.f32.vlgmr.msra.gmra.mrb[42].mxu1 %vm458_vm1, %v7043_v44  ;;  %6586 = vmatpush3.bf16.msra.mxu0 %v7356_v40  ;;  %v7876_v44 = vld [vmem:[#allocation34_spill] sm:$0xff]  ;;  %v7895_v40 = vld [vmem:[#allocation27_spill] sm:$0xff] }
  0xc6   : > { %6592 = vmatpush3.bf16.msra.mxu1 %v7363_v55  ;;  %6587 = vmatprep.subr.bf16.mxu0 %v6755_v0 }
  0xc7   : > { %6593 = vmatprep.subr.bf16.mxu1 %v6755_v0  ;;  %6108 = vmatprep.mubr.msk.f32.mxu0 %vm6756_vm0, %v7849_v28 }
  0xc8   : > { %6119 = vmatprep.mubr.msk.f32.mxu1 %vm6756_vm0, %v7849_v28 }
  0xc9   : > { %6589 = vmatpush3.bf16.msra.mxu0 %v7375_v49 }
  0xca   : > { %6595 = vmatpush3.bf16.msra.mxu1 %v7379_v17  ;;  %6596 = vmatprep.subr.bf16.mxu0 %v6755_v0 }
  0xcb   : > { %6602 = vmatprep.subr.bf16.mxu1 %v6755_v0 }
  0xcc   : > { %6109 = vmatmul.mubr.msk.f32.vlgmr.msra.gmra.mrb[44].mxu0 %vm458_vm1, %v7075_v4  ;;  %v7877_v4 = vld [vmem:[#allocation35_spill] sm:$0xff] }
  0xcd   : > { %6120 = vmatmul.mubr.msk.f32.vlgmr.msra.gmra.mrb[44].mxu1 %vm458_vm1, %v7081_v10  ;;  %6598 = vmatpush3.bf16.msra.mxu0 %v7394_v3  ;;  %v7879_v10 = vld [vmem:[#allocation15_spill] sm:$0xff]  ;;  %v7896_v3 = vld [vmem:[#allocation28_spill] sm:$0xff] }
  0xce   : > { %6604 = vmatpush3.bf16.msra.mxu1 %v7401_v45  ;;  %6599 = vmatprep.subr.bf16.mxu0 %v6755_v0  ;;  %v7894_v45 = vld [vmem:[#allocation26_spill] sm:$0xff] }
  0xcf   : > { %6605 = vmatprep.subr.bf16.mxu1 %v6755_v0  ;;  %6130 = vmatprep.mubr.msk.f32.mxu0 %vm6756_vm0, %v7849_v28 }
  0xd0   : > { %6141 = vmatprep.mubr.msk.f32.mxu1 %vm6756_vm0, %v7849_v28 }
  0xd1   : > { %6601 = vmatpush3.bf16.msra.mxu0 %v7413_v54 }
  0xd2   : > { %6607 = vmatpush3.bf16.msra.mxu1 %v7417_v41  ;;  %6608 = vmatprep.subr.bf16.mxu0 %v6755_v0 }
  0xd3   : > { %6614 = vmatprep.subr.bf16.mxu1 %v6755_v0 }
  0xd4   : > { %6131 = vmatmul.mubr.msk.f32.vlgmr.msra.gmra.mrb[46].mxu0 %vm458_vm1, %v7120_v50 }
  0xd5   : > { %6142 = vmatmul.mubr.msk.f32.vlgmr.msra.gmra.mrb[46].mxu1 %vm458_vm1, %v7126_v52  ;;  %6610 = vmatpush3.bf16.msra.mxu0 %v6815_v5  ;;  %v7860_v5 = vld [vmem:[#allocation2_spill] sm:$0xff] }
  0xd6   : > { %6616 = vmatpush3.bf16.msra.mxu1 %v6823_v9  ;;  %6611 = vmatprep.subr.bf16.mxu0 %v6755_v0  ;;  %v7861_v9 = vld [vmem:[#allocation3_spill] sm:$0xff] }
  0xd7   : > { %6617 = vmatprep.subr.bf16.mxu1 %v6755_v0  ;;  %6152 = vmatprep.mubr.msk.f32.mxu0 %vm6756_vm0, %v7849_v28 }
  0xd8   : > { %6163 = vmatprep.mubr.msk.f32.mxu1 %vm6756_vm0, %v7849_v28 }
  0xd9   : > { %6613 = vmatpush3.bf16.msra.mxu0 %v6828_v12  ;;  %v7862_v12 = vld [vmem:[#allocation4_spill] sm:$0xff] }
  0xda   : > { %6619 = vmatpush3.bf16.msra.mxu1 %v6832_v13  ;;  %6620 = vmatprep.subr.bf16.mxu0 %v6755_v0  ;;  %v7863_v13 = vld [vmem:[#allocation5_spill] sm:$0xff] }
  0xdb   : > { %6626 = vmatprep.subr.bf16.mxu1 %v6755_v0 }
  0xdc   : > { %6153 = vmatmul.mubr.msk.f32.vlgmr.msra.gmra.mrb[32].mxu0 %vm458_vm1, %v7164_v38  ;;  %v7882_v38 = vld [vmem:[#allocation36_spill] sm:$0xff] }
  0xdd   : > { %6164 = vmatmul.mubr.msk.f32.vlgmr.msra.gmra.mrb[32].mxu1 %vm458_vm1, %v7170_v58  ;;  %6622 = vmatpush3.bf16.msra.mxu0 %v7860_v5  ;;  %v7884_v58 = vld [vmem:[#allocation18_spill] sm:$0xff] }
  0xde   : > { %6628 = vmatpush3.bf16.msra.mxu1 %v7861_v9  ;;  %6623 = vmatprep.subr.bf16.mxu0 %v6755_v0 }
  0xdf   : > { %6629 = vmatprep.subr.bf16.mxu1 %v6755_v0  ;;  %6174 = vmatprep.mubr.msk.f32.mxu0 %vm6756_vm0, %v7849_v28 }
  0xe0   : > { %6185 = vmatprep.mubr.msk.f32.mxu1 %vm6756_vm0, %v7849_v28 }
  0xe1   : > { %6625 = vmatpush3.bf16.msra.mxu0 %v7862_v12 }
  0xe2   : > { %6631 = vmatpush3.bf16.msra.mxu1 %v7863_v13  ;;  %6632 = vmatprep.subr.bf16.mxu0 %v6755_v0 }
  0xe3   : > { %6638 = vmatprep.subr.bf16.mxu1 %v6755_v0 }
  0xe4   : > { %6175 = vmatmul.mubr.msk.f32.vlgmr.msra.gmra.mrb[34].mxu0 %vm458_vm1, %v7864_v18 }
  0xe5   : > { %6186 = vmatmul.mubr.msk.f32.vlgmr.msra.gmra.mrb[34].mxu1 %vm458_vm1, %v7865_v19  ;;  %6634 = vmatpush3.bf16.msra.mxu0 %v7866_v20 }
  0xe6   : > { %6640 = vmatpush3.bf16.msra.mxu1 %v7867_v21  ;;  %6635 = vmatprep.subr.bf16.mxu0 %v6755_v0 }
  0xe7   : > { %6641 = vmatprep.subr.bf16.mxu1 %v6755_v0  ;;  %6196 = vmatprep.mubr.msk.f32.mxu0 %vm6756_vm0, %v7849_v28 }
  0xe8   : > { %6207 = vmatprep.mubr.msk.f32.mxu1 %vm6756_vm0, %v7849_v28 }
  0xe9   : > { %6637 = vmatpush3.bf16.msra.mxu0 %v7868_v27 }
  0xea   : > { %6643 = vmatpush3.bf16.msra.mxu1 %v7869_v32  ;;  %6644 = vmatprep.subr.bf16.mxu0 %v6755_v0 }
  0xeb   : > { %6650 = vmatprep.subr.bf16.mxu1 %v6755_v0 }
  0xec   : > { %6197 = vmatmul.mubr.msk.f32.vlgmr.msra.gmra.mrb[36].mxu0 %vm458_vm1, %v7870_v34 }
  0xed   : > { %6208 = vmatmul.mubr.msk.f32.vlgmr.msra.gmra.mrb[36].mxu1 %vm458_vm1, %v7871_v46  ;;  %6646 = vmatpush3.bf16.msra.mxu0 %v7872_v48 }
  0xee   : > { %6652 = vmatpush3.bf16.msra.mxu1 %v7873_v60  ;;  %6647 = vmatprep.subr.bf16.mxu0 %v6755_v0 }
  0xef   : > { %v7617_v61 = vpop.f32.mrb[0].mxu0  ;;  %6653 = vmatprep.subr.bf16.mxu1 %v6755_v0  ;;  %6218 = vmatprep.mubr.msk.f32.mxu0 %vm6756_vm0, %v7849_v28 }
  0xf0   : > { %v7622_v62 = vpop.f32.mrb[0].mxu1  ;;  %v5626_v16 = vpop.f32.mrb[1].mxu0  ;;  %6229 = vmatprep.mubr.msk.f32.mxu1 %vm6756_vm0, %v7849_v28 }
  0xf1   : > { %v5637_v22 = vpop.f32.mrb[1].mxu1  ;;  %6649 = vmatpush3.bf16.msra.mxu0 %v7874_v30 }
  0xf2   : > { %6655 = vmatpush3.bf16.msra.mxu1 %v7875_v42  ;;  %6656 = vmatprep.subr.bf16.mxu0 %v6755_v0 }
  0xf3   : > { %6662 = vmatprep.subr.bf16.mxu1 %v6755_v0 }
  0xf4   : > { %6219 = vmatmul.mubr.msk.f32.vlgmr.msra.gmra.mrb[38].mxu0 %vm458_vm1, %v7876_v44 }
  0xf5   : > { %6230 = vmatmul.mubr.msk.f32.vlgmr.msra.gmra.mrb[38].mxu1 %vm458_vm1, %v7877_v4  ;;  %6658 = vmatpush3.bf16.msra.mxu0 %v7878_v6 }
  0xf6   : > { %6664 = vmatpush3.bf16.msra.mxu1 %v7879_v10  ;;  %6659 = vmatprep.subr.bf16.mxu0 %v6755_v0 }
  0xf7   : > { %v7637_v50 = vpop.f32.mrb[2].mxu0  ;;  %6665 = vmatprep.subr.bf16.mxu1 %v6755_v0  ;;  %6240 = vmatprep.mubr.msk.f32.mxu0 %vm6756_vm0, %v7849_v28 }
  0xf8   : > { %v7642_v51 = vpop.f32.mrb[2].mxu1  ;;  %v5648_v52 = vpop.f32.mrb[3].mxu0  ;;  %6251 = vmatprep.mubr.msk.f32.mxu1 %vm6756_vm0, %v7849_v28 }
  0xf9   : > { %v5659_v53 = vpop.f32.mrb[3].mxu1  ;;  %6661 = vmatpush3.bf16.msra.mxu0 %v7880_v14 }
  0xfa   : > { %6667 = vmatpush3.bf16.msra.mxu1 %v7881_v15  ;;  %6668 = vmatprep.subr.bf16.mxu0 %v6755_v0 }
  0xfb   : > { %6674 = vmatprep.subr.bf16.mxu1 %v6755_v0 }
  0xfc   : > { %6241 = vmatmul.mubr.msk.f32.vlgmr.msra.gmra.mrb[40].mxu0 %vm458_vm1, %v7882_v38 }
  0xfd   : > { %6252 = vmatmul.mubr.msk.f32.vlgmr.msra.gmra.mrb[40].mxu1 %vm458_vm1, %v7883_v39  ;;  %6670 = vmatpush3.bf16.msra.mxu0 %v7884_v58 }
  0xfe   : > { %6676 = vmatpush3.bf16.msra.mxu1 %v7885_v59  ;;  %6671 = vmatprep.subr.bf16.mxu0 %v6755_v0 }
  0xff   : > { %v7657_v24 = vpop.f32.mrb[4].mxu0  ;;  %6677 = vmatprep.subr.bf16.mxu1 %v6755_v0  ;;  %6262 = vmatprep.mubr.msk.f32.mxu0 %vm6756_vm0, %v7849_v28 }
 0x100   : > { %v7662_v25 = vpop.f32.mrb[4].mxu1  ;;  %v5670_v1 = vpop.f32.mrb[5].mxu0  ;;  %6273 = vmatprep.mubr.msk.f32.mxu1 %vm6756_vm0, %v7849_v28 }
 0x101   : > { %v5681_v11 = vpop.f32.mrb[5].mxu1  ;;  %6673 = vmatpush3.bf16.msra.mxu0 %v7886_v36 }
 0x102   : > { %6679 = vmatpush3.bf16.msra.mxu1 %v7887_v43  ;;  %6680 = vmatprep.subr.bf16.mxu0 %v6755_v0 }
 0x103   : > { %6686 = vmatprep.subr.bf16.mxu1 %v6755_v0 }
 0x104   : > { %6263 = vmatmul.mubr.msk.f32.vlgmr.msra.gmra.mrb[42].mxu0 %vm458_vm1, %v7888_v31 }
 0x105   : > { %6274 = vmatmul.mubr.msk.f32.vlgmr.msra.gmra.mrb[42].mxu1 %vm458_vm1, %v7889_v37  ;;  %6682 = vmatpush3.bf16.msra.mxu0 %v7890_v23 }
 0x106   : > { %6688 = vmatpush3.bf16.msra.mxu1 %v7891_v7  ;;  %6683 = vmatprep.subr.bf16.mxu0 %v6755_v0 }
 0x107   : > { %v7677_v63 = vpop.f32.mrb[6].mxu0  ;;  %6689 = vmatprep.subr.bf16.mxu1 %v6755_v0  ;;  %6284 = vmatprep.mubr.msk.f32.mxu0 %vm6756_vm0, %v7849_v28 }
 0x108   : > { %v7682_v2 = vpop.f32.mrb[6].mxu1  ;;  %v5692_v55 = vpop.f32.mrb[7].mxu0  ;;  %6295 = vmatprep.mubr.msk.f32.mxu1 %vm6756_vm0, %v7849_v28 }
 0x109   : > { %v5703_v47 = vpop.f32.mrb[7].mxu1  ;;  %6685 = vmatpush3.bf16.msra.mxu0 %v7892_v8 }
 0x10a   : > { %6691 = vmatpush3.bf16.msra.mxu1 %v7893_v56  ;;  %6692 = vmatprep.subr.bf16.mxu0 %v6755_v0 }
 0x10b   : > { %6698 = vmatprep.subr.bf16.mxu1 %v6755_v0 }
 0x10c   : > { %6285 = vmatmul.mubr.msk.f32.vlgmr.msra.gmra.mrb[44].mxu0 %vm458_vm1, %v7392_v35 }
 0x10d   : > { %6296 = vmatmul.mubr.msk.f32.vlgmr.msra.gmra.mrb[44].mxu1 %vm458_vm1, %v7398_v29  ;;  %6694 = vmatpush3.bf16.msra.mxu0 %v7894_v45  ;;  %v7897_v29 = vld [vmem:[#allocation29_spill] sm:$0xff] }
 0x10e   : > { %6700 = vmatpush3.bf16.msra.mxu1 %v7895_v40  ;;  %6695 = vmatprep.subr.bf16.mxu0 %v6755_v0 }
 0x10f   : > { %v1112_v49 = vpop.f32.mrb[8].mxu0  ;;  %6701 = vmatprep.subr.bf16.mxu1 %v6755_v0  ;;  %6306 = vmatprep.mubr.msk.f32.mxu0 %vm6756_vm0, %v7849_v28 }
 0x110   : > { %v1185_v17 = vpop.f32.mrb[8].mxu1  ;;  %v5714_v33 = vpop.f32.mrb[9].mxu0  ;;  %6317 = vmatprep.mubr.msk.f32.mxu1 %vm6756_vm0, %v7849_v28 }
 0x111   : > { %v5725_v35 = vpop.f32.mrb[9].mxu1  ;;  %6697 = vmatpush3.bf16.msra.mxu0 %v7896_v3 }
 0x112   : > { %6703 = vmatpush3.bf16.msra.mxu1 %v7897_v29 }
 0x114   : > { %6307 = vmatmul.mubr.msk.f32.vlgmr.msra.gmra.mrb[46].mxu0 %vm458_vm1, %v7426_v57 }
 0x115   : > { %6318 = vmatmul.mubr.msk.f32.vlgmr.msra.gmra.mrb[46].mxu1 %vm458_vm1, %v7430_v26 }
 0x117   : > { %v1258_v0 = vpop.f32.mrb[10].mxu0 }
 0x118   : > { %v1331_v54 = vpop.f32.mrb[10].mxu1  ;;  %v5736_v41 = vpop.f32.mrb[11].mxu0 }
 0x119   : > { %v5747_v5 = vpop.f32.mrb[11].mxu1 }
 0x11f   : > { %v7708_v9 = vpop.f32.mrb[12].mxu0 }
 0x120   : > { %v7710_v12 = vpop.f32.mrb[12].mxu1  ;;  %v5758_v28 = vpop.f32.mrb[13].mxu0 }
 0x121   : > { %v5769_v13 = vpop.f32.mrb[13].mxu1 }
 0x127   : > { %v7712_v18 = vpop.f32.mrb[14].mxu0 }
 0x128   : > { %v7714_v19 = vpop.f32.mrb[14].mxu1  ;;  %v5780_v20 = vpop.f32.mrb[15].mxu0 }
 0x129   : > { %v5791_v21 = vpop.f32.mrb[15].mxu1 }
 0x12f   : > { %v1696_v57 = vpop.f32.mrb[16].mxu0 }
 0x130   : > { %v2795_v26 = vsub.f32 %v7617_v61, %v1696_v57  ;;  %v1769_v27 = vpop.f32.mrb[16].mxu1  ;;  %v5802_v32 = vpop.f32.mrb[17].mxu0 }
 0x131   : > { %v2796_v34 = vsub.f32 %v7622_v62, %v1769_v27  ;;  %v5813_v46 = vpop.f32.mrb[17].mxu1 }
 0x132   : > { %2811 = vst [vmem:[%s7720_s11] sm:$0xff] %v2795_v26 }
 0x133   : > { %2812 = vst [vmem:[%s7720_s11 + $0x8] sm:$0xff] %v2796_v34 }
 0x137   : > { %v1842_v48 = vpop.f32.mrb[18].mxu0 }
 0x138   : > { %v2797_v60 = vsub.f32 %v7637_v50, %v1842_v48  ;;  %v1915_v16 = vpop.f32.mrb[18].mxu1  ;;  %v5824_v22 = vpop.f32.mrb[19].mxu0 }
 0x139   : > { %v2798_v30 = vsub.f32 %v7642_v51, %v1915_v16  ;;  %v5835_v42 = vpop.f32.mrb[19].mxu1 }
 0x13a   : > { %2813 = vst [vmem:[%s7720_s11 + $0x10] sm:$0xff] %v2797_v60 }
 0x13b   : > { %2814 = vst [vmem:[%s7720_s11 + $0x18] sm:$0xff] %v2798_v30 }
 0x13f   : > { %v1988_v61 = vpop.f32.mrb[20].mxu0 }
 0x140   : > { %v2799_v62 = vsub.f32 %v7657_v24, %v1988_v61  ;;  %v2061_v44 = vpop.f32.mrb[20].mxu1  ;;  %v5846_v4 = vpop.f32.mrb[21].mxu0 }
 0x141   : > { %v2800_v6 = vsub.f32 %v7662_v25, %v2061_v44  ;;  %v5857_v10 = vpop.f32.mrb[21].mxu1 }
 0x142   : > { %2815 = vst [vmem:[%s7720_s11 + $0x20] sm:$0xff] %v2799_v62 }
 0x143   : > { %2816 = vst [vmem:[%s7720_s11 + $0x28] sm:$0xff] %v2800_v6 }
 0x147   : > { %v2134_v50 = vpop.f32.mrb[22].mxu0 }
 0x148   : > { %v2801_v51 = vsub.f32 %v7677_v63, %v2134_v50  ;;  %v2207_v52 = vpop.f32.mrb[22].mxu1  ;;  %v5868_v53 = vpop.f32.mrb[23].mxu0 }
 0x149   : > { %v2802_v14 = vsub.f32 %v7682_v2, %v2207_v52  ;;  %v5879_v15 = vpop.f32.mrb[23].mxu1 }
 0x14a   : > { %2817 = vst [vmem:[%s7720_s11 + $0x30] sm:$0xff] %v2801_v51 }
 0x14b   : > { %2818 = vst [vmem:[%s7720_s11 + $0x38] sm:$0xff] %v2802_v14 }
 0x14f   : > { %v2280_v38 = vpop.f32.mrb[24].mxu0 }
 0x150   : > { %v2803_v39 = vsub.f32 %v1112_v49, %v2280_v38  ;;  %v2353_v58 = vpop.f32.mrb[24].mxu1  ;;  %v5890_v59 = vpop.f32.mrb[25].mxu0 }
 0x151   : > { %v2804_v24 = vsub.f32 %v1185_v17, %v2353_v58  ;;  %v5901_v25 = vpop.f32.mrb[25].mxu1 }
 0x152   : > { %2819 = vst [vmem:[%s7720_s11 + $0x40] sm:$0xff] %v2803_v39 }
 0x153   : > { %2820 = vst [vmem:[%s7720_s11 + $0x48] sm:$0xff] %v2804_v24 }
 0x157   : > { %v2426_v1 = vpop.f32.mrb[26].mxu0 }
 0x158   : > { %v2805_v11 = vsub.f32 %v1258_v0, %v2426_v1  ;;  %v2499_v36 = vpop.f32.mrb[26].mxu1  ;;  %v5912_v43 = vpop.f32.mrb[27].mxu0 }
 0x159   : > { %v2806_v31 = vsub.f32 %v1331_v54, %v2499_v36  ;;  %v5923_v37 = vpop.f32.mrb[27].mxu1 }
 0x15a   : > { %2821 = vst [vmem:[%s7720_s11 + $0x50] sm:$0xff] %v2805_v11 }
 0x15b   : > { %2822 = vst [vmem:[%s7720_s11 + $0x58] sm:$0xff] %v2806_v31 }
 0x15f   : > { %v2572_v23 = vpop.f32.mrb[28].mxu0 }
 0x160   : > { %v2807_v7 = vsub.f32 %v7708_v9, %v2572_v23  ;;  %v2645_v63 = vpop.f32.mrb[28].mxu1  ;;  %v5934_v2 = vpop.f32.mrb[29].mxu0 }
 0x161   : > { %v2808_v55 = vsub.f32 %v7710_v12, %v2645_v63  ;;  %v5945_v47 = vpop.f32.mrb[29].mxu1 }
 0x162   : > { %2823 = vst [vmem:[%s7720_s11 + $0x60] sm:$0xff] %v2807_v7 }
 0x163   : > { %2824 = vst [vmem:[%s7720_s11 + $0x68] sm:$0xff] %v2808_v55 }
 0x167   : > { %v2718_v8 = vpop.f32.mrb[30].mxu0 }
 0x168   : > { %v2809_v56 = vsub.f32 %v7712_v18, %v2718_v8  ;;  %v2791_v45 = vpop.f32.mrb[30].mxu1  ;;  %v5956_v40 = vpop.f32.mrb[31].mxu0 }
 0x169   : > { %v2810_v49 = vsub.f32 %v7714_v19, %v2791_v45  ;;  %v5967_v17 = vpop.f32.mrb[31].mxu1 }
 0x16a   : > { %2825 = vst [vmem:[%s7720_s11 + $0x70] sm:$0xff] %v2809_v56 }
 0x16b   : > { %2826 = vst [vmem:[%s7720_s11 + $0x78] sm:$0xff] %v2810_v49 }
 0x1af   : > { %v4013_v33 = vpop.f32.mrb[32].mxu0 }
 0x1b0   : > { %5067 = vst [vmem:[%s7754_s14] sm:$0xff] %v4013_v33  ;;  %v4083_v35 = vpop.f32.mrb[32].mxu1  ;;  %v6154_v3 = vpop.f32.mrb[33].mxu0 }
 0x1b1   : > { %5068 = vst [vmem:[%s7754_s14 + $0x8] sm:$0xff] %v4083_v35  ;;  %v6165_v29 = vpop.f32.mrb[33].mxu1 }
 0x1b7   : > { %v4153_v0 = vpop.f32.mrb[34].mxu0 }
 0x1b8   : > { %5069 = vst [vmem:[%s7754_s14 + $0x10] sm:$0xff] %v4153_v0  ;;  %v4223_v54 = vpop.f32.mrb[34].mxu1  ;;  %v6176_v41 = vpop.f32.mrb[35].mxu0 }
 0x1b9   : > { %5070 = vst [vmem:[%s7754_s14 + $0x18] sm:$0xff] %v4223_v54  ;;  %v6187_v5 = vpop.f32.mrb[35].mxu1 }
 0x1bf   : > { %v4293_v9 = vpop.f32.mrb[36].mxu0 }
 0x1c0   : > { %5071 = vst [vmem:[%s7754_s14 + $0x20] sm:$0xff] %v4293_v9  ;;  %v4363_v12 = vpop.f32.mrb[36].mxu1  ;;  %v6198_v28 = vpop.f32.mrb[37].mxu0 }
 0x1c1   : > { %5072 = vst [vmem:[%s7754_s14 + $0x28] sm:$0xff] %v4363_v12  ;;  %v6209_v13 = vpop.f32.mrb[37].mxu1 }
 0x1c7   : > { %v4433_v18 = vpop.f32.mrb[38].mxu0 }
 0x1c8   : > { %5073 = vst [vmem:[%s7754_s14 + $0x30] sm:$0xff] %v4433_v18  ;;  %v4503_v19 = vpop.f32.mrb[38].mxu1  ;;  %v6220_v20 = vpop.f32.mrb[39].mxu0 }
 0x1c9   : > { %5074 = vst [vmem:[%s7754_s14 + $0x38] sm:$0xff] %v4503_v19  ;;  %v6231_v21 = vpop.f32.mrb[39].mxu1 }
 0x1cf   : > { %v4573_v57 = vpop.f32.mrb[40].mxu0 }
 0x1d0   : > { %5075 = vst [vmem:[%s7754_s14 + $0x40] sm:$0xff] %v4573_v57  ;;  %v4643_v26 = vpop.f32.mrb[40].mxu1  ;;  %v6242_v27 = vpop.f32.mrb[41].mxu0 }
 0x1d1   : > { %5076 = vst [vmem:[%s7754_s14 + $0x48] sm:$0xff] %v4643_v26  ;;  %v6253_v32 = vpop.f32.mrb[41].mxu1 }
 0x1d7   : > { %v4713_v34 = vpop.f32.mrb[42].mxu0 }
 0x1d8   : > { %5077 = vst [vmem:[%s7754_s14 + $0x50] sm:$0xff] %v4713_v34  ;;  %v4783_v46 = vpop.f32.mrb[42].mxu1  ;;  %v6264_v48 = vpop.f32.mrb[43].mxu0 }
 0x1d9   : > { %5078 = vst [vmem:[%s7754_s14 + $0x58] sm:$0xff] %v4783_v46  ;;  %v6275_v60 = vpop.f32.mrb[43].mxu1 }
 0x1df   : > { %v4853_v16 = vpop.f32.mrb[44].mxu0 }
 0x1e0   : > { %5079 = vst [vmem:[%s7754_s14 + $0x60] sm:$0xff] %v4853_v16  ;;  %v4923_v22 = vpop.f32.mrb[44].mxu1  ;;  %v6286_v30 = vpop.f32.mrb[45].mxu0 }
 0x1e1   : > { %5080 = vst [vmem:[%s7754_s14 + $0x68] sm:$0xff] %v4923_v22  ;;  %v6297_v42 = vpop.f32.mrb[45].mxu1 }
 0x1e7   : > { %v4993_v61 = vpop.f32.mrb[46].mxu0 }
 0x1e8   : > { %5081 = vst [vmem:[%s7754_s14 + $0x70] sm:$0xff] %v4993_v61  ;;  %v5063_v62 = vpop.f32.mrb[46].mxu1  ;;  %v6308_v44 = vpop.f32.mrb[47].mxu0 }
 0x1e9   : > { %5082 = vst [vmem:[%s7754_s14 + $0x78] sm:$0xff] %v5063_v62  ;;  %v6319_v4 = vpop.f32.mrb[47].mxu1 }
 0x1ea PF: > { %s16_s18 = sadd.s32 1, %s6753_s18  }
 0x1eb   : > { %p13_p4 = scmp.ge.s32.totalorder %s16_s18, 4  }
 0x1ed   :  { %15 = sbr.rel (!%p13_p4) target bundleno = 1 (0x1), region = 87 }

// kernel: reverse.5
= control target key start
LH: loop header
LB: loop body
LE: loop exit
PB: predicated region body
PF: predicated region fallthrough
CT: control target
= control target key end

     0   :  { %s1256_s0 = inlined_call_operand.vmem [shape: f32[2,64,28,13], index: 0, kind: input, shape index: {}]   ;;  %s1257_s1 = inlined_call_operand.vmem [shape: f32[2,64,28,13], index: 1, kind: output, shape index: {}]  }
   0x1   :  { %v416_v0 = vld [vmem:[%s1256_s0 + $0x180] sm:$0xff]  ;;  %v466_v26 = vld [vmem:[%s1256_s0 + $0x188] sm:$0xff]  ;;  %v518_v52 = vld [vmem:[%s1256_s0 + $0x190] sm:$0xff] }
   0x2   :  { %v417_v1 = vld [vmem:[%s1256_s0 + $0x320] sm:$0xff]  ;;  %4 = vst [vmem:[%s1257_s1] sm:$0xff] %v416_v0  ;;  %467 = vst [vmem:[%s1257_s1 + $0x8] sm:$0xff] %v466_v26  ;;  %v468_v27 = vld [vmem:[%s1256_s0 + $0x328] sm:$0xff] }
   0x3   :  { %v419_v2 = vld [vmem:[%s1256_s0 + $0x160] sm:$0xff]  ;;  %418 = vst [vmem:[%s1257_s1 + $0x1a0] sm:$0xff] %v417_v1  ;;  %v470_v28 = vld [vmem:[%s1256_s0 + $0x168] sm:$0xff]  ;;  %469 = vst [vmem:[%s1257_s1 + $0x1a8] sm:$0xff] %v468_v27 }
   0x4   :  { %420 = vst [vmem:[%s1257_s1 + $0x20] sm:$0xff] %v419_v2  ;;  %v421_v3 = vld [vmem:[%s1256_s0 + $0x300] sm:$0xff]  ;;  %v472_v29 = vld [vmem:[%s1256_s0 + $0x308] sm:$0xff]  ;;  %471 = vst [vmem:[%s1257_s1 + $0x28] sm:$0xff] %v470_v28 }
   0x5   :  { %v423_v4 = vld [vmem:[%s1256_s0 + $0x140] sm:$0xff]  ;;  %422 = vst [vmem:[%s1257_s1 + $0x1c0] sm:$0xff] %v421_v3  ;;  %473 = vst [vmem:[%s1257_s1 + $0x1c8] sm:$0xff] %v472_v29  ;;  %v474_v30 = vld [vmem:[%s1256_s0 + $0x148] sm:$0xff] }
   0x6   :  { %v425_v5 = vld [vmem:[%s1256_s0 + $0x2e0] sm:$0xff]  ;;  %424 = vst [vmem:[%s1257_s1 + $0x40] sm:$0xff] %v423_v4  ;;  %v476_v31 = vld [vmem:[%s1256_s0 + $0x2e8] sm:$0xff]  ;;  %475 = vst [vmem:[%s1257_s1 + $0x48] sm:$0xff] %v474_v30 }
   0x7   :  { %426 = vst [vmem:[%s1257_s1 + $0x1e0] sm:$0xff] %v425_v5  ;;  %v427_v6 = vld [vmem:[%s1256_s0 + $0x120] sm:$0xff]  ;;  %v478_v32 = vld [vmem:[%s1256_s0 + $0x128] sm:$0xff]  ;;  %477 = vst [vmem:[%s1257_s1 + $0x1e8] sm:$0xff] %v476_v31 }
   0x8   :  { %v429_v7 = vld [vmem:[%s1256_s0 + $0x2c0] sm:$0xff]  ;;  %428 = vst [vmem:[%s1257_s1 + $0x60] sm:$0xff] %v427_v6  ;;  %479 = vst [vmem:[%s1257_s1 + $0x68] sm:$0xff] %v478_v32  ;;  %v480_v33 = vld [vmem:[%s1256_s0 + $0x2c8] sm:$0xff] }
   0x9   :  { %v431_v8 = vld [vmem:[%s1256_s0 + $0x100] sm:$0xff]  ;;  %430 = vst [vmem:[%s1257_s1 + $0x200] sm:$0xff] %v429_v7  ;;  %v482_v34 = vld [vmem:[%s1256_s0 + $0x108] sm:$0xff]  ;;  %481 = vst [vmem:[%s1257_s1 + $0x208] sm:$0xff] %v480_v33 }
   0xa   :  { %432 = vst [vmem:[%s1257_s1 + $0x80] sm:$0xff] %v431_v8  ;;  %v433_v9 = vld [vmem:[%s1256_s0 + $0x2a0] sm:$0xff]  ;;  %v484_v35 = vld [vmem:[%s1256_s0 + $0x2a8] sm:$0xff]  ;;  %483 = vst [vmem:[%s1257_s1 + $0x88] sm:$0xff] %v482_v34 }
   0xb   :  { %v435_v10 = vld [vmem:[%s1256_s0 + $0xe0] sm:$0xff]  ;;  %434 = vst [vmem:[%s1257_s1 + $0x220] sm:$0xff] %v433_v9  ;;  %485 = vst [vmem:[%s1257_s1 + $0x228] sm:$0xff] %v484_v35  ;;  %v486_v36 = vld [vmem:[%s1256_s0 + $0xe8] sm:$0xff] }
   0xc   :  { %v437_v11 = vld [vmem:[%s1256_s0 + $0x280] sm:$0xff]  ;;  %436 = vst [vmem:[%s1257_s1 + $0xa0] sm:$0xff] %v435_v10  ;;  %v488_v37 = vld [vmem:[%s1256_s0 + $0x288] sm:$0xff]  ;;  %487 = vst [vmem:[%s1257_s1 + $0xa8] sm:$0xff] %v486_v36 }
   0xd   :  { %438 = vst [vmem:[%s1257_s1 + $0x240] sm:$0xff] %v437_v11  ;;  %v439_v12 = vld [vmem:[%s1256_s0 + $0xc0] sm:$0xff]  ;;  %v490_v38 = vld [vmem:[%s1256_s0 + $0xc8] sm:$0xff]  ;;  %489 = vst [vmem:[%s1257_s1 + $0x248] sm:$0xff] %v488_v37 }
   0xe   :  { %v441_v13 = vld [vmem:[%s1256_s0 + $0x260] sm:$0xff]  ;;  %440 = vst [vmem:[%s1257_s1 + $0xc0] sm:$0xff] %v439_v12  ;;  %491 = vst [vmem:[%s1257_s1 + $0xc8] sm:$0xff] %v490_v38  ;;  %v492_v39 = vld [vmem:[%s1256_s0 + $0x268] sm:$0xff] }
   0xf   :  { %v443_v14 = vld [vmem:[%s1256_s0 + $0xa0] sm:$0xff]  ;;  %442 = vst [vmem:[%s1257_s1 + $0x260] sm:$0xff] %v441_v13  ;;  %v494_v40 = vld [vmem:[%s1256_s0 + $0xa8] sm:$0xff]  ;;  %493 = vst [vmem:[%s1257_s1 + $0x268] sm:$0xff] %v492_v39 }
  0x10   :  { %444 = vst [vmem:[%s1257_s1 + $0xe0] sm:$0xff] %v443_v14  ;;  %v445_v15 = vld [vmem:[%s1256_s0 + $0x240] sm:$0xff]  ;;  %v496_v41 = vld [vmem:[%s1256_s0 + $0x248] sm:$0xff]  ;;  %495 = vst [vmem:[%s1257_s1 + $0xe8] sm:$0xff] %v494_v40 }
  0x11   :  { %v447_v16 = vld [vmem:[%s1256_s0 + $0x80] sm:$0xff]  ;;  %446 = vst [vmem:[%s1257_s1 + $0x280] sm:$0xff] %v445_v15  ;;  %497 = vst [vmem:[%s1257_s1 + $0x288] sm:$0xff] %v496_v41  ;;  %v498_v42 = vld [vmem:[%s1256_s0 + $0x88] sm:$0xff] }
  0x12   :  { %v449_v17 = vld [vmem:[%s1256_s0 + $0x220] sm:$0xff]  ;;  %448 = vst [vmem:[%s1257_s1 + $0x100] sm:$0xff] %v447_v16  ;;  %v500_v43 = vld [vmem:[%s1256_s0 + $0x228] sm:$0xff]  ;;  %499 = vst [vmem:[%s1257_s1 + $0x108] sm:$0xff] %v498_v42 }
  0x13   :  { %450 = vst [vmem:[%s1257_s1 + $0x2a0] sm:$0xff] %v449_v17  ;;  %v451_v18 = vld [vmem:[%s1256_s0 + $0x60] sm:$0xff]  ;;  %v502_v44 = vld [vmem:[%s1256_s0 + $0x68] sm:$0xff]  ;;  %501 = vst [vmem:[%s1257_s1 + $0x2a8] sm:$0xff] %v500_v43 }
  0x14   :  { %v453_v19 = vld [vmem:[%s1256_s0 + $0x200] sm:$0xff]  ;;  %452 = vst [vmem:[%s1257_s1 + $0x120] sm:$0xff] %v451_v18  ;;  %503 = vst [vmem:[%s1257_s1 + $0x128] sm:$0xff] %v502_v44  ;;  %v504_v45 = vld [vmem:[%s1256_s0 + $0x208] sm:$0xff] }
  0x15   :  { %v455_v20 = vld [vmem:[%s1256_s0 + $0x40] sm:$0xff]  ;;  %454 = vst [vmem:[%s1257_s1 + $0x2c0] sm:$0xff] %v453_v19  ;;  %v506_v46 = vld [vmem:[%s1256_s0 + $0x48] sm:$0xff]  ;;  %505 = vst [vmem:[%s1257_s1 + $0x2c8] sm:$0xff] %v504_v45 }
  0x16   :  { %456 = vst [vmem:[%s1257_s1 + $0x140] sm:$0xff] %v455_v20  ;;  %v457_v21 = vld [vmem:[%s1256_s0 + $0x1e0] sm:$0xff]  ;;  %v508_v47 = vld [vmem:[%s1256_s0 + $0x1e8] sm:$0xff]  ;;  %507 = vst [vmem:[%s1257_s1 + $0x148] sm:$0xff] %v506_v46 }
  0x17   :  { %v459_v22 = vld [vmem:[%s1256_s0 + $0x20] sm:$0xff]  ;;  %458 = vst [vmem:[%s1257_s1 + $0x2e0] sm:$0xff] %v457_v21  ;;  %509 = vst [vmem:[%s1257_s1 + $0x2e8] sm:$0xff] %v508_v47  ;;  %v510_v48 = vld [vmem:[%s1256_s0 + $0x28] sm:$0xff] }
  0x18   :  { %v461_v23 = vld [vmem:[%s1256_s0 + $0x1c0] sm:$0xff]  ;;  %460 = vst [vmem:[%s1257_s1 + $0x160] sm:$0xff] %v459_v22  ;;  %v512_v49 = vld [vmem:[%s1256_s0 + $0x1c8] sm:$0xff]  ;;  %511 = vst [vmem:[%s1257_s1 + $0x168] sm:$0xff] %v510_v48 }
  0x19   :  { %462 = vst [vmem:[%s1257_s1 + $0x300] sm:$0xff] %v461_v23  ;;  %v97_v24 = vld [vmem:[%s1256_s0] sm:$0xff]  ;;  %v514_v50 = vld [vmem:[%s1256_s0 + $0x8] sm:$0xff]  ;;  %513 = vst [vmem:[%s1257_s1 + $0x308] sm:$0xff] %v512_v49 }
  0x1a   :  { %v464_v25 = vld [vmem:[%s1256_s0 + $0x1a0] sm:$0xff]  ;;  %463 = vst [vmem:[%s1257_s1 + $0x180] sm:$0xff] %v97_v24  ;;  %515 = vst [vmem:[%s1257_s1 + $0x188] sm:$0xff] %v514_v50  ;;  %v516_v51 = vld [vmem:[%s1256_s0 + $0x1a8] sm:$0xff] }
  0x1b   :  { %465 = vst [vmem:[%s1257_s1 + $0x320] sm:$0xff] %v464_v25  ;;  %v520_v53 = vld [vmem:[%s1256_s0 + $0x330] sm:$0xff]  ;;  %517 = vst [vmem:[%s1257_s1 + $0x328] sm:$0xff] %v516_v51  ;;  %v570_v14 = vld [vmem:[%s1256_s0 + $0x198] sm:$0xff] }
  0x1c   :  { %519 = vst [vmem:[%s1257_s1 + $0x10] sm:$0xff] %v518_v52  ;;  %521 = vst [vmem:[%s1257_s1 + $0x1b0] sm:$0xff] %v520_v53  ;;  %v522_v54 = vld [vmem:[%s1256_s0 + $0x170] sm:$0xff]  ;;  %v572_v15 = vld [vmem:[%s1256_s0 + $0x338] sm:$0xff] }
  0x1d   :  { %v524_v55 = vld [vmem:[%s1256_s0 + $0x310] sm:$0xff]  ;;  %523 = vst [vmem:[%s1257_s1 + $0x30] sm:$0xff] %v522_v54  ;;  %v574_v16 = vld [vmem:[%s1256_s0 + $0x178] sm:$0xff]  ;;  %571 = vst [vmem:[%s1257_s1 + $0x18] sm:$0xff] %v570_v14 }
  0x1e   :  { %v526_v56 = vld [vmem:[%s1256_s0 + $0x150] sm:$0xff]  ;;  %525 = vst [vmem:[%s1257_s1 + $0x1d0] sm:$0xff] %v524_v55  ;;  %573 = vst [vmem:[%s1257_s1 + $0x1b8] sm:$0xff] %v572_v15  ;;  %v576_v17 = vld [vmem:[%s1256_s0 + $0x318] sm:$0xff] }
  0x1f   :  { %527 = vst [vmem:[%s1257_s1 + $0x50] sm:$0xff] %v526_v56  ;;  %v528_v57 = vld [vmem:[%s1256_s0 + $0x2f0] sm:$0xff]  ;;  %575 = vst [vmem:[%s1257_s1 + $0x38] sm:$0xff] %v574_v16  ;;  %v578_v18 = vld [vmem:[%s1256_s0 + $0x158] sm:$0xff] }
  0x20   :  { %v530_v58 = vld [vmem:[%s1256_s0 + $0x130] sm:$0xff]  ;;  %529 = vst [vmem:[%s1257_s1 + $0x1f0] sm:$0xff] %v528_v57  ;;  %v580_v19 = vld [vmem:[%s1256_s0 + $0x2f8] sm:$0xff]  ;;  %577 = vst [vmem:[%s1257_s1 + $0x1d8] sm:$0xff] %v576_v17 }
  0x21   :  { %v532_v59 = vld [vmem:[%s1256_s0 + $0x2d0] sm:$0xff]  ;;  %531 = vst [vmem:[%s1257_s1 + $0x70] sm:$0xff] %v530_v58  ;;  %579 = vst [vmem:[%s1257_s1 + $0x58] sm:$0xff] %v578_v18  ;;  %v582_v20 = vld [vmem:[%s1256_s0 + $0x138] sm:$0xff] }
  0x22   :  { %533 = vst [vmem:[%s1257_s1 + $0x210] sm:$0xff] %v532_v59  ;;  %v534_v60 = vld [vmem:[%s1256_s0 + $0x110] sm:$0xff]  ;;  %581 = vst [vmem:[%s1257_s1 + $0x1f8] sm:$0xff] %v580_v19  ;;  %v584_v21 = vld [vmem:[%s1256_s0 + $0x2d8] sm:$0xff] }
  0x23   :  { %v536_v61 = vld [vmem:[%s1256_s0 + $0x2b0] sm:$0xff]  ;;  %535 = vst [vmem:[%s1257_s1 + $0x90] sm:$0xff] %v534_v60  ;;  %v586_v22 = vld [vmem:[%s1256_s0 + $0x118] sm:$0xff]  ;;  %583 = vst [vmem:[%s1257_s1 + $0x78] sm:$0xff] %v582_v20 }
  0x24   :  { %v538_v62 = vld [vmem:[%s1256_s0 + $0xf0] sm:$0xff]  ;;  %537 = vst [vmem:[%s1257_s1 + $0x230] sm:$0xff] %v536_v61  ;;  %585 = vst [vmem:[%s1257_s1 + $0x218] sm:$0xff] %v584_v21  ;;  %v588_v23 = vld [vmem:[%s1256_s0 + $0x2b8] sm:$0xff] }
  0x25   :  { %539 = vst [vmem:[%s1257_s1 + $0xb0] sm:$0xff] %v538_v62  ;;  %v540_v63 = vld [vmem:[%s1256_s0 + $0x290] sm:$0xff]  ;;  %587 = vst [vmem:[%s1257_s1 + $0x98] sm:$0xff] %v586_v22  ;;  %v590_v24 = vld [vmem:[%s1256_s0 + $0xf8] sm:$0xff] }
  0x26   :  { %v542_v0 = vld [vmem:[%s1256_s0 + $0xd0] sm:$0xff]  ;;  %541 = vst [vmem:[%s1257_s1 + $0x250] sm:$0xff] %v540_v63  ;;  %v592_v25 = vld [vmem:[%s1256_s0 + $0x298] sm:$0xff]  ;;  %589 = vst [vmem:[%s1257_s1 + $0x238] sm:$0xff] %v588_v23 }
  0x27   :  { %v544_v1 = vld [vmem:[%s1256_s0 + $0x270] sm:$0xff]  ;;  %543 = vst [vmem:[%s1257_s1 + $0xd0] sm:$0xff] %v542_v0  ;;  %591 = vst [vmem:[%s1257_s1 + $0xb8] sm:$0xff] %v590_v24  ;;  %v594_v26 = vld [vmem:[%s1256_s0 + $0xd8] sm:$0xff] }
  0x28   :  { %545 = vst [vmem:[%s1257_s1 + $0x270] sm:$0xff] %v544_v1  ;;  %v546_v2 = vld [vmem:[%s1256_s0 + $0xb0] sm:$0xff]  ;;  %593 = vst [vmem:[%s1257_s1 + $0x258] sm:$0xff] %v592_v25  ;;  %v596_v27 = vld [vmem:[%s1256_s0 + $0x278] sm:$0xff] }
  0x29   :  { %v548_v3 = vld [vmem:[%s1256_s0 + $0x250] sm:$0xff]  ;;  %547 = vst [vmem:[%s1257_s1 + $0xf0] sm:$0xff] %v546_v2  ;;  %v598_v28 = vld [vmem:[%s1256_s0 + $0xb8] sm:$0xff]  ;;  %595 = vst [vmem:[%s1257_s1 + $0xd8] sm:$0xff] %v594_v26 }
  0x2a   :  { %v550_v4 = vld [vmem:[%s1256_s0 + $0x90] sm:$0xff]  ;;  %549 = vst [vmem:[%s1257_s1 + $0x290] sm:$0xff] %v548_v3  ;;  %597 = vst [vmem:[%s1257_s1 + $0x278] sm:$0xff] %v596_v27  ;;  %v600_v29 = vld [vmem:[%s1256_s0 + $0x258] sm:$0xff] }
  0x2b   :  { %551 = vst [vmem:[%s1257_s1 + $0x110] sm:$0xff] %v550_v4  ;;  %v552_v5 = vld [vmem:[%s1256_s0 + $0x230] sm:$0xff]  ;;  %599 = vst [vmem:[%s1257_s1 + $0xf8] sm:$0xff] %v598_v28  ;;  %v602_v30 = vld [vmem:[%s1256_s0 + $0x98] sm:$0xff] }
  0x2c   :  { %v554_v6 = vld [vmem:[%s1256_s0 + $0x70] sm:$0xff]  ;;  %553 = vst [vmem:[%s1257_s1 + $0x2b0] sm:$0xff] %v552_v5  ;;  %v604_v31 = vld [vmem:[%s1256_s0 + $0x238] sm:$0xff]  ;;  %601 = vst [vmem:[%s1257_s1 + $0x298] sm:$0xff] %v600_v29 }
  0x2d   :  { %v556_v7 = vld [vmem:[%s1256_s0 + $0x210] sm:$0xff]  ;;  %555 = vst [vmem:[%s1257_s1 + $0x130] sm:$0xff] %v554_v6  ;;  %603 = vst [vmem:[%s1257_s1 + $0x118] sm:$0xff] %v602_v30  ;;  %v606_v32 = vld [vmem:[%s1256_s0 + $0x78] sm:$0xff] }
  0x2e   :  { %557 = vst [vmem:[%s1257_s1 + $0x2d0] sm:$0xff] %v556_v7  ;;  %v558_v8 = vld [vmem:[%s1256_s0 + $0x50] sm:$0xff]  ;;  %605 = vst [vmem:[%s1257_s1 + $0x2b8] sm:$0xff] %v604_v31  ;;  %v608_v33 = vld [vmem:[%s1256_s0 + $0x218] sm:$0xff] }
  0x2f   :  { %v560_v9 = vld [vmem:[%s1256_s0 + $0x1f0] sm:$0xff]  ;;  %559 = vst [vmem:[%s1257_s1 + $0x150] sm:$0xff] %v558_v8  ;;  %v610_v34 = vld [vmem:[%s1256_s0 + $0x58] sm:$0xff]  ;;  %607 = vst [vmem:[%s1257_s1 + $0x138] sm:$0xff] %v606_v32 }
  0x30   :  { %v562_v10 = vld [vmem:[%s1256_s0 + $0x30] sm:$0xff]  ;;  %561 = vst [vmem:[%s1257_s1 + $0x2f0] sm:$0xff] %v560_v9  ;;  %609 = vst [vmem:[%s1257_s1 + $0x2d8] sm:$0xff] %v608_v33  ;;  %v612_v35 = vld [vmem:[%s1256_s0 + $0x1f8] sm:$0xff] }
  0x31   :  { %563 = vst [vmem:[%s1257_s1 + $0x170] sm:$0xff] %v562_v10  ;;  %v564_v11 = vld [vmem:[%s1256_s0 + $0x1d0] sm:$0xff]  ;;  %611 = vst [vmem:[%s1257_s1 + $0x158] sm:$0xff] %v610_v34  ;;  %v614_v36 = vld [vmem:[%s1256_s0 + $0x38] sm:$0xff] }
  0x32   :  { %v566_v12 = vld [vmem:[%s1256_s0 + $0x10] sm:$0xff]  ;;  %565 = vst [vmem:[%s1257_s1 + $0x310] sm:$0xff] %v564_v11  ;;  %v616_v37 = vld [vmem:[%s1256_s0 + $0x1d8] sm:$0xff]  ;;  %613 = vst [vmem:[%s1257_s1 + $0x2f8] sm:$0xff] %v612_v35 }
  0x33   :  { %v568_v13 = vld [vmem:[%s1256_s0 + $0x1b0] sm:$0xff]  ;;  %567 = vst [vmem:[%s1257_s1 + $0x190] sm:$0xff] %v566_v12  ;;  %615 = vst [vmem:[%s1257_s1 + $0x178] sm:$0xff] %v614_v36  ;;  %v618_v38 = vld [vmem:[%s1256_s0 + $0x18] sm:$0xff] }
  0x34   :  { %569 = vst [vmem:[%s1257_s1 + $0x330] sm:$0xff] %v568_v13  ;;  %617 = vst [vmem:[%s1257_s1 + $0x318] sm:$0xff] %v616_v37  ;;  %v620_v39 = vld [vmem:[%s1256_s0 + $0x1b8] sm:$0xff] }
  0x35   :  { %619 = vst [vmem:[%s1257_s1 + $0x198] sm:$0xff] %v618_v38  ;;  %621 = vst [vmem:[%s1257_s1 + $0x338] sm:$0xff] %v620_v39 }

// kernel: _lambda_.7
= control target key start
LH: loop header
LB: loop body
LE: loop exit
PB: predicated region body
PF: predicated region fallthrough
CT: control target
= control target key end

     0   :  { %15 = vsyncpa [#allocation4], 0  ;;  %s2299_s13 = smov 0   ;;  %s2729_s0 = inlined_call_operand.vmem [shape: f32[2,12544], index: 0, kind: input, shape index: {}]   ;;  %s2730_s1 = inlined_call_operand.vmem [shape: f32[2,12544], index: 1, kind: input, shape index: {}]   ;;  %s2731_s2 = inlined_call_operand.vmem [shape: f32[2,12544], index: 2, kind: input, shape index: {}]   ;;  %s2732_s3 = inlined_call_operand.vmem [shape: f32[2,12544], index: 3, kind: input, shape index: {}]   ;;  %s2733_s4 = inlined_call_operand.vmem [shape: f32[12544,120], index: 4, kind: input, shape index: {}]   ;;  %s2734_s5 = inlined_call_operand.vmem [shape: f32[1,120], index: 5, kind: input, shape index: {}]   ;;  %s2735_s6 = inlined_call_operand.vmem [shape: f32[120,84], index: 6, kind: input, shape index: {}]   ;;  %s2736_s7 = inlined_call_operand.vmem [shape: f32[1,84], index: 7, kind: input, shape index: {}]   ;;  %s2737_s8 = inlined_call_operand.vmem [shape: f32[84,10], index: 8, kind: input, shape index: {}]   ;;  %s2738_s9 = inlined_call_operand.vmem [shape: f32[1,10], index: 9, kind: input, shape index: {}]   ;;  %s2739_s10 = inlined_call_operand.hbm [shape: f32[2,10], index: 10, kind: output, shape index: {}]  }
   0x1 LB: > { %s2305_s14 = sadd.s32 4294967295, %s2236_s13   ;;  %p1571_p0 = scmp.ge.s32.totalorder %s2236_s13, 1  ;;  %s2236_s13 = sphi %s2299_s13, %s21_s13  }
   0x2   : > { %p353_p1 = scmp.lt.s32.totalorder %s2236_s13, 8 }
   0x4   : > { %p354_p2 = pnand %p1571_p0, %p353_p1 }
   0x5   : > { %s406_s15 = smul.u32 (!%p354_p2), 14, %s2305_s14  ;;  %p1577_p5 = scmp.ne.s32.totalorder (!%p354_p2), %s2305_s14, 0 }
   0x6   : > { %357 = sbr.rel (%p354_p2) target bundleno = 843 (0x34b), region = 60 }
   0x7   : > { %s430_s16 = smul.u32 (!%p354_p2), 224, %s2305_s14  ;;  %p407_p3 = scmp.lt.s32.totalorder (!%p354_p2), %s406_s15, 97 }
   0x9   : > { %p431_p4 = scmp.lt.s32.totalorder (!%p354_p2), %s430_s16, 1567 }
   0xd   : > { %s2741_s15 = smov (!%p407_p3, %s406_s15), 97  ;;  %s2743_s16 = smov (!%p431_p4, %s430_s16), 1567 }
   0xe   : > { %s1572_s17 = sshll.u32 %s2741_s15, 1  ;;  %s1576_s30 = sshll.u32 %s2743_s16, 3  ;;  %vm440_vm0 = vcmask (!%p1577_p5), 975872   ;;  %v2238_v0 = vmov (!%p1577_p5), 0.0  }
   0xf   : > { %s2314_s20 = scalar_lea.vmem %s2729_s0, %s1572_s17  ;;  %s2319_s23 = scalar_lea.vmem %s2730_s1, %s1572_s17  ;;  %441 = vst.msk [vmem:[#allocation2] sm:$0x3] (!%p1577_p5), %vm440_vm0, %v2238_v0 }
  0x10   : > { %s2324_s26 = scalar_lea.vmem %s2731_s2, %s1572_s17  ;;  %s2329_s29 = scalar_lea.vmem %s2732_s3, %s1572_s17 }
  0x11   : > { %s2334_s15 = scalar_lea.vmem %s2733_s4, %s1576_s30  ;;  %439 = sbr.rel (%p1577_p5) target bundleno = 24 (0x18), region = 64 }
  0x18 PF: > { %v487_v1 = vld [vmem:[%s2334_s15 + $0x80] sm:$0xff]  ;;  %v488_v2 = vld [vmem:[%s2334_s15 + $0x88] sm:$0xff]  ;;  %v489_v12 = vld [vmem:[%s2334_s15 + $0x90] sm:$0xff]  ;;  %v2239_v63 = vmov 1983009808   ;;  %vm1263_vm1 = vcmask 975872  }
  0x19   : > { %v519_v3 = vld [vmem:[%s2334_s15 + $0x180] sm:$0xff]  ;;  %v1920_v4 = vpack.c.bf16 %v488_v2, %v487_v1  ;;  %v520_v5 = vld [vmem:[%s2334_s15 + $0x188] sm:$0xff]  ;;  %v490_v14 = vld [vmem:[%s2334_s15 + $0x98] sm:$0xff]  ;;  %v701_v0 = vunpack.c.l.s4 %v2239_v63  ;;  %v703_v1 = vlaneseq  ;;  %p1578_p6 = scmp.ne.s32.totalorder %s2305_s14, 6 }
  0x1a   : > { %v471_v6 = vld [vmem:[%s2334_s15] sm:$0xff]  ;;  %v472_v7 = vld [vmem:[%s2334_s15 + $0x8] sm:$0xff]  ;;  %v1952_v8 = vpack.c.bf16 %v520_v5, %v519_v3  ;;  %v521_v15 = vld [vmem:[%s2334_s15 + $0x190] sm:$0xff]  ;;  %v1924_v17 = vpack.c.bf16 %v490_v14, %v489_v12  ;;  %vm2241_vm2 = vmmov (!%p1578_p6), 0   ;;  %vm1301_vm3 = vcmask (!%p1578_p6), 982016  }
  0x1b   : > { %v1922_v9 = vpack.c.bf16 %v472_v7, %v471_v6  ;;  %v503_v10 = vld [vmem:[%s2334_s15 + $0x100] sm:$0xff]  ;;  %v504_v11 = vld [vmem:[%s2334_s15 + $0x108] sm:$0xff]  ;;  %1921 = vmatprep.subr.bf16.mxu0 %v1920_v4  ;;  %v522_v16 = vld [vmem:[%s2334_s15 + $0x198] sm:$0xff]  ;;  %vm1398_vm4 = vcmask (!%p1578_p6), 1043456   ;;  %vm1394_vm5 = vcmask (!%p1578_p6), 687104   ;;  %vm1472_vm6 = vcmask (!%p1578_p6), 74752  }
  0x1c   : > { %v1954_v13 = vpack.c.bf16 %v504_v11, %v503_v10  ;;  %1953 = vmatprep.subr.bf16.mxu1 %v1952_v8  ;;  %v1956_v18 = vpack.c.bf16 %v522_v16, %v521_v15  ;;  %v473_v19 = vld [vmem:[%s2334_s15 + $0x10] sm:$0xff]  ;;  %v474_v20 = vld [vmem:[%s2334_s15 + $0x18] sm:$0xff]  ;;  %v491_v24 = vld [vmem:[%s2334_s15 + $0xa0] sm:$0xff]  ;;  %v702_v15 = vunpack.c.0.s8 %v701_v0  ;;  %v704_v16 = vshrl.u32 %v703_v1, 7 }
  0x1d   : > { %1923 = vmatpush3.bf16.msra.mxu0 %v1922_v9  ;;  %v505_v21 = vld [vmem:[%s2334_s15 + $0x110] sm:$0xff]  ;;  %v1926_v22 = vpack.c.bf16 %v474_v20, %v473_v19  ;;  %v506_v23 = vld [vmem:[%s2334_s15 + $0x118] sm:$0xff]  ;;  %v492_v25 = vld [vmem:[%s2334_s15 + $0xa8] sm:$0xff] }
  0x1e   : > { %1955 = vmatpush3.bf16.msra.mxu1 %v1954_v13  ;;  %1925 = vmatprep.subr.bf16.mxu0 %v1924_v17  ;;  %v1958_v26 = vpack.c.bf16 %v506_v23, %v505_v21  ;;  %v1928_v27 = vpack.c.bf16 %v492_v25, %v491_v24  ;;  %v523_v28 = vld [vmem:[%s2334_s15 + $0x1a0] sm:$0xff]  ;;  %v524_v29 = vld [vmem:[%s2334_s15 + $0x1a8] sm:$0xff]  ;;  %v493_v36 = vld [vmem:[%s2334_s15 + $0xb0] sm:$0xff] }
  0x1f   : > { %1957 = vmatprep.subr.bf16.mxu1 %v1956_v18  ;;  %v475_v30 = vld [vmem:[%s2334_s15 + $0x20] sm:$0xff]  ;;  %v1960_v31 = vpack.c.bf16 %v524_v29, %v523_v28  ;;  %v476_v32 = vld [vmem:[%s2334_s15 + $0x28] sm:$0xff]  ;;  %v494_v37 = vld [vmem:[%s2334_s15 + $0xb8] sm:$0xff] }
  0x20   : > { %v507_v33 = vld [vmem:[%s2334_s15 + $0x120] sm:$0xff]  ;;  %v508_v34 = vld [vmem:[%s2334_s15 + $0x128] sm:$0xff]  ;;  %v1930_v35 = vpack.c.bf16 %v476_v32, %v475_v30  ;;  %v525_v38 = vld [vmem:[%s2334_s15 + $0x1b0] sm:$0xff]  ;;  %v1932_v40 = vpack.c.bf16 %v494_v37, %v493_v36 }
  0x21   : > { %1927 = vmatpush3.bf16.msra.mxu0 %v1926_v22  ;;  %v1962_v39 = vpack.c.bf16 %v508_v34, %v507_v33  ;;  %v526_v41 = vld [vmem:[%s2334_s15 + $0x1b8] sm:$0xff]  ;;  %v477_v42 = vld [vmem:[%s2334_s15 + $0x30] sm:$0xff]  ;;  %v495_v47 = vld [vmem:[%s2334_s15 + $0xc0] sm:$0xff]  ;;  %v2401_v34 = vsub.s32 %v702_v15, %v704_v16 }
  0x22   : > { %1959 = vmatpush3.bf16.msra.mxu1 %v1958_v26  ;;  %1929 = vmatprep.subr.bf16.mxu0 %v1928_v27  ;;  %v478_v43 = vld [vmem:[%s2334_s15 + $0x38] sm:$0xff]  ;;  %v1964_v44 = vpack.c.bf16 %v526_v41, %v525_v38  ;;  %v509_v45 = vld [vmem:[%s2334_s15 + $0x130] sm:$0xff]  ;;  %v496_v48 = vld [vmem:[%s2334_s15 + $0xc8] sm:$0xff] }
  0x23   : > { %1961 = vmatprep.subr.bf16.mxu1 %v1960_v31  ;;  %v510_v46 = vld [vmem:[%s2334_s15 + $0x138] sm:$0xff]  ;;  %v527_v49 = vld [vmem:[%s2334_s15 + $0x1c0] sm:$0xff]  ;;  %v528_v50 = vld [vmem:[%s2334_s15 + $0x1c8] sm:$0xff]  ;;  %v1934_v51 = vpack.c.bf16 %v478_v43, %v477_v42  ;;  %v1936_v53 = vpack.c.bf16 %v496_v48, %v495_v47 }
  0x24   : > { %v1966_v52 = vpack.c.bf16 %v510_v46, %v509_v45  ;;  %v479_v54 = vld [vmem:[%s2334_s15 + $0x40] sm:$0xff]  ;;  %v480_v55 = vld [vmem:[%s2334_s15 + $0x48] sm:$0xff]  ;;  %v1968_v57 = vpack.c.bf16 %v528_v50, %v527_v49  ;;  %v497_v59 = vld [vmem:[%s2334_s15 + $0xd0] sm:$0xff] }
  0x25   : > { %1931 = vmatpush3.bf16.msra.mxu0 %v1930_v35  ;;  %v511_v56 = vld [vmem:[%s2334_s15 + $0x140] sm:$0xff]  ;;  %v512_v58 = vld [vmem:[%s2334_s15 + $0x148] sm:$0xff]  ;;  %v498_v60 = vld [vmem:[%s2334_s15 + $0xd8] sm:$0xff]  ;;  %v1938_v2 = vpack.c.bf16 %v480_v55, %v479_v54 }
  0x26   : > { %1963 = vmatpush3.bf16.msra.mxu1 %v1962_v39  ;;  %1933 = vmatprep.subr.bf16.mxu0 %v1932_v40  ;;  %v529_v61 = vld [vmem:[%s2334_s15 + $0x1d0] sm:$0xff]  ;;  %v530_v62 = vld [vmem:[%s2334_s15 + $0x1d8] sm:$0xff]  ;;  %v1970_v3 = vpack.c.bf16 %v512_v58, %v511_v56  ;;  %v1940_v4 = vpack.c.bf16 %v498_v60, %v497_v59  ;;  %v499_v10 = vld [vmem:[%s2334_s15 + $0xe0] sm:$0xff] }
  0x27   : > { %1965 = vmatprep.subr.bf16.mxu1 %v1964_v44  ;;  %v481_v5 = vld [vmem:[%s2334_s15 + $0x50] sm:$0xff]  ;;  %v482_v6 = vld [vmem:[%s2334_s15 + $0x58] sm:$0xff]  ;;  %v1972_v8 = vpack.c.bf16 %v530_v62, %v529_v61  ;;  %v500_v11 = vld [vmem:[%s2334_s15 + $0xe8] sm:$0xff] }
  0x28   : > { %v513_v7 = vld [vmem:[%s2334_s15 + $0x150] sm:$0xff]  ;;  %v514_v9 = vld [vmem:[%s2334_s15 + $0x158] sm:$0xff]  ;;  %v531_v12 = vld [vmem:[%s2334_s15 + $0x1e0] sm:$0xff]  ;;  %v1942_v17 = vpack.c.bf16 %v482_v6, %v481_v5  ;;  %v1944_v22 = vpack.c.bf16 %v500_v11, %v499_v10 }
  0x29   : > { %1935 = vmatpush3.bf16.msra.mxu0 %v1934_v51  ;;  %v532_v13 = vld [vmem:[%s2334_s15 + $0x1e8] sm:$0xff]  ;;  %v483_v14 = vld [vmem:[%s2334_s15 + $0x60] sm:$0xff]  ;;  %v1974_v21 = vpack.c.bf16 %v514_v9, %v513_v7  ;;  %v501_v23 = vld [vmem:[%s2334_s15 + $0xf0] sm:$0xff] }
  0x2a   : > { %1967 = vmatpush3.bf16.msra.mxu1 %v1966_v52  ;;  %1937 = vmatprep.subr.bf16.mxu0 %v1936_v53  ;;  %v484_v18 = vld [vmem:[%s2334_s15 + $0x68] sm:$0xff]  ;;  %v515_v19 = vld [vmem:[%s2334_s15 + $0x160] sm:$0xff]  ;;  %v1976_v26 = vpack.c.bf16 %v532_v13, %v531_v12  ;;  %v502_v27 = vld [vmem:[%s2334_s15 + $0xf8] sm:$0xff] }
  0x2b   : > { %1969 = vmatprep.subr.bf16.mxu1 %v1968_v57  ;;  %v516_v20 = vld [vmem:[%s2334_s15 + $0x168] sm:$0xff]  ;;  %v442_v24 = vld [vmem:[%s2314_s20] sm:$0xff]  ;;  %v533_v31 = vld [vmem:[%s2334_s15 + $0x1f0] sm:$0xff]  ;;  %v1946_v35 = vpack.c.bf16 %v484_v18, %v483_v14  ;;  %v1948_v37 = vpack.c.bf16 %v502_v27, %v501_v23 }
  0x2c   : > { %v446_v25 = vld [vmem:[%s2319_s23] sm:$0xff]  ;;  %v534_v32 = vld [vmem:[%s2334_s15 + $0x1f8] sm:$0xff]  ;;  %v1978_v36 = vpack.c.bf16 %v516_v20, %v515_v19  ;;  %v485_v38 = vld [vmem:[%s2334_s15 + $0x70] sm:$0xff] }
  0x2d   : > { %1939 = vmatpush3.bf16.msra.mxu0 %v1938_v2  ;;  %v450_v28 = vmax.f32 %v442_v24, %v446_v25  ;;  %v454_v29 = vld [vmem:[%s2324_s26] sm:$0xff]  ;;  %v486_v39 = vld [vmem:[%s2334_s15 + $0x78] sm:$0xff]  ;;  %v1980_v41 = vpack.c.bf16 %v534_v32, %v533_v31  ;;  %v517_v42 = vld [vmem:[%s2334_s15 + $0x170] sm:$0xff] }
  0x2e   : > { %1971 = vmatpush3.bf16.msra.mxu1 %v1970_v3  ;;  %1941 = vmatprep.subr.bf16.mxu0 %v1940_v4  ;;  %v458_v30 = vld [vmem:[%s2329_s29] sm:$0xff]  ;;  %v518_v43 = vld [vmem:[%s2334_s15 + $0x178] sm:$0xff]  ;;  %v552_v47 = vld [vmem:[%s2334_s15 + $0x288] sm:$0xff]  ;;  %v1950_v50 = vpack.c.bf16 %v486_v39, %v485_v38 }
  0x2f   : > { %1973 = vmatprep.subr.bf16.mxu1 %v1972_v8  ;;  %v462_v33 = vmax.f32 %v454_v29, %v458_v30  ;;  %v551_v44 = vld [vmem:[%s2334_s15 + $0x280] sm:$0xff]  ;;  %v584_v49 = vld [vmem:[%s2334_s15 + $0x388] sm:$0xff]  ;;  %v1982_v51 = vpack.c.bf16 %v518_v43, %v517_v42  ;;  %v553_v60 = vld [vmem:[%s2334_s15 + $0x290] sm:$0xff] }
  0x30   : > { %v583_v48 = vld [vmem:[%s2334_s15 + $0x380] sm:$0xff]  ;;  %v536_v55 = vld [vmem:[%s2334_s15 + $0x208] sm:$0xff]  ;;  %v1984_v57 = vpack.c.bf16 %v552_v47, %v551_v44  ;;  %v554_v61 = vld [vmem:[%s2334_s15 + $0x298] sm:$0xff] }
  0x31   : > { %1943 = vmatpush3.bf16.msra.mxu0 %v1942_v17  ;;  %v466_v40 = vmax.f32 %v450_v28, %v462_v33  ;;  %v535_v54 = vld [vmem:[%s2334_s15 + $0x200] sm:$0xff]  ;;  %v2016_v58 = vpack.c.bf16 %v584_v49, %v583_v48  ;;  %v568_v59 = vld [vmem:[%s2334_s15 + $0x308] sm:$0xff]  ;;  %v585_v63 = vld [vmem:[%s2334_s15 + $0x390] sm:$0xff]  ;;  %v1988_v3 = vpack.c.bf16 %v554_v61, %v553_v60 }
  0x32   : > { %1975 = vmatpush3.bf16.msra.mxu1 %v1974_v21  ;;  %1945 = vmatprep.subr.bf16.mxu0 %v1944_v22  ;;  %v567_v56 = vld [vmem:[%s2334_s15 + $0x300] sm:$0xff]  ;;  %v586_v0 = vld [vmem:[%s2334_s15 + $0x398] sm:$0xff]  ;;  %v1986_v1 = vpack.c.bf16 %v536_v55, %v535_v54  ;;  %v537_v4 = vld [vmem:[%s2334_s15 + $0x210] sm:$0xff] }
  0x33   : > { %1977 = vmatprep.subr.bf16.mxu1 %v1976_v26  ;;  %v706_v45 = vrot.slane %v466_v40, %v2401_v34  ;;  %v699_v46 = vcombine.high %v466_v40, %v466_v40  ;;  %v2018_v2 = vpack.c.bf16 %v568_v59, %v567_v56  ;;  %v538_v5 = vld [vmem:[%s2334_s15 + $0x218] sm:$0xff]  ;;  %v569_v6 = vld [vmem:[%s2334_s15 + $0x310] sm:$0xff]  ;;  %v2020_v7 = vpack.c.bf16 %v586_v0, %v585_v63  ;;  %v555_v9 = vld [vmem:[%s2334_s15 + $0x2a0] sm:$0xff] }
  0x34   : > { %v570_v8 = vld [vmem:[%s2334_s15 + $0x318] sm:$0xff]  ;;  %v556_v10 = vld [vmem:[%s2334_s15 + $0x2a8] sm:$0xff]  ;;  %v587_v11 = vld [vmem:[%s2334_s15 + $0x3a0] sm:$0xff]  ;;  %v1990_v13 = vpack.c.bf16 %v538_v5, %v537_v4 }
  0x35   : > { %1947 = vmatpush3.bf16.msra.mxu0 %v1946_v35  ;;  %v714_v52 = vcombine.high %v706_v45, %v706_v45  ;;  %v713_v53 = vrot.slane %v699_v46, %v2401_v34  ;;  %v588_v12 = vld [vmem:[%s2334_s15 + $0x3a8] sm:$0xff]  ;;  %v2022_v14 = vpack.c.bf16 %v570_v8, %v569_v6  ;;  %v1992_v15 = vpack.c.bf16 %v556_v10, %v555_v9  ;;  %v539_v16 = vld [vmem:[%s2334_s15 + $0x220] sm:$0xff]  ;;  %v557_v21 = vld [vmem:[%s2334_s15 + $0x2b0] sm:$0xff] }
  0x36   : > { %1979 = vmatpush3.bf16.msra.mxu1 %v1978_v36  ;;  %1949 = vmatprep.subr.bf16.mxu0 %v1948_v37  ;;  %v540_v17 = vld [vmem:[%s2334_s15 + $0x228] sm:$0xff]  ;;  %v571_v18 = vld [vmem:[%s2334_s15 + $0x320] sm:$0xff]  ;;  %v2024_v19 = vpack.c.bf16 %v588_v12, %v587_v11  ;;  %v558_v22 = vld [vmem:[%s2334_s15 + $0x2b8] sm:$0xff] }
  0x37   : > { %1981 = vmatprep.subr.bf16.mxu1 %v1980_v41  ;;  %836 = vmatprep.mubr.f32.mxu0 %v714_v52  ;;  %v715_v62 = vcombine.high %v713_v53, %v713_v53  ;;  %v572_v20 = vld [vmem:[%s2334_s15 + $0x328] sm:$0xff]  ;;  %v589_v23 = vld [vmem:[%s2334_s15 + $0x3b0] sm:$0xff]  ;;  %v590_v24 = vld [vmem:[%s2334_s15 + $0x3b8] sm:$0xff]  ;;  %v1994_v25 = vpack.c.bf16 %v540_v17, %v539_v16  ;;  %v1996_v28 = vpack.c.bf16 %v558_v22, %v557_v21 }
  0x38   : > { %v541_v26 = vld [vmem:[%s2334_s15 + $0x230] sm:$0xff]  ;;  %v2026_v27 = vpack.c.bf16 %v572_v20, %v571_v18  ;;  %v542_v29 = vld [vmem:[%s2334_s15 + $0x238] sm:$0xff]  ;;  %v2028_v32 = vpack.c.bf16 %v590_v24, %v589_v23  ;;  %v559_v33 = vld [vmem:[%s2334_s15 + $0x2c0] sm:$0xff] }
  0x39   : > { %1951 = vmatpush3.bf16.msra.mxu0 %v1950_v50  ;;  %906 = vmatprep.mubr.f32.mxu1 %v715_v62  ;;  %v573_v30 = vld [vmem:[%s2334_s15 + $0x330] sm:$0xff]  ;;  %v574_v31 = vld [vmem:[%s2334_s15 + $0x338] sm:$0xff]  ;;  %v560_v35 = vld [vmem:[%s2334_s15 + $0x2c8] sm:$0xff]  ;;  %v1998_v40 = vpack.c.bf16 %v542_v29, %v541_v26 }
  0x3a   : > { %1983 = vmatpush3.bf16.msra.mxu1 %v1982_v51  ;;  %1985 = vmatprep.subr.bf16.mxu0 %v1984_v57  ;;  %v591_v36 = vld [vmem:[%s2334_s15 + $0x3c0] sm:$0xff]  ;;  %v592_v37 = vld [vmem:[%s2334_s15 + $0x3c8] sm:$0xff]  ;;  %v2000_v46 = vpack.c.bf16 %v560_v35, %v559_v33  ;;  %v561_v52 = vld [vmem:[%s2334_s15 + $0x2d0] sm:$0xff] }
  0x3b   : > { %2017 = vmatprep.subr.bf16.mxu1 %v2016_v58  ;;  %v443_v38 = vld [vmem:[%s2314_s20 + $0x8] sm:$0xff]  ;;  %v543_v41 = vld [vmem:[%s2334_s15 + $0x240] sm:$0xff]  ;;  %v2032_v51 = vpack.c.bf16 %v592_v37, %v591_v36  ;;  %v593_v54 = vld [vmem:[%s2334_s15 + $0x3d0] sm:$0xff] }
  0x3c   : > { %837 = vmatmul.mubr.f32.vlgmr.msra.gmra.mrb[0].mxu0 %v706_v45  ;;  %v447_v39 = vld [vmem:[%s2319_s23 + $0x8] sm:$0xff]  ;;  %v2030_v45 = vpack.c.bf16 %v574_v31, %v573_v30  ;;  %v575_v48 = vld [vmem:[%s2334_s15 + $0x340] sm:$0xff]  ;;  %v594_v55 = vld [vmem:[%s2334_s15 + $0x3d8] sm:$0xff] }
  0x3d   : > { %907 = vmatmul.mubr.f32.vlgmr.msra.gmra.mrb[0].mxu1 %v713_v53  ;;  %1987 = vmatpush3.bf16.msra.mxu0 %v1986_v1  ;;  %v451_v42 = vmax.f32 %v443_v38, %v447_v39  ;;  %v455_v43 = vld [vmem:[%s2324_s26 + $0x8] sm:$0xff]  ;;  %v562_v53 = vld [vmem:[%s2334_s15 + $0x2d8] sm:$0xff]  ;;  %v545_v60 = vld [vmem:[%s2334_s15 + $0x250] sm:$0xff]  ;;  %v2036_v1 = vpack.c.bf16 %v594_v55, %v593_v54 }
  0x3e   : > { %2019 = vmatpush3.bf16.msra.mxu1 %v2018_v2  ;;  %1989 = vmatprep.subr.bf16.mxu0 %v1988_v3  ;;  %v459_v44 = vld [vmem:[%s2329_s29 + $0x8] sm:$0xff]  ;;  %v2004_v59 = vpack.c.bf16 %v562_v53, %v561_v52  ;;  %v546_v61 = vld [vmem:[%s2334_s15 + $0x258] sm:$0xff]  ;;  %v577_v62 = vld [vmem:[%s2334_s15 + $0x350] sm:$0xff] }
  0x3f   : > { %2021 = vmatprep.subr.bf16.mxu1 %v2020_v7  ;;  %v544_v47 = vld [vmem:[%s2334_s15 + $0x248] sm:$0xff]  ;;  %v463_v50 = vmax.f32 %v455_v43, %v459_v44  ;;  %v578_v2 = vld [vmem:[%s2334_s15 + $0x358] sm:$0xff]  ;;  %v563_v3 = vld [vmem:[%s2334_s15 + $0x2e0] sm:$0xff]  ;;  %v2006_v9 = vpack.c.bf16 %v546_v61, %v545_v60 }
  0x40   : > { %v576_v49 = vld [vmem:[%s2334_s15 + $0x348] sm:$0xff]  ;;  %v2002_v57 = vpack.c.bf16 %v544_v47, %v543_v41  ;;  %v595_v5 = vld [vmem:[%s2334_s15 + $0x3e0] sm:$0xff]  ;;  %v2038_v10 = vpack.c.bf16 %v578_v2, %v577_v62  ;;  %v565_v18 = vld [vmem:[%s2334_s15 + $0x2f0] sm:$0xff] }
  0x41   : > { %1991 = vmatpush3.bf16.msra.mxu0 %v1990_v13  ;;  %v467_v56 = vmax.f32 %v451_v42, %v463_v50  ;;  %v2034_v58 = vpack.c.bf16 %v576_v49, %v575_v48  ;;  %v564_v4 = vld [vmem:[%s2334_s15 + $0x2e8] sm:$0xff]  ;;  %v547_v12 = vld [vmem:[%s2334_s15 + $0x260] sm:$0xff]  ;;  %v597_v20 = vld [vmem:[%s2334_s15 + $0x3f0] sm:$0xff] }
  0x42   : > { %2023 = vmatpush3.bf16.msra.mxu1 %v2022_v14  ;;  %1993 = vmatprep.subr.bf16.mxu0 %v1992_v15  ;;  %v596_v6 = vld [vmem:[%s2334_s15 + $0x3e8] sm:$0xff]  ;;  %v2008_v11 = vpack.c.bf16 %v564_v4, %v563_v3  ;;  %v579_v14 = vld [vmem:[%s2334_s15 + $0x360] sm:$0xff]  ;;  %v598_v21 = vld [vmem:[%s2334_s15 + $0x3f8] sm:$0xff] }
  0x43   : > { %2025 = vmatprep.subr.bf16.mxu1 %v2024_v19  ;;  %v2461_v63 = vrot.slane %v467_v56, %v2401_v34  ;;  %v716_v0 = vcombine.high %v467_v56, %v467_v56  ;;  %v548_v13 = vld [vmem:[%s2334_s15 + $0x268] sm:$0xff]  ;;  %v2040_v16 = vpack.c.bf16 %v596_v6, %v595_v5  ;;  %v566_v19 = vld [vmem:[%s2334_s15 + $0x2f8] sm:$0xff]  ;;  %v615_v30 = vld [vmem:[%s2334_s15 + $0x480] sm:$0xff] }
  0x44   : > { %v580_v17 = vld [vmem:[%s2334_s15 + $0x368] sm:$0xff]  ;;  %v2010_v22 = vpack.c.bf16 %v548_v13, %v547_v12  ;;  %v2012_v24 = vpack.c.bf16 %v566_v19, %v565_v18  ;;  %v550_v26 = vld [vmem:[%s2334_s15 + $0x278] sm:$0xff]  ;;  %v599_v38 = vld [vmem:[%s2334_s15 + $0x400] sm:$0xff] }
  0x45   : > { %1995 = vmatpush3.bf16.msra.mxu0 %v1994_v25  ;;  %v731_v7 = vcombine.high %v2461_v63, %v2461_v63  ;;  %v2471_v8 = vrot.slane %v716_v0, %v2401_v34  ;;  %v2042_v23 = vpack.c.bf16 %v580_v17, %v579_v14  ;;  %v549_v25 = vld [vmem:[%s2334_s15 + $0x270] sm:$0xff]  ;;  %v582_v29 = vld [vmem:[%s2334_s15 + $0x378] sm:$0xff]  ;;  %v616_v31 = vld [vmem:[%s2334_s15 + $0x488] sm:$0xff] }
  0x46   : > { %2027 = vmatpush3.bf16.msra.mxu1 %v2026_v27  ;;  %1997 = vmatprep.subr.bf16.mxu0 %v1996_v28  ;;  %v581_v27 = vld [vmem:[%s2334_s15 + $0x370] sm:$0xff]  ;;  %v2044_v28 = vpack.c.bf16 %v598_v21, %v597_v20  ;;  %v648_v33 = vld [vmem:[%s2334_s15 + $0x588] sm:$0xff]  ;;  %v2014_v35 = vpack.c.bf16 %v550_v26, %v549_v25  ;;  %v2048_v37 = vpack.c.bf16 %v616_v31, %v615_v30  ;;  %v618_v44 = vld [vmem:[%s2334_s15 + $0x498] sm:$0xff] }
  0x47   : > { %2029 = vmatprep.subr.bf16.mxu1 %v2028_v32  ;;  %v732_v15 = vcombine.high %v2471_v8, %v2471_v8  ;;  %976 = vmatprep.mubr.f32.mxu0 %v731_v7  ;;  %v647_v32 = vld [vmem:[%s2334_s15 + $0x580] sm:$0xff]  ;;  %v2046_v36 = vpack.c.bf16 %v582_v29, %v581_v27  ;;  %v600_v39 = vld [vmem:[%s2334_s15 + $0x408] sm:$0xff]  ;;  %v617_v43 = vld [vmem:[%s2334_s15 + $0x490] sm:$0xff] }
  0x48   : > { %v2080_v41 = vpack.c.bf16 %v648_v33, %v647_v32  ;;  %v632_v42 = vld [vmem:[%s2334_s15 + $0x508] sm:$0xff]  ;;  %v2050_v47 = vpack.c.bf16 %v600_v39, %v599_v38  ;;  %v601_v48 = vld [vmem:[%s2334_s15 + $0x410] sm:$0xff]  ;;  %v602_v49 = vld [vmem:[%s2334_s15 + $0x418] sm:$0xff]  ;;  %v2052_v52 = vpack.c.bf16 %v618_v44, %v617_v43 }
  0x49   : > { %1999 = vmatpush3.bf16.msra.mxu0 %v1998_v40  ;;  %1046 = vmatprep.mubr.f32.mxu1 %v732_v15  ;;  %v631_v40 = vld [vmem:[%s2334_s15 + $0x500] sm:$0xff]  ;;  %v633_v50 = vld [vmem:[%s2334_s15 + $0x510] sm:$0xff]  ;;  %v634_v53 = vld [vmem:[%s2334_s15 + $0x518] sm:$0xff] }
  0x4a   : > { %2031 = vmatpush3.bf16.msra.mxu1 %v2030_v45  ;;  %2001 = vmatprep.subr.bf16.mxu0 %v2000_v46  ;;  %v649_v45 = vld [vmem:[%s2334_s15 + $0x590] sm:$0xff]  ;;  %v650_v46 = vld [vmem:[%s2334_s15 + $0x598] sm:$0xff]  ;;  %v619_v54 = vld [vmem:[%s2334_s15 + $0x4a0] sm:$0xff]  ;;  %v2086_v3 = vpack.c.bf16 %v634_v53, %v633_v50 }
  0x4b   : > { %2033 = vmatprep.subr.bf16.mxu1 %v2032_v51  ;;  %v2082_v51 = vpack.c.bf16 %v632_v42, %v631_v40  ;;  %v620_v55 = vld [vmem:[%s2334_s15 + $0x4a8] sm:$0xff]  ;;  %v2084_v56 = vpack.c.bf16 %v650_v46, %v649_v45  ;;  %v651_v60 = vld [vmem:[%s2334_s15 + $0x5a0] sm:$0xff]  ;;  %v460_v0 = vld [vmem:[%s2329_s29 + $0x10] sm:$0xff] }
  0x4c   : > { %v652_v61 = vld [vmem:[%s2334_s15 + $0x5a8] sm:$0xff]  ;;  %v2056_v4 = vpack.c.bf16 %v620_v55, %v619_v54  ;;  %v603_v5 = vld [vmem:[%s2334_s15 + $0x420] sm:$0xff]  ;;  %v653_v12 = vld [vmem:[%s2334_s15 + $0x5b0] sm:$0xff] }
  0x4d   : > { %2003 = vmatpush3.bf16.msra.mxu0 %v2002_v57  ;;  %v444_v57 = vld [vmem:[%s2314_s20 + $0x10] sm:$0xff]  ;;  %v635_v6 = vld [vmem:[%s2334_s15 + $0x520] sm:$0xff]  ;;  %v2088_v7 = vpack.c.bf16 %v652_v61, %v651_v60  ;;  %v654_v13 = vld [vmem:[%s2334_s15 + $0x5b8] sm:$0xff] }
  0x4e   : > { %2035 = vmatpush3.bf16.msra.mxu1 %v2034_v58  ;;  %2005 = vmatprep.subr.bf16.mxu0 %v2004_v59  ;;  %v448_v58 = vld [vmem:[%s2319_s23 + $0x10] sm:$0xff]  ;;  %v606_v20 = vld [vmem:[%s2334_s15 + $0x438] sm:$0xff]  ;;  %v624_v25 = vld [vmem:[%s2334_s15 + $0x4c8] sm:$0xff] }
  0x4f   : > { %2037 = vmatprep.subr.bf16.mxu1 %v2036_v1  ;;  %v456_v59 = vld [vmem:[%s2324_s26 + $0x10] sm:$0xff]  ;;  %v452_v62 = vmax.f32 %v444_v57, %v448_v58  ;;  %v2054_v1 = vpack.c.bf16 %v602_v49, %v601_v48  ;;  %v656_v29 = vld [vmem:[%s2334_s15 + $0x5c8] sm:$0xff]  ;;  %v658_v44 = vld [vmem:[%s2334_s15 + $0x5d8] sm:$0xff] }
  0x50   : > { %v464_v2 = vmax.f32 %v456_v59, %v460_v0  ;;  %v605_v19 = vld [vmem:[%s2334_s15 + $0x430] sm:$0xff]  ;;  %v640_v39 = vld [vmem:[%s2334_s15 + $0x548] sm:$0xff]  ;;  %v610_v46 = vld [vmem:[%s2334_s15 + $0x458] sm:$0xff] }
  0x51   : > { %2007 = vmatpush3.bf16.msra.mxu0 %v2006_v9  ;;  %v636_v9 = vld [vmem:[%s2334_s15 + $0x528] sm:$0xff]  ;;  %v637_v21 = vld [vmem:[%s2334_s15 + $0x530] sm:$0xff]  ;;  %v2062_v30 = vpack.c.bf16 %v606_v20, %v605_v19  ;;  %v642_v48 = vld [vmem:[%s2334_s15 + $0x558] sm:$0xff] }
  0x52   : > { %2039 = vmatpush3.bf16.msra.mxu1 %v2038_v10  ;;  %2009 = vmatprep.subr.bf16.mxu0 %v2008_v11  ;;  %v621_v10 = vld [vmem:[%s2334_s15 + $0x4b0] sm:$0xff]  ;;  %v622_v11 = vld [vmem:[%s2334_s15 + $0x4b8] sm:$0xff]  ;;  %v2090_v17 = vpack.c.bf16 %v636_v9, %v635_v6  ;;  %v659_v58 = vld [vmem:[%s2334_s15 + $0x5e0] sm:$0xff] }
  0x53   : > { %2041 = vmatprep.subr.bf16.mxu1 %v2040_v16  ;;  %v2060_v18 = vpack.c.bf16 %v622_v11, %v621_v10  ;;  %v625_v40 = vld [vmem:[%s2334_s15 + $0x4d0] sm:$0xff]  ;;  %v445_v53 = vld [vmem:[%s2314_s20 + $0x18] sm:$0xf]  ;;  %v660_v59 = vld [vmem:[%s2334_s15 + $0x5e8] sm:$0xff] }
  0x54   : > { %v609_v42 = vld [vmem:[%s2334_s15 + $0x450] sm:$0xff]  ;;  %v449_v55 = vld [vmem:[%s2319_s23 + $0x18] sm:$0xf]  ;;  %v611_v0 = vld [vmem:[%s2334_s15 + $0x460] sm:$0xff] }
  0x55   : > { %2011 = vmatpush3.bf16.msra.mxu0 %v2010_v22  ;;  %v2092_v22 = vpack.c.bf16 %v654_v13, %v653_v12  ;;  %v657_v43 = vld [vmem:[%s2334_s15 + $0x5d0] sm:$0xff]  ;;  %v461_v57 = vld [vmem:[%s2329_s29 + $0x18] sm:$0xf]  ;;  %v2070_v60 = vpack.c.bf16 %v610_v46, %v609_v42  ;;  %v679_v20 = vld [vmem:[%s2334_s15 + $0x680] sm:$0xff] }
  0x56   : > { %2043 = vmatpush3.bf16.msra.mxu1 %v2042_v23  ;;  %2013 = vmatprep.subr.bf16.mxu0 %v2012_v24  ;;  %v638_v23 = vld [vmem:[%s2334_s15 + $0x538] sm:$0xff]  ;;  %v623_v24 = vld [vmem:[%s2334_s15 + $0x4c0] sm:$0xff]  ;;  %v2100_v54 = vpack.c.bf16 %v658_v44, %v657_v43  ;;  %v629_v6 = vld [vmem:[%s2334_s15 + $0x4f0] sm:$0xff] }
  0x57   : > { %2045 = vmatprep.subr.bf16.mxu1 %v2044_v28  ;;  %v655_v28 = vld [vmem:[%s2334_s15 + $0x5c0] sm:$0xff]  ;;  %v2094_v32 = vpack.c.bf16 %v638_v23, %v637_v21  ;;  %v2064_v33 = vpack.c.bf16 %v624_v25, %v623_v24  ;;  %v661_v9 = vld [vmem:[%s2334_s15 + $0x5f0] sm:$0xff]  ;;  %v662_v10 = vld [vmem:[%s2334_s15 + $0x5f8] sm:$0xff] }
  0x58   : > { %v2096_v38 = vpack.c.bf16 %v656_v29, %v655_v28  ;;  %v613_v13 = vld [vmem:[%s2334_s15 + $0x470] sm:$0xff]  ;;  %v646_v19 = vld [vmem:[%s2334_s15 + $0x578] sm:$0xff]  ;;  %v680_v21 = vld [vmem:[%s2334_s15 + $0x688] sm:$0xff] }
  0x59   : > { %2015 = vmatpush3.bf16.msra.mxu0 %v2014_v35  ;;  %v607_v35 = vld [vmem:[%s2334_s15 + $0x440] sm:$0xff]  ;;  %v2112_v24 = vpack.c.bf16 %v680_v21, %v679_v20  ;;  %v681_v29 = vld [vmem:[%s2334_s15 + $0x690] sm:$0xff]  ;;  %v686_v43 = vld [vmem:[%s2334_s15 + $0x6b8] sm:$0xff] }
  0x5a   : > { %2047 = vmatpush3.bf16.msra.mxu1 %v2046_v36  ;;  %2049 = vmatprep.subr.bf16.mxu0 %v2048_v37  ;;  %v608_v36 = vld [vmem:[%s2334_s15 + $0x448] sm:$0xff]  ;;  %v639_v37 = vld [vmem:[%s2334_s15 + $0x540] sm:$0xff]  ;;  %v685_v42 = vld [vmem:[%s2334_s15 + $0x6b0] sm:$0xff] }
  0x5b   : > { %2081 = vmatprep.subr.bf16.mxu1 %v2080_v41  ;;  %v626_v41 = vld [vmem:[%s2334_s15 + $0x4d8] sm:$0xff]  ;;  %v2066_v45 = vpack.c.bf16 %v608_v36, %v607_v35  ;;  %v2098_v49 = vpack.c.bf16 %v640_v39, %v639_v37  ;;  %v663_v25 = vld [vmem:[%s2334_s15 + $0x600] sm:$0xff]  ;;  %v2124_v44 = vpack.c.bf16 %v686_v43, %v685_v42 }
  0x5c   : > { %977 = vmatmul.mubr.f32.vlgmr.msra.gmra.mrb[2].mxu0 %v2461_v63  ;;  %v604_v63 = vld [vmem:[%s2334_s15 + $0x428] sm:$0xff]  ;;  %v2068_v50 = vpack.c.bf16 %v626_v41, %v625_v40  ;;  %v666_v35 = vld [vmem:[%s2334_s15 + $0x618] sm:$0xff]  ;;  %v683_v37 = vld [vmem:[%s2334_s15 + $0x6a0] sm:$0xff] }
  0x5d   : > { %2051 = vmatpush3.bf16.msra.mxu0 %v2050_v47  ;;  %1047 = vmatmul.mubr.f32.vlgmr.msra.gmra.mrb[2].mxu1 %v2471_v8  ;;  %v468_v8 = vmax.f32 %v452_v62, %v464_v2  ;;  %v2058_v14 = vpack.c.bf16 %v604_v63, %v603_v5  ;;  %v641_v47 = vld [vmem:[%s2334_s15 + $0x550] sm:$0xff]  ;;  %v643_v2 = vld [vmem:[%s2334_s15 + $0x560] sm:$0xff]  ;;  %v2104_v5 = vpack.c.bf16 %v660_v59, %v659_v58  ;;  %v644_v63 = vld [vmem:[%s2334_s15 + $0x568] sm:$0xff] }
  0x5e   : > { %2083 = vmatpush3.bf16.msra.mxu1 %v2082_v51  ;;  %2053 = vmatprep.subr.bf16.mxu0 %v2052_v52  ;;  %v627_v51 = vld [vmem:[%s2334_s15 + $0x4e0] sm:$0xff]  ;;  %v628_v52 = vld [vmem:[%s2334_s15 + $0x4e8] sm:$0xff]  ;;  %v2102_v61 = vpack.c.bf16 %v642_v48, %v641_v47  ;;  %v1282_v43 = vld [vmem:[%s2735_s6 + $0x18] sm:$0xff] (!%p1578_p6) }
  0x5f   : > { %2085 = vmatprep.subr.bf16.mxu1 %v2084_v56  ;;  %v2522_v15 = vrot.slane %v468_v8, %v2401_v34  ;;  %v733_v16 = vcombine.high %v468_v8, %v468_v8  ;;  %v457_v56 = vld [vmem:[%s2324_s26 + $0x18] sm:$0xf]  ;;  %v2072_v62 = vpack.c.bf16 %v628_v52, %v627_v51  ;;  %v2106_v8 = vpack.c.bf16 %v644_v63, %v643_v2  ;;  %v667_v40 = vld [vmem:[%s2334_s15 + $0x620] sm:$0xff]  ;;  %v668_v41 = vld [vmem:[%s2334_s15 + $0x628] sm:$0xff] }
  0x60   : > { %v687_v46 = vld [vmem:[%s2334_s15 + $0x6c0] sm:$0xff]  ;;  %v688_v47 = vld [vmem:[%s2334_s15 + $0x6c8] sm:$0xff]  ;;  %v689_v52 = vld [vmem:[%s2334_s15 + $0x6d0] sm:$0xff] }
  0x61   : > { %2055 = vmatpush3.bf16.msra.mxu0 %v2054_v1  ;;  %v748_v26 = vcombine.high %v2522_v15, %v2522_v15  ;;  %v2533_v27 = vrot.slane %v733_v16, %v2401_v34  ;;  %v612_v1 = vld [vmem:[%s2334_s15 + $0x468] sm:$0xff]  ;;  %v645_v16 = vld [vmem:[%s2334_s15 + $0x570] sm:$0xff]  ;;  %v691_v58 = vld [vmem:[%s2334_s15 + $0x6e0] sm:$0xff] }
  0x62   : > { %2087 = vmatpush3.bf16.msra.mxu1 %v2086_v3  ;;  %2057 = vmatprep.subr.bf16.mxu0 %v2056_v4  ;;  %v453_v3 = vmax.f32 %v445_v53, %v449_v55  ;;  %v465_v4 = vmax.f32 %v457_v56, %v461_v57  ;;  %v2074_v11 = vpack.c.bf16 %v612_v1, %v611_v0  ;;  %v672_v51 = vld [vmem:[%s2334_s15 + $0x648] sm:$0xff]  ;;  %v690_v53 = vld [vmem:[%s2334_s15 + $0x6d8] sm:$0xff]  ;;  %v673_v56 = vld [vmem:[%s2334_s15 + $0x650] sm:$0xff] }
  0x63   : > { %2089 = vmatprep.subr.bf16.mxu1 %v2088_v7  ;;  %1116 = vmatprep.mubr.f32.mxu0 %v748_v26  ;;  %v749_v31 = vcombine.high %v2533_v27, %v2533_v27  ;;  %v630_v7 = vld [vmem:[%s2334_s15 + $0x4f8] sm:$0xff]  ;;  %v2110_v23 = vpack.c.bf16 %v646_v19, %v645_v16  ;;  %v664_v26 = vld [vmem:[%s2334_s15 + $0x608] sm:$0xff]  ;;  %v2132_v55 = vpack.c.bf16 %v690_v53, %v689_v52  ;;  %v693_v1 = vld [vmem:[%s2334_s15 + $0x6f0] sm:$0xff] }
  0x64   : > { %v2076_v12 = vpack.c.bf16 %v630_v7, %v629_v6  ;;  %v674_v57 = vld [vmem:[%s2334_s15 + $0x658] sm:$0xff]  ;;  %v692_v59 = vld [vmem:[%s2334_s15 + $0x6e8] sm:$0xff]  ;;  %v1285_v52 = vld [vmem:[%s2735_s6 + $0x30] sm:$0xff] (!%p1578_p6) }
  0x65   : > { %2059 = vmatpush3.bf16.msra.mxu0 %v2058_v14  ;;  %1186 = vmatprep.mubr.f32.mxu1 %v749_v31  ;;  %v614_v14 = vld [vmem:[%s2334_s15 + $0x478] sm:$0xff]  ;;  %v2114_v31 = vpack.c.bf16 %v664_v26, %v663_v25  ;;  %v676_v0 = vld [vmem:[%s2334_s15 + $0x668] sm:$0xff] }
  0x66   : > { %2091 = vmatpush3.bf16.msra.mxu1 %v2090_v17  ;;  %2061 = vmatprep.subr.bf16.mxu0 %v2060_v18  ;;  %v469_v17 = vmax.f32 %v453_v3, %v465_v4  ;;  %v2108_v18 = vpack.c.bf16 %v662_v10, %v661_v9  ;;  %v694_v2 = vld [vmem:[%s2334_s15 + $0x6f8] sm:$0xff] }
  0x67   : > { %2093 = vmatprep.subr.bf16.mxu1 %v2092_v22  ;;  %v2078_v22 = vpack.c.bf16 %v614_v14, %v613_v13  ;;  %v2140_v4 = vpack.c.bf16 %v694_v2, %v693_v1  ;;  %v678_v63 = vld [vmem:[%s2334_s15 + $0x678] sm:$0xff]  ;;  %v1289_v1 = vld [vmem:[%s2735_s6 + $0x50] sm:$0xff] (!%p1578_p6) }
  0x68   : > { %v2576_v28 = vrot.slane %v469_v17, %v2401_v34  ;;  %v684_v34 = vld [vmem:[%s2334_s15 + $0x6a8] sm:$0xff]  ;;  %v1286_v53 = vld [vmem:[%s2735_s6 + $0x38] sm:$0xff] (!%p1578_p6) }
  0x69   : > { %2063 = vmatpush3.bf16.msra.mxu0 %v2062_v30  ;;  %v682_v30 = vld [vmem:[%s2334_s15 + $0x698] sm:$0xff]  ;;  %v2120_v39 = vpack.c.bf16 %v684_v34, %v683_v37 }
  0x6a   : > { %2095 = vmatpush3.bf16.msra.mxu1 %v2094_v32  ;;  %2065 = vmatprep.subr.bf16.mxu0 %v2064_v33  ;;  %v2116_v32 = vpack.c.bf16 %v682_v30, %v681_v29  ;;  %v665_v33 = vld [vmem:[%s2334_s15 + $0x610] sm:$0xff]  ;;  %v757_v36 = vcombine.high %v2576_v28, %v2576_v28  ;;  %v1290_v2 = vld [vmem:[%s2735_s6 + $0x58] sm:$0xff] (!%p1578_p6) }
  0x6b   : > { %2097 = vmatprep.subr.bf16.mxu1 %v2096_v38  ;;  %v2118_v38 = vpack.c.bf16 %v666_v35, %v665_v33 }
  0x6d   : > { %2067 = vmatpush3.bf16.msra.mxu0 %v2066_v45  ;;  %v669_v45 = vld [vmem:[%s2334_s15 + $0x630] sm:$0xff] }
  0x6e   : > { %2099 = vmatpush3.bf16.msra.mxu1 %v2098_v49  ;;  %2069 = vmatprep.subr.bf16.mxu0 %v2068_v50  ;;  %v2128_v49 = vpack.c.bf16 %v688_v47, %v687_v46  ;;  %v671_v50 = vld [vmem:[%s2334_s15 + $0x640] sm:$0xff]  ;;  %v1377_v47 = vld [vmem:[%s2737_s8 + $0x8] sm:$0xff] (!%p1578_p6) }
  0x6f   : > { %2101 = vmatprep.subr.bf16.mxu1 %v2100_v54  ;;  %v2130_v54 = vpack.c.bf16 %v672_v51, %v671_v50  ;;  %v1376_v46 = vld [vmem:[%s2737_s8] sm:$0xff] (!%p1578_p6) }
  0x70   : > { %v2166_v51 = vpack.c.bf16 (!%p1578_p6), %v1377_v47, %v1376_v46 }
  0x71   : > { %2071 = vmatpush3.bf16.msra.mxu0 %v2070_v60  ;;  %v2134_v60 = vpack.c.bf16 %v674_v57, %v673_v56  ;;  %v1381_v56 = vld [vmem:[%s2737_s8 + $0x28] sm:$0xff] (!%p1578_p6)  ;;  %v2154_v57 = vpack.c.bf16 (!%p1578_p6), %v1286_v53, %v1285_v52 }
  0x72   : > { %2103 = vmatpush3.bf16.msra.mxu1 %v2102_v61  ;;  %2073 = vmatprep.subr.bf16.mxu0 %v2072_v62  ;;  %v2136_v61 = vpack.c.bf16 %v692_v59, %v691_v58  ;;  %v675_v62 = vld [vmem:[%s2334_s15 + $0x660] sm:$0xff]  ;;  %v1288_v59 = vld [vmem:[%s2735_s6 + $0x48] sm:$0xff] (!%p1578_p6) }
  0x73   : > { %2105 = vmatprep.subr.bf16.mxu1 %v2104_v5  ;;  %v2138_v3 = vpack.c.bf16 %v676_v0, %v675_v62  ;;  %v677_v5 = vld [vmem:[%s2334_s15 + $0x670] sm:$0xff]  ;;  %v1287_v58 = vld [vmem:[%s2735_s6 + $0x40] sm:$0xff] (!%p1578_p6)  ;;  %v1383_v62 = vld [vmem:[%s2737_s8 + $0x38] sm:$0xff] (!%p1578_p6) }
  0x74   : > { %v2142_v6 = vpack.c.bf16 %v678_v63, %v677_v5  ;;  %v2157_v0 = vpack.c.bf16 (!%p1578_p6), %v1288_v59, %v1287_v58  ;;  %v1291_v5 = vld [vmem:[%s2735_s6 + $0x60] sm:$0xff] (!%p1578_p6)  ;;  %v1292_v63 = vld [vmem:[%s2735_s6 + $0x68] sm:$0xff] (!%p1578_p6) }
  0x75   : > { %2075 = vmatpush3.bf16.msra.mxu0 %v2074_v11 }
  0x76   : > { %2107 = vmatpush3.bf16.msra.mxu1 %v2106_v8  ;;  %2077 = vmatprep.subr.bf16.mxu0 %v2076_v12 }
  0x77   : > { %2109 = vmatprep.subr.bf16.mxu1 %v2108_v18 }
  0x79   : > { %2079 = vmatpush3.bf16.msra.mxu0 %v2078_v22 }
  0x7a   : > { %2111 = vmatpush3.bf16.msra.mxu1 %v2110_v23  ;;  %2113 = vmatprep.subr.bf16.mxu0 %v2112_v24 }
  0x7c   : > { %1117 = vmatmul.mubr.f32.vlgmr.msra.gmra.mrb[4].mxu0 %v2522_v15  ;;  %v2122_v15 = vpack.c.bf16 %v668_v41, %v667_v40  ;;  %v1281_v40 = vld [vmem:[%s2735_s6 + $0x10] sm:$0xff] (!%p1578_p6)  ;;  %v2240_v41 = vmov (!%p1578_p6), 0.0|0.0  }
  0x7d   : > { %2115 = vmatpush3.bf16.msra.mxu0 %v2114_v31  ;;  %1187 = vmatmul.mubr.f32.vlgmr.msra.gmra.mrb[4].mxu1 %v2533_v27  ;;  %v670_v27 = vld [vmem:[%s2334_s15 + $0x638] sm:$0xff] }
  0x7e   : > { %2117 = vmatprep.subr.bf16.mxu0 %v2116_v32  ;;  %1256 = vmatprep.mubr.f32.mxu0 %v757_v36  ;;  %v2126_v48 = vpack.c.bf16 %v670_v27, %v669_v45  ;;  %v470_v36 = vld [vmem:[#allocation2] sm:$0x3]  ;;  %v1284_v27 = vld [vmem:[%s2735_s6 + $0x28] sm:$0xff] (!%p1578_p6) }
  0x7f   : > { %2165 = vmatprep.subr.bf16.mxu1 (!%p1578_p6), %v2240_v41  ;;  %v1283_v45 = vld [vmem:[%s2735_s6 + $0x20] sm:$0xff] (!%p1578_p6) }
  0x80   : > { %v2151_v50 = vpack.c.bf16 (!%p1578_p6), %v1284_v27, %v1283_v45  ;;  %2167 = vmatpush3.bf16.msra.mxu1 (!%p1578_p6), %v2166_v51 }
  0x81   : > { %2119 = vmatpush3.bf16.msra.mxu0 %v2118_v38  ;;  %v1279_v38 = vld [vmem:[%s2735_s6] sm:$0xff] (!%p1578_p6)  ;;  %2168 = vmatprep.subr.bf16.mxu1 (!%p1578_p6), %v2240_v41 }
  0x82   : > { %2121 = vmatprep.subr.bf16.mxu0 %v2120_v39  ;;  %v1280_v39 = vld [vmem:[%s2735_s6 + $0x8] sm:$0xff] (!%p1578_p6) }
  0x83   : > { %v2145_v42 = vpack.c.bf16 (!%p1578_p6), %v1280_v39, %v1279_v38 }
  0x85   : > { %2123 = vmatpush3.bf16.msra.mxu0 %v2122_v15  ;;  %v2242_v15 = vmov (!%p1578_p6), 0.0  }
  0x86   : > { %2125 = vmatprep.subr.bf16.mxu0 %v2124_v44  ;;  %1917 = vmatprep.mubr.msk.f32.mxu1 (!%p1578_p6), %vm2241_vm2, %v2242_v15  ;;  %v2148_v44 = vpack.c.bf16 (!%p1578_p6), %v1282_v43, %v1281_v40 }
  0x89   : > { %2127 = vmatpush3.bf16.msra.mxu0 %v2126_v48  ;;  %v1378_v48 = vld [vmem:[%s2737_s8 + $0x10] sm:$0xff] (!%p1578_p6) }
  0x8a   : > { %2129 = vmatprep.subr.bf16.mxu0 %v2128_v49  ;;  %v1379_v49 = vld [vmem:[%s2737_s8 + $0x18] sm:$0xff] (!%p1578_p6) }
  0x8d   : > { %2131 = vmatpush3.bf16.msra.mxu0 %v2130_v54  ;;  %v2169_v54 = vpack.c.bf16 (!%p1578_p6), %v1379_v49, %v1378_v48 }
  0x8e   : > { %2133 = vmatprep.subr.bf16.mxu0 %v2132_v55  ;;  %v1380_v55 = vld [vmem:[%s2737_s8 + $0x20] sm:$0xff] (!%p1578_p6) }
  0x8f   : > { %2170 = vmatpush3.bf16.msra.mxu1 (!%p1578_p6), %v2169_v54 }
  0x90   : > { %2171 = vmatprep.subr.bf16.mxu1 (!%p1578_p6), %v2240_v41 }
  0x91   : > { %2135 = vmatpush3.bf16.msra.mxu0 %v2134_v60  ;;  %v2172_v60 = vpack.c.bf16 (!%p1578_p6), %v1381_v56, %v1380_v55 }
  0x92   : > { %2137 = vmatprep.subr.bf16.mxu0 %v2136_v61  ;;  %v1382_v61 = vld [vmem:[%s2737_s8 + $0x30] sm:$0xff] (!%p1578_p6) }
  0x93   : > { %2173 = vmatpush3.bf16.msra.mxu1 (!%p1578_p6), %v2172_v60 }
  0x94   : > { %2174 = vmatprep.subr.bf16.mxu1 (!%p1578_p6), %v2240_v41 }
  0x95   : > { %2139 = vmatpush3.bf16.msra.mxu0 %v2138_v3  ;;  %v2175_v3 = vpack.c.bf16 (!%p1578_p6), %v1383_v62, %v1382_v61 }
  0x96   : > { %2141 = vmatprep.subr.bf16.mxu0 %v2140_v4  ;;  %v2160_v4 = vpack.c.bf16 (!%p1578_p6), %v1290_v2, %v1289_v1 }
  0x97   : > { %2176 = vmatpush3.bf16.msra.mxu1 (!%p1578_p6), %v2175_v3 }
  0x98   : > { %2177 = vmatprep.subr.bf16.mxu1 (!%p1578_p6), %v2240_v41 }
  0x99   : > { %2143 = vmatpush3.bf16.msra.mxu0 %v2142_v6 }
  0x9a   : > { %2144 = vmatprep.subr.bf16.mxu0 (!%p1578_p6), %v2240_v41 }
  0x9c   : > { %1257 = vmatmul.mubr.f32.vlgmr.msra.gmra.mrb[6].mxu0 %v2576_v28 }
  0x9d   : > { %1892 = vmatprep.mubr.msk.f32.mxu0 (!%p1578_p6), %vm2241_vm2, %v2242_v15  ;;  %2146 = vmatpush3.bf16.msra.mxu0 (!%p1578_p6), %v2145_v42 }
  0x9e   : > { %2147 = vmatprep.subr.bf16.mxu0 (!%p1578_p6), %v2240_v41 }
  0xa1   : > { %2149 = vmatpush3.bf16.msra.mxu0 (!%p1578_p6), %v2148_v44 }
  0xa2   : > { %2150 = vmatprep.subr.bf16.mxu0 (!%p1578_p6), %v2240_v41 }
  0xa5   : > { %2152 = vmatpush3.bf16.msra.mxu0 (!%p1578_p6), %v2151_v50 }
  0xa6   : > { %2153 = vmatprep.subr.bf16.mxu0 (!%p1578_p6), %v2240_v41 }
  0xa9   : > { %2155 = vmatpush3.bf16.msra.mxu0 (!%p1578_p6), %v2154_v57 }
  0xaa   : > { %2156 = vmatprep.subr.bf16.mxu0 (!%p1578_p6), %v2240_v41 }
  0xad   : > { %2158 = vmatpush3.bf16.msra.mxu0 (!%p1578_p6), %v2157_v0 }
  0xae   : > { %2159 = vmatprep.subr.bf16.mxu0 (!%p1578_p6), %v2240_v41 }
  0xb1   : > { %2161 = vmatpush3.bf16.msra.mxu0 (!%p1578_p6), %v2160_v4 }
  0xb2   : > { %2162 = vmatprep.subr.bf16.mxu0 (!%p1578_p6), %v2240_v41 }
 0x10f   : > { %v1621_v7 = vpop.f32.mrb[0].mxu0 }
 0x110   : > { %v1656_v9 = vpop.f32.mrb[0].mxu1  ;;  %v1622_v10 = vpop.f32.mrb[1].mxu0 }
 0x111   : > { %v1623_v11 = vadd.f32 %v1622_v10, %v1621_v7  ;;  %v1657_v8 = vpop.f32.mrb[1].mxu1  ;;  %v1579_v7 = vld [vmem:[%s2734_s5] ss:$0 sm:$0xff] (!%p1578_p6) }
 0x112   : > { %v1658_v12 = vadd.f32 %v1657_v8, %v1656_v9  ;;  %v2163_v9 = vpack.c.bf16 (!%p1578_p6), %v1292_v63, %v1291_v5 }
 0x114   : > { %v909_v13 = vadd.f32 %v1658_v12, %v1623_v11  ;;  %2164 = vmatpush3.bf16.msra.mxu0 (!%p1578_p6), %v2163_v9  ;;  %v1293_v11 = vld [vmem:[%s2735_s6 + $0x70] sm:$0xff] (!%p1578_p6)  ;;  %v1384_v12 = vld [vmem:[%s2737_s8 + $0x40] sm:$0xff] (!%p1578_p6) }
 0x115   : > { %1890 = vmatprep.subr.mxu0 (!%p1578_p6), %v2242_v15 }
 0x118   : > { %1891 = vmatpush3.msra.mxu0 (!%p1578_p6), %v1293_v11 }
 0x12f   : > { %v1691_v14 = vpop.f32.mrb[2].mxu0 }
 0x130   : > { %v1692_v16 = vpop.f32.mrb[3].mxu0  ;;  %v1726_v17 = vpop.f32.mrb[2].mxu1 }
 0x131   : > { %v1693_v18 = vadd.f32 %v1692_v16, %v1691_v14  ;;  %v1727_v19 = vpop.f32.mrb[3].mxu1  ;;  %v1386_v16 = vld [vmem:[%s2737_s8 + $0x50] sm:$0xf] (!%p1578_p6) }
 0x132   : > { %v1728_v20 = vadd.f32 %v1727_v19, %v1726_v17  ;;  %v1580_v17 = vld [vmem:[%s2736_s7] ss:$0 sm:$0xff] (!%p1578_p6) }
 0x133   : > { %v979_v21 = vadd.f32 %v1693_v18, %v909_v13  ;;  %v1385_v13 = vld [vmem:[%s2737_s8 + $0x48] sm:$0xff] (!%p1578_p6) }
 0x134   : > { %v2178_v14 = vpack.c.bf16 (!%p1578_p6), %v1385_v13, %v1384_v12 }
 0x135   : > { %v1049_v22 = vadd.f32 %v1728_v20, %v979_v21 }
 0x136   : > { %2179 = vmatpush3.bf16.msra.mxu1 (!%p1578_p6), %v2178_v14 }
 0x137   : > { %1915 = vmatprep.subr.mxu1 (!%p1578_p6), %v2242_v15 }
 0x13a   : > { %1916 = vmatpush3.msk.msra.mxu1 (!%p1578_p6), %vm1398_vm4, %v1386_v16 }
 0x14f   : > { %v1761_v23 = vpop.f32.mrb[4].mxu0 }
 0x150   : > { %v1762_v24 = vpop.f32.mrb[5].mxu0  ;;  %v1796_v25 = vpop.f32.mrb[4].mxu1 }
 0x151   : > { %v1763_v26 = vadd.f32 %v1762_v24, %v1761_v23  ;;  %v1797_v28 = vpop.f32.mrb[5].mxu1 }
 0x152   : > { %v1798_v29 = vadd.f32 %v1797_v28, %v1796_v25 }
 0x153   : > { %v1119_v30 = vadd.f32 %v1763_v26, %v1049_v22  ;;  %v1582_v22 = vld [vmem:[%s2738_s9] ss:$0 sm:$0xff] (!%p1578_p6) }
 0x155   : > { %v1189_v31 = vadd.f32 %v1798_v29, %v1119_v30 }
 0x16f   : > { %v1831_v32 = vpop.f32.mrb[6].mxu0 }
 0x170   : > { %v1832_v33 = vpop.f32.mrb[7].mxu0 }
 0x171   : > { %v1833_v35 = vadd.f32 %v1832_v33, %v1831_v32  ;;  %1268 = sbr.rel (%p1578_p6) target bundleno = 818 (0x332), region = 68 }
 0x173   : > { %v1259_v37 = vadd.f32 %v1833_v35, %v1189_v31 }
 0x175   : > { %v1262_v34 = vadd.f32 %v1259_v37, %v470_v36 }
 0x177   : > { %1264 = vst.msk [vmem:[#allocation2] sm:$0x3] %vm1263_vm1, %v1262_v34 }
 0x17e   : > { %v1269_v6 = vld [vmem:[#allocation2] sm:$0x3] }
 0x17f   : > { %v1277_v10 = vadd.f32 %v1579_v7, %v1269_v6 }
 0x181   : > { %v1278_v8 = vmax.f32 %v1277_v10, 0.0 }
 0x183   : > { %1893 = vmatmul.mubr.msk.f32.vlgmr.msra.gmra.mrb[0].mxu0 %vm1301_vm3, %v1278_v8 }
 0x256   : > { %v1371_v18 = vpop.f32.mrb[0].mxu0 }
 0x257   : > { %v1372_v19 = vadd.f32 %v1580_v17, %v1371_v18  ;;  %v1894_v20 = vpop.f32.mrb[1].mxu0 }
 0x259   : > { %v1375_v21 = vmax.f32 %v1372_v19, 0.0 }
 0x25b   : > { %1918 = vmatmul.mubr.msk.f32.vlgmr.msra.gmra.mrb[0].mxu1 %vm1394_vm5, %v1375_v21 }
 0x32e   : > { %v1468_v23 = vpop.f32.mrb[0].mxu1 }
 0x32f   : > { %v1469_v24 = vadd.f32 %v1582_v22, %v1468_v23  ;;  %v1919_v25 = vpop.f32.mrb[1].mxu1 }
 0x331   : > { %1473 = vst.msk [vmem:[#allocation3] sm:$0x3] %vm1472_vm6, %v1469_v24 }
 0x332 PF: > { %p2184_p7 = scmp.eq.s32.totalorder %s2305_s14, 6  ;;  %s2243_s20 = smov [#allocation3]  }
 0x333   : > { %s1481_s21 = sshll.u32 %s2243_s20, 4  ;;  %s1482_s21 = int_to_ptr.vmem [resolvable:$true] %s1481_s21 }
 0x334   : > { %s2200_s22 = scalar_lea.vmem %s1482_s21, 32  ;;  %p2207_p11 = scmp.lt.s32.totalorder %s1482_s21, %s1482_s21 }
 0x335   : > { %p2201_p8 = scmp.ne.s32.totalorder %s1482_s21, %s2200_s22  ;;  %p2208_p12 = scmp.lt.s32.totalorder %s2200_s22, %s2200_s22 }
 0x337   : > { %p2202_p9 = pnand %p2201_p8, %p2184_p7  ;;  %p2209_p13 = por %p2208_p12, %p2207_p11 }
 0x339   : > { %p2203_p10 = pneg %p2202_p9 }
 0x33b   : > { %p2210_p0 = pnand %p2209_p13, %p2203_p10 }
 0x33d   : > { %2213 = shalt.err (!%p2210_p0)
}
 0x33e   : > { %s2214_s25 = scalar_lea.hbm %s2739_s10, 32 }
 0x33f   : > { %p2215_p1 = scmp.ne.s32.totalorder %s2739_s10, %s2214_s25  ;;  %p2220_p4 = scmp.lt.u32.totalorder %s2214_s25, %s2739_s10 }
 0x341   : > { %p2216_p2 = pnand %p2215_p1, %p2184_p7 }
 0x343   : > { %p2217_p3 = pneg %p2216_p2 }
 0x345   : > { %p2222_p5 = pnand %p2220_p4, %p2217_p3 }
 0x347   : > { %2225 = shalt.err (!%p2222_p5)
}
 0x348   : > { %2181 = dma.vmem_to_hbm [thread:$0]  (%p2184_p7), %s1482_s21, 32, %s2739_s10, [#allocation4]  }
 0x349   : > { %2231 = dma.done.wait (%p2184_p7), [#allocation4], 32  }
 0x34a   : > { %2233 = vsyncadd (%p2184_p7), [#allocation4], 4294967264 }
 0x34b PF: > { %s21_s13 = sadd.s32 1, %s2236_s13  }
 0x34c   : > { %p18_p6 = scmp.ge.s32.totalorder %s21_s13, 9  }
 0x34e   :  { %20 = sbr.rel (!%p18_p6) target bundleno = 1 (0x1), region = 107 }
 0x355   :  { %1494 = vsyncpa [#allocation4], 1 }
 0x356   :  { %1496 = vsyncpa [#allocation4 + $0x1], 1 }

</bundles_post_ra>
